<compile_context>
chip_gen: v7x
topology: tpu7x:2x2x1
jax: 0.10.0
libtpu: 0.0.40
codegen_flags: <defaults>
</compile_context>

<pallas_src>
import numpy as np
import jax
import jax.numpy as jnp
from jax.experimental import pallas as pl
from jax.experimental.pallas import tpu as pltpu

# --------------------------- model configuration ----------------------------
EMBED = 32          # embed_size
HEADS = 4           # num_heads
HEAD_DIM = EMBED // HEADS
FFN = 64            # forward_expansion (hidden width of the MLP)
LAYERS = 2          # num_layers
BATCH = 2
SEQ = 8
LN_EPS = 1e-5       # PyTorch LayerNorm default
INV_SCALE = 1.0 / (EMBED ** 0.5)
# 1/sqrt(E) is folded into wq, so the masked additive bias is pre-scaled too:
# it lands exactly on -1e20/sqrt(E), same as the reference masked_fill + divide.
MASK_NEG = -1e20 * INV_SCALE


# ------------------------------ fused Pallas kernel --------------------------
def _fused_decoder_kernel(x_ref, enc_ref, tbias_ref, sbias_ref,
                          wqkv_ref, wo_ref, w1_ref, w2_ref, vece_ref, vecf_ref,
                          out_ref, cat_ref):
    """All decoder layers for the whole (sublane-fused) batch in one shot."""
    E, D = EMBED, HEAD_DIM

    x = x_ref[...].astype(jnp.float32)        # (N*S, E)
    enc = enc_ref[...].astype(jnp.float32)    # (N*S, E)
    tbias = tbias_ref[...]                    # (N*S, N*S) additive, pre-scaled
    sbias = sbias_ref[...]                    # (N*S, N*S)

    def attend(q, k, v, bias, wo, bo):
        # One K transpose per attention (not per head): every per-head logits
        # dot is then a standard (M,K)x(K,N) contraction.
        kt = k.T                               # (E, N*S)
        for h in range(HEADS):                 # static unroll
            lo, hi = h * D, (h + 1) * D
            logits = jnp.dot(q[:, lo:hi], kt[lo:hi, :],
                             preferred_element_type=jnp.float32) + bias
            logits = logits - jnp.max(logits, axis=-1, keepdims=True)
            p = jnp.exp(logits)
            inv_den = pl.reciprocal(jnp.sum(p, axis=-1, keepdims=True),
                                    approx=True)          # EUP vrcp
            # head output lands in its 8-lane slot of the scratch buffer.
            cat_ref[:, lo:hi] = jnp.dot(p * inv_den, v[:, lo:hi],
                                        preferred_element_type=jnp.float32)
        # single fc_out matmul over the concatenated heads
        return jnp.dot(cat_ref[...], wo,
                       preferred_element_type=jnp.float32) + bo

    def add_ln(a, res, gamma, beta):
        y = a + res
        mean = jnp.mean(y, axis=-1, keepdims=True)
        var = jnp.mean((y - mean) ** 2, axis=-1, keepdims=True)
        return (y - mean) * jax.lax.rsqrt(var + LN_EPS) * gamma + beta

    for l in range(LAYERS):                    # static unroll, L=2
        wqkv = wqkv_ref[l]                     # (E, 3E); 1/sqrt(E) folded in Q block
        wo = wo_ref[l]                         # (E, E)
        vecs = vece_ref[l]                     # (8, E)
        bo, g1, be1 = vecs[0:1], vecs[1:2], vecs[2:3]
        g2, be2, g3 = vecs[3:4], vecs[4:5], vecs[5:6]
        be3, b2 = vecs[6:7], vecs[7:8]
        w1 = w1_ref[l]                         # (E, F)
        w2 = w2_ref[l]                         # (F, E)
        b1 = vecf_ref[l]                       # (1, F)

        # ---- self-attention: values=x, keys=x, queries=x, tgt mask ----
        qkv = jnp.dot(x, wqkv, preferred_element_type=jnp.float32)   # fused QKV
        a = attend(qkv[:, :E], qkv[:, E:2 * E], qkv[:, 2 * E:], tbias, wo, bo)
        x = add_ln(a, x, g1, be1)              # TODO(synk): dropout == identity

        # ---- cross-attention, reference argument order preserved:
        #      self.attention(x, enc, enc, src_mask) -> values=x, keys=enc, queries=enc
        qk = jnp.dot(enc, wqkv[:, :2 * E], preferred_element_type=jnp.float32)
        v = jnp.dot(x, wqkv[:, 2 * E:], preferred_element_type=jnp.float32)
        a = attend(qk[:, :E], qk[:, E:], v, sbias, wo, bo)
        x = add_ln(a, x, g2, be2)

        # ---- feed-forward ----
        hid = jnp.maximum(
            jnp.dot(x, w1, preferred_element_type=jnp.float32) + b1, 0.0)
        f = jnp.dot(hid, w2, preferred_element_type=jnp.float32) + b2
        x = add_ln(f, x, g3, be3)

    out_ref[...] = x.astype(out_ref.dtype)


# ------------------------------ Pallas wrapper --------------------------------
def _block_diag_bias(mask):
    """(N,1,S,S) {0,1} mask -> (N*S, N*S) additive bias.

    0 where attention is allowed (same batch element AND unmasked),
    MASK_NEG everywhere else (cross-batch blocks or masked positions).
    Computed once per forward in plain JAX; only this tiny tensor reaches
    the kernel (no per-layer/per-head compare+select, no mask DMA).
    """
    N, _, Sq, Sk = mask.shape
    keep_in_batch = (mask[:, 0] != 0)                      # (N, Sq, Sk)
    same_batch = jnp.eye(N, dtype=bool)                    # (N, N)
    keep = same_batch[:, None, :, None] & keep_in_batch[:, :, None, :]
    return jnp.where(keep, 0.0, MASK_NEG).astype(jnp.float32).reshape(N * Sq, N * Sk)


def transformer_decoder_pallas(x, enc_out, src_mask, tgt_mask, prep):
    """Fused forward of the whole TransformerDecoder (single pallas_call)."""
    N, Sq, E = x.shape
    Nk, Sk, Ek = enc_out.shape
    # Cross-attention (values=x, keys=enc, queries=enc) + residual add require
    # matching lengths; batch fusion requires matching batch sizes.
    assert N == Nk and Sq == Sk and E == Ek == EMBED, "shape mismatch"

    x2 = x.reshape(N * Sq, E)
    enc2 = enc_out.reshape(N * Sk, E)
    tbias = _block_diag_bias(tgt_mask)
    sbias = _block_diag_bias(src_mask)

    out = pl.pallas_call(
        _fused_decoder_kernel,
        out_shape=jax.ShapeDtypeStruct((N * Sq, E), jnp.float32),
        scratch_shapes=[pltpu.VMEM((N * Sq, E), jnp.float32)],  # head-concat buffer
    )(x2, enc2, tbias, sbias,
      prep["wqkv"], prep["wo"], prep["w1"], prep["w2"],
      prep["vece"], prep["vecf"])
    return out.reshape(N, Sq, E)


# ------------------------ one-time weight preparation -------------------------
def prepare_params(params):
    """Expand per-head weights to block-diag (E,E), pack Q|K|V into one (E,3E)
    matrix (1/sqrt(E) folded into the Q block), transpose, stack per layer.
    Runs ONCE, outside the jitted forward."""
    eye_h = jnp.eye(HEADS, dtype=jnp.float32)
    wqkv_l, wo_l, w1_l, w2_l, vece_l, vecf_l = [], [], [], [], [], []
    for lp in params["layers"]:
        ap = lp["attn"]
        wq_t = jnp.kron(eye_h, ap["wq"].T) * jnp.float32(INV_SCALE)
        wk_t = jnp.kron(eye_h, ap["wk"].T)
        wv_t = jnp.kron(eye_h, ap["wv"].T)
        wqkv_l.append(jnp.concatenate([wq_t, wk_t, wv_t], axis=1))   # (E, 3E)
        wo_l.append(ap["wo"].T)                                      # (E, E)
        w1_l.append(lp["ff"]["w1"].T)                                # (E, F)
        w2_l.append(lp["ff"]["w2"].T)                                # (F, E)
        vece_l.append(jnp.stack([ap["bo"],
                                 lp["norm1"]["gamma"], lp["norm1"]["beta"],
                                 lp["norm2"]["gamma"], lp["norm2"]["beta"],
                                 lp["norm3"]["gamma"], lp["norm3"]["beta"],
                                 lp["ff"]["b2"]]))                   # (8, E)
        vecf_l.append(lp["ff"]["b1"].reshape(1, FFN))                # (1, F)
    return dict(wqkv=jnp.stack(wqkv_l).astype(jnp.float32),
                wo=jnp.stack(wo_l).astype(jnp.float32),
                w1=jnp.stack(w1_l).astype(jnp.float32),
                w2=jnp.stack(w2_l).astype(jnp.float32),
                vece=jnp.stack(vece_l).astype(jnp.float32),
                vecf=jnp.stack(vecf_l).astype(jnp.float32))


# --------------------------- pure-JAX reference ------------------------------
def _mha_ref(values, keys, queries, mask, ap):
    N, Vl, _ = values.shape
    Kl, Ql = keys.shape[1], queries.shape[1]
    v = values.reshape(N, Vl, HEADS, HEAD_DIM) @ ap["wv"].T
    k = keys.reshape(N, Kl, HEADS, HEAD_DIM) @ ap["wk"].T
    q = queries.reshape(N, Ql, HEADS, HEAD_DIM) @ ap["wq"].T
    energy = jnp.einsum("nqhd,nkhd->nhqk", q, k)
    energy = jnp.where(mask == 0, -1e20, energy)
    attn = jax.nn.softmax(energy / (EMBED ** 0.5), axis=3)
    out = jnp.einsum("nhql,nlhd->nqhd", attn, v).reshape(N, Ql, EMBED)
    return out @ ap["wo"].T + ap["bo"]


def _ln_ref(y, np_):
    mean = jnp.mean(y, axis=-1, keepdims=True)
    var = jnp.mean((y - mean) ** 2, axis=-1, keepdims=True)
    return (y - mean) / jnp.sqrt(var + LN_EPS) * np_["gamma"] + np_["beta"]


def _decoder_ref(x, enc_out, src_mask, tgt_mask, params):
    for lp in params["layers"]:
        a = _mha_ref(x, x, x, tgt_mask, lp["attn"])
        x = _ln_ref(a + x, lp["norm1"])
        a = _mha_ref(x, enc_out, enc_out, src_mask, lp["attn"])
        x = _ln_ref(a + x, lp["norm2"])
        f = x @ lp["ff"]["w1"].T + lp["ff"]["b1"]
        f = jnp.maximum(f, 0.0)
        f = f @ lp["ff"]["w2"].T + lp["ff"]["b2"]
        x = _ln_ref(f + x, lp["norm3"])
    return x


# ------------------------------ parameter init -------------------------------
def init_params(key):
    keys = iter(jax.random.split(key, 16 * LAYERS + 4))

    def nrm(shape, scale=0.05):
        return scale * jax.random.normal(next(keys), shape, jnp.float32)

    layers = []
    for _ in range(LAYERS):
        layers.append(dict(
            attn=dict(wq=nrm((HEAD_DIM, HEAD_DIM)),
                      wk=nrm((HEAD_DIM, HEAD_DIM)),
                      wv=nrm((HEAD_DIM, HEAD_DIM)),
                      wo=nrm((EMBED, HEADS * HEAD_DIM)),
                      bo=nrm((EMBED,))),
            norm1=dict(gamma=1.0 + nrm((EMBED,)), beta=nrm((EMBED,))),
            norm2=dict(gamma=1.0 + nrm((EMBED,)), beta=nrm((EMBED,))),
            norm3=dict(gamma=1.0 + nrm((EMBED,)), beta=nrm((EMBED,))),
            ff=dict(w1=nrm((FFN, EMBED)), b1=nrm((FFN,)),
                    w2=nrm((EMBED, FFN)), b2=nrm((EMBED,))),
        ))
    return dict(layers=layers)


# ------------------------------------ main -----------------------------------
if __name__ == "__main__":
    root = jax.random.PRNGKey(0)
    kp, kx, ke = jax.random.split(root, 3)
    params = init_params(kp)
    prep = prepare_params(params)   # one-time kron/pack/transpose/stack of weights

    x = jax.random.normal(kx, (BATCH, SEQ, EMBED), jnp.float32)
    enc_out = jax.random.normal(ke, (BATCH, SEQ, EMBED), jnp.float32)
    tgt_mask = jnp.broadcast_to(
        jnp.tril(jnp.ones((SEQ, SEQ), jnp.float32)), (BATCH, 1, SEQ, SEQ))
    src_mask = jnp.ones((BATCH, 1, SEQ, SEQ), jnp.float32)

    run = jax.jit(transformer_decoder_pallas)
    out = jax.block_until_ready(run(x, enc_out, src_mask, tgt_mask, prep))
    assert out.shape == (BATCH, SEQ, EMBED) and out.dtype == jnp.float32

    ref = jax.block_until_ready(_decoder_ref(x, enc_out, src_mask, tgt_mask, params))
    # Tolerance relaxed vs 1e-4 to absorb the approx-reciprocal softmax and
    # MXU-vs-XLA f32 matmul accumulation differences; real bugs are >> 1e-2.
    np.testing.assert_allclose(np.asarray(out), np.asarray(ref),
                               atol=1e-3, rtol=1e-3)
    print("KERNEL_OK")
</pallas_src>

<mosaic_0001>
module attributes {stable_mosaic.version = 11 : i64} {
  func.func @_fused_decoder_kernel(%arg0: memref<16x32xf32, #tpu.memory_space<vmem>>, %arg1: memref<16x32xf32, #tpu.memory_space<vmem>>, %arg2: memref<16x16xf32, #tpu.memory_space<vmem>>, %arg3: memref<16x16xf32, #tpu.memory_space<vmem>>, %arg4: memref<2x32x96xf32, #tpu.memory_space<vmem>>, %arg5: memref<2x32x32xf32, #tpu.memory_space<vmem>>, %arg6: memref<2x32x64xf32, #tpu.memory_space<vmem>>, %arg7: memref<2x64x32xf32, #tpu.memory_space<vmem>>, %arg8: memref<2x8x32xf32, #tpu.memory_space<vmem>>, %arg9: memref<2x1x64xf32, #tpu.memory_space<vmem>>, %arg10: memref<16x32xf32, #tpu.memory_space<vmem>>, %arg11: memref<16x32xf32, #tpu.memory_space<vmem>>) attributes {dimension_semantics = [], scalar_prefetch = 0 : i64, scratch_operands = 1 : i64, tpu.core_type = #tpu.core_type<tc>} {
    %c0 = arith.constant 0 : index
    %c0_0 = arith.constant 0 : index
    %0 = vector.load %arg0[%c0, %c0_0] : memref<16x32xf32, #tpu.memory_space<vmem>>, vector<16x32xf32>
    %c0_1 = arith.constant 0 : index
    %c0_2 = arith.constant 0 : index
    %1 = vector.load %arg1[%c0_1, %c0_2] : memref<16x32xf32, #tpu.memory_space<vmem>>, vector<16x32xf32>
    %c0_3 = arith.constant 0 : index
    %c0_4 = arith.constant 0 : index
    %2 = vector.load %arg2[%c0_3, %c0_4] : memref<16x16xf32, #tpu.memory_space<vmem>>, vector<16x16xf32>
    %c0_5 = arith.constant 0 : index
    %c0_6 = arith.constant 0 : index
    %3 = vector.load %arg3[%c0_5, %c0_6] : memref<16x16xf32, #tpu.memory_space<vmem>>, vector<16x16xf32>
    %c0_7 = arith.constant 0 : index
    %c0_8 = arith.constant 0 : index
    %c0_9 = arith.constant 0 : index
    %4 = vector.load %arg4[%c0_7, %c0_8, %c0_9] : memref<2x32x96xf32, #tpu.memory_space<vmem>>, vector<1x32x96xf32>
    %5 = vector.shape_cast %4 : vector<1x32x96xf32> to vector<32x96xf32>
    %c0_10 = arith.constant 0 : index
    %c0_11 = arith.constant 0 : index
    %c0_12 = arith.constant 0 : index
    %6 = vector.load %arg5[%c0_10, %c0_11, %c0_12] : memref<2x32x32xf32, #tpu.memory_space<vmem>>, vector<1x32x32xf32>
    %7 = vector.shape_cast %6 : vector<1x32x32xf32> to vector<32x32xf32>
    %c0_13 = arith.constant 0 : index
    %c0_14 = arith.constant 0 : index
    %c0_15 = arith.constant 0 : index
    %8 = vector.load %arg8[%c0_13, %c0_14, %c0_15] : memref<2x8x32xf32, #tpu.memory_space<vmem>>, vector<1x8x32xf32>
    %9 = vector.shape_cast %8 : vector<1x8x32xf32> to vector<8x32xf32>
    %10 = vector.extract_strided_slice %9 {offsets = [0, 0], sizes = [1, 32], strides = [1, 1]} : vector<8x32xf32> to vector<1x32xf32>
    %11 = vector.extract_strided_slice %9 {offsets = [1, 0], sizes = [1, 32], strides = [1, 1]} : vector<8x32xf32> to vector<1x32xf32>
    %12 = vector.extract_strided_slice %9 {offsets = [2, 0], sizes = [1, 32], strides = [1, 1]} : vector<8x32xf32> to vector<1x32xf32>
    %13 = vector.extract_strided_slice %9 {offsets = [3, 0], sizes = [1, 32], strides = [1, 1]} : vector<8x32xf32> to vector<1x32xf32>
    %14 = vector.extract_strided_slice %9 {offsets = [4, 0], sizes = [1, 32], strides = [1, 1]} : vector<8x32xf32> to vector<1x32xf32>
    %15 = vector.extract_strided_slice %9 {offsets = [5, 0], sizes = [1, 32], strides = [1, 1]} : vector<8x32xf32> to vector<1x32xf32>
    %16 = vector.extract_strided_slice %9 {offsets = [6, 0], sizes = [1, 32], strides = [1, 1]} : vector<8x32xf32> to vector<1x32xf32>
    %17 = vector.extract_strided_slice %9 {offsets = [7, 0], sizes = [1, 32], strides = [1, 1]} : vector<8x32xf32> to vector<1x32xf32>
    %c0_16 = arith.constant 0 : index
    %c0_17 = arith.constant 0 : index
    %c0_18 = arith.constant 0 : index
    %18 = vector.load %arg6[%c0_16, %c0_17, %c0_18] : memref<2x32x64xf32, #tpu.memory_space<vmem>>, vector<1x32x64xf32>
    %19 = vector.shape_cast %18 : vector<1x32x64xf32> to vector<32x64xf32>
    %c0_19 = arith.constant 0 : index
    %c0_20 = arith.constant 0 : index
    %c0_21 = arith.constant 0 : index
    %20 = vector.load %arg7[%c0_19, %c0_20, %c0_21] : memref<2x64x32xf32, #tpu.memory_space<vmem>>, vector<1x64x32xf32>
    %21 = vector.shape_cast %20 : vector<1x64x32xf32> to vector<64x32xf32>
    %c0_22 = arith.constant 0 : index
    %c0_23 = arith.constant 0 : index
    %c0_24 = arith.constant 0 : index
    %22 = vector.load %arg9[%c0_22, %c0_23, %c0_24] : memref<2x1x64xf32, #tpu.memory_space<vmem>>, vector<1x1x64xf32>
    %23 = vector.shape_cast %22 : vector<1x1x64xf32> to vector<1x64xf32>
    %cst = arith.constant dense<0.000000e+00> : vector<16x96xf32>
    %24 = tpu.matmul %0, %5, %cst {dimension_numbers = #tpu.dot_dimension_numbers<[1], [0], [0], [1], [0, 0, 1, 1], [], []>} : vector<16x32xf32>, vector<32x96xf32>, vector<16x96xf32> -> vector<16x96xf32>
    %25 = vector.extract_strided_slice %24 {offsets = [0, 0], sizes = [16, 32], strides = [1, 1]} : vector<16x96xf32> to vector<16x32xf32>
    %26 = vector.extract_strided_slice %24 {offsets = [0, 32], sizes = [16, 32], strides = [1, 1]} : vector<16x96xf32> to vector<16x32xf32>
    %27 = vector.extract_strided_slice %24 {offsets = [0, 64], sizes = [16, 32], strides = [1, 1]} : vector<16x96xf32> to vector<16x32xf32>
    %28 = tpu.transpose %26, [1, 0] : vector<16x32xf32> -> vector<32x16xf32>
    %29 = vector.extract_strided_slice %25 {offsets = [0, 0], sizes = [16, 8], strides = [1, 1]} : vector<16x32xf32> to vector<16x8xf32>
    %30 = vector.extract_strided_slice %28 {offsets = [0, 0], sizes = [8, 16], strides = [1, 1]} : vector<32x16xf32> to vector<8x16xf32>
    %cst_25 = arith.constant dense<0.000000e+00> : vector<16x16xf32>
    %31 = tpu.matmul %29, %30, %cst_25 {dimension_numbers = #tpu.dot_dimension_numbers<[1], [0], [0], [1], [0, 0, 1, 1], [], []>} : vector<16x8xf32>, vector<8x16xf32>, vector<16x16xf32> -> vector<16x16xf32>
    %32 = arith.addf %31, %2 : vector<16x16xf32>
    %cst_26 = arith.constant dense<0xFF800000> : vector<16xf32>
    %33 = vector.multi_reduction <maximumf>, %32, %cst_26 [1] : vector<16x16xf32> to vector<16xf32>
    %34 = vector.shape_cast %33 : vector<16xf32> to vector<16x1xf32>
    %35 = vector.broadcast %34 : vector<16x1xf32> to vector<16x16xf32>
    %36 = arith.subf %32, %35 : vector<16x16xf32>
    %37 = math.exp %36 : vector<16x16xf32>
    %cst_27 = arith.constant dense<0.000000e+00> : vector<16xf32>
    %38 = vector.multi_reduction <add>, %37, %cst_27 [1] : vector<16x16xf32> to vector<16xf32>
    %39 = vector.shape_cast %38 : vector<16xf32> to vector<16x1xf32>
    %40 = tpu.reciprocal %39 {approx = true} : vector<16x1xf32> -> vector<16x1xf32>
    %41 = vector.broadcast %40 : vector<16x1xf32> to vector<16x16xf32>
    %42 = arith.mulf %37, %41 : vector<16x16xf32>
    %43 = vector.extract_strided_slice %27 {offsets = [0, 0], sizes = [16, 8], strides = [1, 1]} : vector<16x32xf32> to vector<16x8xf32>
    %cst_28 = arith.constant dense<0.000000e+00> : vector<16x8xf32>
    %44 = tpu.matmul %42, %43, %cst_28 {dimension_numbers = #tpu.dot_dimension_numbers<[1], [0], [0], [1], [0, 0, 1, 1], [], []>} : vector<16x16xf32>, vector<16x8xf32>, vector<16x8xf32> -> vector<16x8xf32>
    %c0_29 = arith.constant 0 : index
    %c0_30 = arith.constant 0 : index
    %45 = vector.load %arg11[%c0_29, %c0_30] : memref<16x32xf32, #tpu.memory_space<vmem>>, vector<16x8xf32>
    tpu.vector_store %arg11[%c0_29, %c0_30], %44 {strides = array<i32>} : memref<16x32xf32, #tpu.memory_space<vmem>>, vector<16x8xf32>,
    %46 = vector.extract_strided_slice %25 {offsets = [0, 8], sizes = [16, 8], strides = [1, 1]} : vector<16x32xf32> to vector<16x8xf32>
    %47 = vector.extract_strided_slice %28 {offsets = [8, 0], sizes = [8, 16], strides = [1, 1]} : vector<32x16xf32> to vector<8x16xf32>
    %cst_31 = arith.constant dense<0.000000e+00> : vector<16x16xf32>
    %48 = tpu.matmul %46, %47, %cst_31 {dimension_numbers = #tpu.dot_dimension_numbers<[1], [0], [0], [1], [0, 0, 1, 1], [], []>} : vector<16x8xf32>, vector<8x16xf32>, vector<16x16xf32> -> vector<16x16xf32>
    %49 = arith.addf %48, %2 : vector<16x16xf32>
    %cst_32 = arith.constant dense<0xFF800000> : vector<16xf32>
    %50 = vector.multi_reduction <maximumf>, %49, %cst_32 [1] : vector<16x16xf32> to vector<16xf32>
    %51 = vector.shape_cast %50 : vector<16xf32> to vector<16x1xf32>
    %52 = vector.broadcast %51 : vector<16x1xf32> to vector<16x16xf32>
    %53 = arith.subf %49, %52 : vector<16x16xf32>
    %54 = math.exp %53 : vector<16x16xf32>
    %cst_33 = arith.constant dense<0.000000e+00> : vector<16xf32>
    %55 = vector.multi_reduction <add>, %54, %cst_33 [1] : vector<16x16xf32> to vector<16xf32>
    %56 = vector.shape_cast %55 : vector<16xf32> to vector<16x1xf32>
    %57 = tpu.reciprocal %56 {approx = true} : vector<16x1xf32> -> vector<16x1xf32>
    %58 = vector.broadcast %57 : vector<16x1xf32> to vector<16x16xf32>
    %59 = arith.mulf %54, %58 : vector<16x16xf32>
    %60 = vector.extract_strided_slice %27 {offsets = [0, 8], sizes = [16, 8], strides = [1, 1]} : vector<16x32xf32> to vector<16x8xf32>
    %cst_34 = arith.constant dense<0.000000e+00> : vector<16x8xf32>
    %61 = tpu.matmul %59, %60, %cst_34 {dimension_numbers = #tpu.dot_dimension_numbers<[1], [0], [0], [1], [0, 0, 1, 1], [], []>} : vector<16x16xf32>, vector<16x8xf32>, vector<16x8xf32> -> vector<16x8xf32>
    %c0_35 = arith.constant 0 : index
    %c8 = arith.constant 8 : index
    %62 = vector.load %arg11[%c0_35, %c8] : memref<16x32xf32, #tpu.memory_space<vmem>>, vector<16x8xf32>
    tpu.vector_store %arg11[%c0_35, %c8], %61 {strides = array<i32>} : memref<16x32xf32, #tpu.memory_space<vmem>>, vector<16x8xf32>,
    %63 = vector.extract_strided_slice %25 {offsets = [0, 16], sizes = [16, 8], strides = [1, 1]} : vector<16x32xf32> to vector<16x8xf32>
    %64 = vector.extract_strided_slice %28 {offsets = [16, 0], sizes = [8, 16], strides = [1, 1]} : vector<32x16xf32> to vector<8x16xf32>
    %cst_36 = arith.constant dense<0.000000e+00> : vector<16x16xf32>
    %65 = tpu.matmul %63, %64, %cst_36 {dimension_numbers = #tpu.dot_dimension_numbers<[1], [0], [0], [1], [0, 0, 1, 1], [], []>} : vector<16x8xf32>, vector<8x16xf32>, vector<16x16xf32> -> vector<16x16xf32>
    %66 = arith.addf %65, %2 : vector<16x16xf32>
    %cst_37 = arith.constant dense<0xFF800000> : vector<16xf32>
    %67 = vector.multi_reduction <maximumf>, %66, %cst_37 [1] : vector<16x16xf32> to vector<16xf32>
    %68 = vector.shape_cast %67 : vector<16xf32> to vector<16x1xf32>
    %69 = vector.broadcast %68 : vector<16x1xf32> to vector<16x16xf32>
    %70 = arith.subf %66, %69 : vector<16x16xf32>
    %71 = math.exp %70 : vector<16x16xf32>
    %cst_38 = arith.constant dense<0.000000e+00> : vector<16xf32>
    %72 = vector.multi_reduction <add>, %71, %cst_38 [1] : vector<16x16xf32> to vector<16xf32>
    %73 = vector.shape_cast %72 : vector<16xf32> to vector<16x1xf32>
    %74 = tpu.reciprocal %73 {approx = true} : vector<16x1xf32> -> vector<16x1xf32>
    %75 = vector.broadcast %74 : vector<16x1xf32> to vector<16x16xf32>
    %76 = arith.mulf %71, %75 : vector<16x16xf32>
    %77 = vector.extract_strided_slice %27 {offsets = [0, 16], sizes = [16, 8], strides = [1, 1]} : vector<16x32xf32> to vector<16x8xf32>
    %cst_39 = arith.constant dense<0.000000e+00> : vector<16x8xf32>
    %78 = tpu.matmul %76, %77, %cst_39 {dimension_numbers = #tpu.dot_dimension_numbers<[1], [0], [0], [1], [0, 0, 1, 1], [], []>} : vector<16x16xf32>, vector<16x8xf32>, vector<16x8xf32> -> vector<16x8xf32>
    %c0_40 = arith.constant 0 : index
    %c16 = arith.constant 16 : index
    %79 = vector.load %arg11[%c0_40, %c16] : memref<16x32xf32, #tpu.memory_space<vmem>>, vector<16x8xf32>
    tpu.vector_store %arg11[%c0_40, %c16], %78 {strides = array<i32>} : memref<16x32xf32, #tpu.memory_space<vmem>>, vector<16x8xf32>,
    %80 = vector.extract_strided_slice %25 {offsets = [0, 24], sizes = [16, 8], strides = [1, 1]} : vector<16x32xf32> to vector<16x8xf32>
    %81 = vector.extract_strided_slice %28 {offsets = [24, 0], sizes = [8, 16], strides = [1, 1]} : vector<32x16xf32> to vector<8x16xf32>
    %cst_41 = arith.constant dense<0.000000e+00> : vector<16x16xf32>
    %82 = tpu.matmul %80, %81, %cst_41 {dimension_numbers = #tpu.dot_dimension_numbers<[1], [0], [0], [1], [0, 0, 1, 1], [], []>} : vector<16x8xf32>, vector<8x16xf32>, vector<16x16xf32> -> vector<16x16xf32>
    %83 = arith.addf %82, %2 : vector<16x16xf32>
    %cst_42 = arith.constant dense<0xFF800000> : vector<16xf32>
    %84 = vector.multi_reduction <maximumf>, %83, %cst_42 [1] : vector<16x16xf32> to vector<16xf32>
    %85 = vector.shape_cast %84 : vector<16xf32> to vector<16x1xf32>
    %86 = vector.broadcast %85 : vector<16x1xf32> to vector<16x16xf32>
    %87 = arith.subf %83, %86 : vector<16x16xf32>
    %88 = math.exp %87 : vector<16x16xf32>
    %cst_43 = arith.constant dense<0.000000e+00> : vector<16xf32>
    %89 = vector.multi_reduction <add>, %88, %cst_43 [1] : vector<16x16xf32> to vector<16xf32>
    %90 = vector.shape_cast %89 : vector<16xf32> to vector<16x1xf32>
    %91 = tpu.reciprocal %90 {approx = true} : vector<16x1xf32> -> vector<16x1xf32>
    %92 = vector.broadcast %91 : vector<16x1xf32> to vector<16x16xf32>
    %93 = arith.mulf %88, %92 : vector<16x16xf32>
    %94 = vector.extract_strided_slice %27 {offsets = [0, 24], sizes = [16, 8], strides = [1, 1]} : vector<16x32xf32> to vector<16x8xf32>
    %cst_44 = arith.constant dense<0.000000e+00> : vector<16x8xf32>
    %95 = tpu.matmul %93, %94, %cst_44 {dimension_numbers = #tpu.dot_dimension_numbers<[1], [0], [0], [1], [0, 0, 1, 1], [], []>} : vector<16x16xf32>, vector<16x8xf32>, vector<16x8xf32> -> vector<16x8xf32>
    %c0_45 = arith.constant 0 : index
    %c24 = arith.constant 24 : index
    %96 = vector.load %arg11[%c0_45, %c24] : memref<16x32xf32, #tpu.memory_space<vmem>>, vector<16x8xf32>
    tpu.vector_store %arg11[%c0_45, %c24], %95 {strides = array<i32>} : memref<16x32xf32, #tpu.memory_space<vmem>>, vector<16x8xf32>,
    %c0_46 = arith.constant 0 : index
    %c0_47 = arith.constant 0 : index
    %97 = vector.load %arg11[%c0_46, %c0_47] : memref<16x32xf32, #tpu.memory_space<vmem>>, vector<16x32xf32>
    %cst_48 = arith.constant dense<0.000000e+00> : vector<16x32xf32>
    %98 = tpu.matmul %97, %7, %cst_48 {dimension_numbers = #tpu.dot_dimension_numbers<[1], [0], [0], [1], [0, 0, 1, 1], [], []>} : vector<16x32xf32>, vector<32x32xf32>, vector<16x32xf32> -> vector<16x32xf32>
    %99 = vector.broadcast %10 : vector<1x32xf32> to vector<16x32xf32>
    %100 = arith.addf %98, %99 : vector<16x32xf32>
    %101 = arith.addf %100, %0 : vector<16x32xf32>
    %cst_49 = arith.constant dense<0.000000e+00> : vector<16xf32>
    %102 = vector.multi_reduction <add>, %101, %cst_49 [1] : vector<16x32xf32> to vector<16xf32>
    %103 = vector.shape_cast %102 : vector<16xf32> to vector<16x1xf32>
    %cst_50 = arith.constant 3.200000e+01 : f32
    %104 = vector.broadcast %cst_50 : f32 to vector<16x1xf32>
    %105 = arith.divf %103, %104 : vector<16x1xf32>
    %106 = vector.broadcast %105 : vector<16x1xf32> to vector<16x32xf32>
    %107 = arith.subf %101, %106 : vector<16x32xf32>
    %108 = arith.mulf %107, %107 : vector<16x32xf32>
    %cst_51 = arith.constant dense<0.000000e+00> : vector<16xf32>
    %109 = vector.multi_reduction <add>, %108, %cst_51 [1] : vector<16x32xf32> to vector<16xf32>
    %110 = vector.shape_cast %109 : vector<16xf32> to vector<16x1xf32>
    %cst_52 = arith.constant 3.200000e+01 : f32
    %111 = vector.broadcast %cst_52 : f32 to vector<16x1xf32>
    %112 = arith.divf %110, %111 : vector<16x1xf32>
    %113 = vector.broadcast %105 : vector<16x1xf32> to vector<16x32xf32>
    %114 = arith.subf %101, %113 : vector<16x32xf32>
    %cst_53 = arith.constant 9.99999974E-6 : f32
    %115 = vector.broadcast %cst_53 : f32 to vector<16x1xf32>
    %116 = arith.addf %112, %115 : vector<16x1xf32>
    %117 = math.rsqrt %116 : vector<16x1xf32>
    %118 = vector.broadcast %117 : vector<16x1xf32> to vector<16x32xf32>
    %119 = arith.mulf %114, %118 : vector<16x32xf32>
    %120 = vector.broadcast %11 : vector<1x32xf32> to vector<16x32xf32>
    %121 = arith.mulf %119, %120 : vector<16x32xf32>
    %122 = vector.broadcast %12 : vector<1x32xf32> to vector<16x32xf32>
    %123 = arith.addf %121, %122 : vector<16x32xf32>
    %124 = vector.extract_strided_slice %5 {offsets = [0, 0], sizes = [32, 64], strides = [1, 1]} : vector<32x96xf32> to vector<32x64xf32>
    %cst_54 = arith.constant dense<0.000000e+00> : vector<16x64xf32>
    %125 = tpu.matmul %1, %124, %cst_54 {dimension_numbers = #tpu.dot_dimension_numbers<[1], [0], [0], [1], [0, 0, 1, 1], [], []>} : vector<16x32xf32>, vector<32x64xf32>, vector<16x64xf32> -> vector<16x64xf32>
    %126 = vector.extract_strided_slice %5 {offsets = [0, 64], sizes = [32, 32], strides = [1, 1]} : vector<32x96xf32> to vector<32x32xf32>
    %cst_55 = arith.constant dense<0.000000e+00> : vector<16x32xf32>
    %127 = tpu.matmul %123, %126, %cst_55 {dimension_numbers = #tpu.dot_dimension_numbers<[1], [0], [0], [1], [0, 0, 1, 1], [], []>} : vector<16x32xf32>, vector<32x32xf32>, vector<16x32xf32> -> vector<16x32xf32>
    %128 = vector.extract_strided_slice %125 {offsets = [0, 0], sizes = [16, 32], strides = [1, 1]} : vector<16x64xf32> to vector<16x32xf32>
    %129 = vector.extract_strided_slice %125 {offsets = [0, 32], sizes = [16, 32], strides = [1, 1]} : vector<16x64xf32> to vector<16x32xf32>
    %130 = tpu.transpose %129, [1, 0] : vector<16x32xf32> -> vector<32x16xf32>
    %131 = vector.extract_strided_slice %128 {offsets = [0, 0], sizes = [16, 8], strides = [1, 1]} : vector<16x32xf32> to vector<16x8xf32>
    %132 = vector.extract_strided_slice %130 {offsets = [0, 0], sizes = [8, 16], strides = [1, 1]} : vector<32x16xf32> to vector<8x16xf32>
    %cst_56 = arith.constant dense<0.000000e+00> : vector<16x16xf32>
    %133 = tpu.matmul %131, %132, %cst_56 {dimension_numbers = #tpu.dot_dimension_numbers<[1], [0], [0], [1], [0, 0, 1, 1], [], []>} : vector<16x8xf32>, vector<8x16xf32>, vector<16x16xf32> -> vector<16x16xf32>
    %134 = arith.addf %133, %3 : vector<16x16xf32>
    %cst_57 = arith.constant dense<0xFF800000> : vector<16xf32>
    %135 = vector.multi_reduction <maximumf>, %134, %cst_57 [1] : vector<16x16xf32> to vector<16xf32>
    %136 = vector.shape_cast %135 : vector<16xf32> to vector<16x1xf32>
    %137 = vector.broadcast %136 : vector<16x1xf32> to vector<16x16xf32>
    %138 = arith.subf %134, %137 : vector<16x16xf32>
    %139 = math.exp %138 : vector<16x16xf32>
    %cst_58 = arith.constant dense<0.000000e+00> : vector<16xf32>
    %140 = vector.multi_reduction <add>, %139, %cst_58 [1] : vector<16x16xf32> to vector<16xf32>
    %141 = vector.shape_cast %140 : vector<16xf32> to vector<16x1xf32>
    %142 = tpu.reciprocal %141 {approx = true} : vector<16x1xf32> -> vector<16x1xf32>
    %143 = vector.broadcast %142 : vector<16x1xf32> to vector<16x16xf32>
    %144 = arith.mulf %139, %143 : vector<16x16xf32>
    %145 = vector.extract_strided_slice %127 {offsets = [0, 0], sizes = [16, 8], strides = [1, 1]} : vector<16x32xf32> to vector<16x8xf32>
    %cst_59 = arith.constant dense<0.000000e+00> : vector<16x8xf32>
    %146 = tpu.matmul %144, %145, %cst_59 {dimension_numbers = #tpu.dot_dimension_numbers<[1], [0], [0], [1], [0, 0, 1, 1], [], []>} : vector<16x16xf32>, vector<16x8xf32>, vector<16x8xf32> -> vector<16x8xf32>
    %c0_60 = arith.constant 0 : index
    %c0_61 = arith.constant 0 : index
    %147 = vector.load %arg11[%c0_60, %c0_61] : memref<16x32xf32, #tpu.memory_space<vmem>>, vector<16x8xf32>
    tpu.vector_store %arg11[%c0_60, %c0_61], %146 {strides = array<i32>} : memref<16x32xf32, #tpu.memory_space<vmem>>, vector<16x8xf32>,
    %148 = vector.extract_strided_slice %128 {offsets = [0, 8], sizes = [16, 8], strides = [1, 1]} : vector<16x32xf32> to vector<16x8xf32>
    %149 = vector.extract_strided_slice %130 {offsets = [8, 0], sizes = [8, 16], strides = [1, 1]} : vector<32x16xf32> to vector<8x16xf32>
    %cst_62 = arith.constant dense<0.000000e+00> : vector<16x16xf32>
    %150 = tpu.matmul %148, %149, %cst_62 {dimension_numbers = #tpu.dot_dimension_numbers<[1], [0], [0], [1], [0, 0, 1, 1], [], []>} : vector<16x8xf32>, vector<8x16xf32>, vector<16x16xf32> -> vector<16x16xf32>
    %151 = arith.addf %150, %3 : vector<16x16xf32>
    %cst_63 = arith.constant dense<0xFF800000> : vector<16xf32>
    %152 = vector.multi_reduction <maximumf>, %151, %cst_63 [1] : vector<16x16xf32> to vector<16xf32>
    %153 = vector.shape_cast %152 : vector<16xf32> to vector<16x1xf32>
    %154 = vector.broadcast %153 : vector<16x1xf32> to vector<16x16xf32>
    %155 = arith.subf %151, %154 : vector<16x16xf32>
    %156 = math.exp %155 : vector<16x16xf32>
    %cst_64 = arith.constant dense<0.000000e+00> : vector<16xf32>
    %157 = vector.multi_reduction <add>, %156, %cst_64 [1] : vector<16x16xf32> to vector<16xf32>
    %158 = vector.shape_cast %157 : vector<16xf32> to vector<16x1xf32>
    %159 = tpu.reciprocal %158 {approx = true} : vector<16x1xf32> -> vector<16x1xf32>
    %160 = vector.broadcast %159 : vector<16x1xf32> to vector<16x16xf32>
    %161 = arith.mulf %156, %160 : vector<16x16xf32>
    %162 = vector.extract_strided_slice %127 {offsets = [0, 8], sizes = [16, 8], strides = [1, 1]} : vector<16x32xf32> to vector<16x8xf32>
    %cst_65 = arith.constant dense<0.000000e+00> : vector<16x8xf32>
    %163 = tpu.matmul %161, %162, %cst_65 {dimension_numbers = #tpu.dot_dimension_numbers<[1], [0], [0], [1], [0, 0, 1, 1], [], []>} : vector<16x16xf32>, vector<16x8xf32>, vector<16x8xf32> -> vector<16x8xf32>
    %c0_66 = arith.constant 0 : index
    %c8_67 = arith.constant 8 : index
    %164 = vector.load %arg11[%c0_66, %c8_67] : memref<16x32xf32, #tpu.memory_space<vmem>>, vector<16x8xf32>
    tpu.vector_store %arg11[%c0_66, %c8_67], %163 {strides = array<i32>} : memref<16x32xf32, #tpu.memory_space<vmem>>, vector<16x8xf32>,
    %165 = vector.extract_strided_slice %128 {offsets = [0, 16], sizes = [16, 8], strides = [1, 1]} : vector<16x32xf32> to vector<16x8xf32>
    %166 = vector.extract_strided_slice %130 {offsets = [16, 0], sizes = [8, 16], strides = [1, 1]} : vector<32x16xf32> to vector<8x16xf32>
    %cst_68 = arith.constant dense<0.000000e+00> : vector<16x16xf32>
    %167 = tpu.matmul %165, %166, %cst_68 {dimension_numbers = #tpu.dot_dimension_numbers<[1], [0], [0], [1], [0, 0, 1, 1], [], []>} : vector<16x8xf32>, vector<8x16xf32>, vector<16x16xf32> -> vector<16x16xf32>
    %168 = arith.addf %167, %3 : vector<16x16xf32>
    %cst_69 = arith.constant dense<0xFF800000> : vector<16xf32>
    %169 = vector.multi_reduction <maximumf>, %168, %cst_69 [1] : vector<16x16xf32> to vector<16xf32>
    %170 = vector.shape_cast %169 : vector<16xf32> to vector<16x1xf32>
    %171 = vector.broadcast %170 : vector<16x1xf32> to vector<16x16xf32>
    %172 = arith.subf %168, %171 : vector<16x16xf32>
    %173 = math.exp %172 : vector<16x16xf32>
    %cst_70 = arith.constant dense<0.000000e+00> : vector<16xf32>
    %174 = vector.multi_reduction <add>, %173, %cst_70 [1] : vector<16x16xf32> to vector<16xf32>
    %175 = vector.shape_cast %174 : vector<16xf32> to vector<16x1xf32>
    %176 = tpu.reciprocal %175 {approx = true} : vector<16x1xf32> -> vector<16x1xf32>
    %177 = vector.broadcast %176 : vector<16x1xf32> to vector<16x16xf32>
    %178 = arith.mulf %173, %177 : vector<16x16xf32>
    %179 = vector.extract_strided_slice %127 {offsets = [0, 16], sizes = [16, 8], strides = [1, 1]} : vector<16x32xf32> to vector<16x8xf32>
    %cst_71 = arith.constant dense<0.000000e+00> : vector<16x8xf32>
    %180 = tpu.matmul %178, %179, %cst_71 {dimension_numbers = #tpu.dot_dimension_numbers<[1], [0], [0], [1], [0, 0, 1, 1], [], []>} : vector<16x16xf32>, vector<16x8xf32>, vector<16x8xf32> -> vector<16x8xf32>
    %c0_72 = arith.constant 0 : index
    %c16_73 = arith.constant 16 : index
    %181 = vector.load %arg11[%c0_72, %c16_73] : memref<16x32xf32, #tpu.memory_space<vmem>>, vector<16x8xf32>
    tpu.vector_store %arg11[%c0_72, %c16_73], %180 {strides = array<i32>} : memref<16x32xf32, #tpu.memory_space<vmem>>, vector<16x8xf32>,
    %182 = vector.extract_strided_slice %128 {offsets = [0, 24], sizes = [16, 8], strides = [1, 1]} : vector<16x32xf32> to vector<16x8xf32>
    %183 = vector.extract_strided_slice %130 {offsets = [24, 0], sizes = [8, 16], strides = [1, 1]} : vector<32x16xf32> to vector<8x16xf32>
    %cst_74 = arith.constant dense<0.000000e+00> : vector<16x16xf32>
    %184 = tpu.matmul %182, %183, %cst_74 {dimension_numbers = #tpu.dot_dimension_numbers<[1], [0], [0], [1], [0, 0, 1, 1], [], []>} : vector<16x8xf32>, vector<8x16xf32>, vector<16x16xf32> -> vector<16x16xf32>
    %185 = arith.addf %184, %3 : vector<16x16xf32>
    %cst_75 = arith.constant dense<0xFF800000> : vector<16xf32>
    %186 = vector.multi_reduction <maximumf>, %185, %cst_75 [1] : vector<16x16xf32> to vector<16xf32>
    %187 = vector.shape_cast %186 : vector<16xf32> to vector<16x1xf32>
    %188 = vector.broadcast %187 : vector<16x1xf32> to vector<16x16xf32>
    %189 = arith.subf %185, %188 : vector<16x16xf32>
    %190 = math.exp %189 : vector<16x16xf32>
    %cst_76 = arith.constant dense<0.000000e+00> : vector<16xf32>
    %191 = vector.multi_reduction <add>, %190, %cst_76 [1] : vector<16x16xf32> to vector<16xf32>
    %192 = vector.shape_cast %191 : vector<16xf32> to vector<16x1xf32>
    %193 = tpu.reciprocal %192 {approx = true} : vector<16x1xf32> -> vector<16x1xf32>
    %194 = vector.broadcast %193 : vector<16x1xf32> to vector<16x16xf32>
    %195 = arith.mulf %190, %194 : vector<16x16xf32>
    %196 = vector.extract_strided_slice %127 {offsets = [0, 24], sizes = [16, 8], strides = [1, 1]} : vector<16x32xf32> to vector<16x8xf32>
    %cst_77 = arith.constant dense<0.000000e+00> : vector<16x8xf32>
    %197 = tpu.matmul %195, %196, %cst_77 {dimension_numbers = #tpu.dot_dimension_numbers<[1], [0], [0], [1], [0, 0, 1, 1], [], []>} : vector<16x16xf32>, vector<16x8xf32>, vector<16x8xf32> -> vector<16x8xf32>
    %c0_78 = arith.constant 0 : index
    %c24_79 = arith.constant 24 : index
    %198 = vector.load %arg11[%c0_78, %c24_79] : memref<16x32xf32, #tpu.memory_space<vmem>>, vector<16x8xf32>
    tpu.vector_store %arg11[%c0_78, %c24_79], %197 {strides = array<i32>} : memref<16x32xf32, #tpu.memory_space<vmem>>, vector<16x8xf32>,
    %c0_80 = arith.constant 0 : index
    %c0_81 = arith.constant 0 : index
    %199 = vector.load %arg11[%c0_80, %c0_81] : memref<16x32xf32, #tpu.memory_space<vmem>>, vector<16x32xf32>
    %cst_82 = arith.constant dense<0.000000e+00> : vector<16x32xf32>
    %200 = tpu.matmul %199, %7, %cst_82 {dimension_numbers = #tpu.dot_dimension_numbers<[1], [0], [0], [1], [0, 0, 1, 1], [], []>} : vector<16x32xf32>, vector<32x32xf32>, vector<16x32xf32> -> vector<16x32xf32>
    %201 = vector.broadcast %10 : vector<1x32xf32> to vector<16x32xf32>
    %202 = arith.addf %200, %201 : vector<16x32xf32>
    %203 = arith.addf %202, %123 : vector<16x32xf32>
    %cst_83 = arith.constant dense<0.000000e+00> : vector<16xf32>
    %204 = vector.multi_reduction <add>, %203, %cst_83 [1] : vector<16x32xf32> to vector<16xf32>
    %205 = vector.shape_cast %204 : vector<16xf32> to vector<16x1xf32>
    %cst_84 = arith.constant 3.200000e+01 : f32
    %206 = vector.broadcast %cst_84 : f32 to vector<16x1xf32>
    %207 = arith.divf %205, %206 : vector<16x1xf32>
    %208 = vector.broadcast %207 : vector<16x1xf32> to vector<16x32xf32>
    %209 = arith.subf %203, %208 : vector<16x32xf32>
    %210 = arith.mulf %209, %209 : vector<16x32xf32>
    %cst_85 = arith.constant dense<0.000000e+00> : vector<16xf32>
    %211 = vector.multi_reduction <add>, %210, %cst_85 [1] : vector<16x32xf32> to vector<16xf32>
    %212 = vector.shape_cast %211 : vector<16xf32> to vector<16x1xf32>
    %cst_86 = arith.constant 3.200000e+01 : f32
    %213 = vector.broadcast %cst_86 : f32 to vector<16x1xf32>
    %214 = arith.divf %212, %213 : vector<16x1xf32>
    %215 = vector.broadcast %207 : vector<16x1xf32> to vector<16x32xf32>
    %216 = arith.subf %203, %215 : vector<16x32xf32>
    %cst_87 = arith.constant 9.99999974E-6 : f32
    %217 = vector.broadcast %cst_87 : f32 to vector<16x1xf32>
    %218 = arith.addf %214, %217 : vector<16x1xf32>
    %219 = math.rsqrt %218 : vector<16x1xf32>
    %220 = vector.broadcast %219 : vector<16x1xf32> to vector<16x32xf32>
    %221 = arith.mulf %216, %220 : vector<16x32xf32>
    %222 = vector.broadcast %13 : vector<1x32xf32> to vector<16x32xf32>
    %223 = arith.mulf %221, %222 : vector<16x32xf32>
    %224 = vector.broadcast %14 : vector<1x32xf32> to vector<16x32xf32>
    %225 = arith.addf %223, %224 : vector<16x32xf32>
    %cst_88 = arith.constant dense<0.000000e+00> : vector<16x64xf32>
    %226 = tpu.matmul %225, %19, %cst_88 {dimension_numbers = #tpu.dot_dimension_numbers<[1], [0], [0], [1], [0, 0, 1, 1], [], []>} : vector<16x32xf32>, vector<32x64xf32>, vector<16x64xf32> -> vector<16x64xf32>
    %227 = vector.broadcast %23 : vector<1x64xf32> to vector<16x64xf32>
    %228 = arith.addf %226, %227 : vector<16x64xf32>
    %cst_89 = arith.constant 0.000000e+00 : f32
    %229 = vector.broadcast %cst_89 : f32 to vector<16x64xf32>
    %230 = arith.maximumf %228, %229 : vector<16x64xf32>
    %cst_90 = arith.constant dense<0.000000e+00> : vector<16x32xf32>
    %231 = tpu.matmul %230, %21, %cst_90 {dimension_numbers = #tpu.dot_dimension_numbers<[1], [0], [0], [1], [0, 0, 1, 1], [], []>} : vector<16x64xf32>, vector<64x32xf32>, vector<16x32xf32> -> vector<16x32xf32>
    %232 = vector.broadcast %17 : vector<1x32xf32> to vector<16x32xf32>
    %233 = arith.addf %231, %232 : vector<16x32xf32>
    %234 = arith.addf %233, %225 : vector<16x32xf32>
    %cst_91 = arith.constant dense<0.000000e+00> : vector<16xf32>
    %235 = vector.multi_reduction <add>, %234, %cst_91 [1] : vector<16x32xf32> to vector<16xf32>
    %236 = vector.shape_cast %235 : vector<16xf32> to vector<16x1xf32>
    %cst_92 = arith.constant 3.200000e+01 : f32
    %237 = vector.broadcast %cst_92 : f32 to vector<16x1xf32>
    %238 = arith.divf %236, %237 : vector<16x1xf32>
    %239 = vector.broadcast %238 : vector<16x1xf32> to vector<16x32xf32>
    %240 = arith.subf %234, %239 : vector<16x32xf32>
    %241 = arith.mulf %240, %240 : vector<16x32xf32>
    %cst_93 = arith.constant dense<0.000000e+00> : vector<16xf32>
    %242 = vector.multi_reduction <add>, %241, %cst_93 [1] : vector<16x32xf32> to vector<16xf32>
    %243 = vector.shape_cast %242 : vector<16xf32> to vector<16x1xf32>
    %cst_94 = arith.constant 3.200000e+01 : f32
    %244 = vector.broadcast %cst_94 : f32 to vector<16x1xf32>
    %245 = arith.divf %243, %244 : vector<16x1xf32>
    %246 = vector.broadcast %238 : vector<16x1xf32> to vector<16x32xf32>
    %247 = arith.subf %234, %246 : vector<16x32xf32>
    %cst_95 = arith.constant 9.99999974E-6 : f32
    %248 = vector.broadcast %cst_95 : f32 to vector<16x1xf32>
    %249 = arith.addf %245, %248 : vector<16x1xf32>
    %250 = math.rsqrt %249 : vector<16x1xf32>
    %251 = vector.broadcast %250 : vector<16x1xf32> to vector<16x32xf32>
    %252 = arith.mulf %247, %251 : vector<16x32xf32>
    %253 = vector.broadcast %15 : vector<1x32xf32> to vector<16x32xf32>
    %254 = arith.mulf %252, %253 : vector<16x32xf32>
    %255 = vector.broadcast %16 : vector<1x32xf32> to vector<16x32xf32>
    %256 = arith.addf %254, %255 : vector<16x32xf32>
    %c1 = arith.constant 1 : index
    %c0_96 = arith.constant 0 : index
    %c0_97 = arith.constant 0 : index
    %257 = vector.load %arg4[%c1, %c0_96, %c0_97] : memref<2x32x96xf32, #tpu.memory_space<vmem>>, vector<1x32x96xf32>
    %258 = vector.shape_cast %257 : vector<1x32x96xf32> to vector<32x96xf32>
    %c1_98 = arith.constant 1 : index
    %c0_99 = arith.constant 0 : index
    %c0_100 = arith.constant 0 : index
    %259 = vector.load %arg5[%c1_98, %c0_99, %c0_100] : memref<2x32x32xf32, #tpu.memory_space<vmem>>, vector<1x32x32xf32>
    %260 = vector.shape_cast %259 : vector<1x32x32xf32> to vector<32x32xf32>
    %c1_101 = arith.constant 1 : index
    %c0_102 = arith.constant 0 : index
    %c0_103 = arith.constant 0 : index
    %261 = vector.load %arg8[%c1_101, %c0_102, %c0_103] : memref<2x8x32xf32, #tpu.memory_space<vmem>>, vector<1x8x32xf32>
    %262 = vector.shape_cast %261 : vector<1x8x32xf32> to vector<8x32xf32>
    %263 = vector.extract_strided_slice %262 {offsets = [0, 0], sizes = [1, 32], strides = [1, 1]} : vector<8x32xf32> to vector<1x32xf32>
    %264 = vector.extract_strided_slice %262 {offsets = [1, 0], sizes = [1, 32], strides = [1, 1]} : vector<8x32xf32> to vector<1x32xf32>
    %265 = vector.extract_strided_slice %262 {offsets = [2, 0], sizes = [1, 32], strides = [1, 1]} : vector<8x32xf32> to vector<1x32xf32>
    %266 = vector.extract_strided_slice %262 {offsets = [3, 0], sizes = [1, 32], strides = [1, 1]} : vector<8x32xf32> to vector<1x32xf32>
    %267 = vector.extract_strided_slice %262 {offsets = [4, 0], sizes = [1, 32], strides = [1, 1]} : vector<8x32xf32> to vector<1x32xf32>
    %268 = vector.extract_strided_slice %262 {offsets = [5, 0], sizes = [1, 32], strides = [1, 1]} : vector<8x32xf32> to vector<1x32xf32>
    %269 = vector.extract_strided_slice %262 {offsets = [6, 0], sizes = [1, 32], strides = [1, 1]} : vector<8x32xf32> to vector<1x32xf32>
    %270 = vector.extract_strided_slice %262 {offsets = [7, 0], sizes = [1, 32], strides = [1, 1]} : vector<8x32xf32> to vector<1x32xf32>
    %c1_104 = arith.constant 1 : index
    %c0_105 = arith.constant 0 : index
    %c0_106 = arith.constant 0 : index
    %271 = vector.load %arg6[%c1_104, %c0_105, %c0_106] : memref<2x32x64xf32, #tpu.memory_space<vmem>>, vector<1x32x64xf32>
    %272 = vector.shape_cast %271 : vector<1x32x64xf32> to vector<32x64xf32>
    %c1_107 = arith.constant 1 : index
    %c0_108 = arith.constant 0 : index
    %c0_109 = arith.constant 0 : index
    %273 = vector.load %arg7[%c1_107, %c0_108, %c0_109] : memref<2x64x32xf32, #tpu.memory_space<vmem>>, vector<1x64x32xf32>
    %274 = vector.shape_cast %273 : vector<1x64x32xf32> to vector<64x32xf32>
    %c1_110 = arith.constant 1 : index
    %c0_111 = arith.constant 0 : index
    %c0_112 = arith.constant 0 : index
    %275 = vector.load %arg9[%c1_110, %c0_111, %c0_112] : memref<2x1x64xf32, #tpu.memory_space<vmem>>, vector<1x1x64xf32>
    %276 = vector.shape_cast %275 : vector<1x1x64xf32> to vector<1x64xf32>
    %cst_113 = arith.constant dense<0.000000e+00> : vector<16x96xf32>
    %277 = tpu.matmul %256, %258, %cst_113 {dimension_numbers = #tpu.dot_dimension_numbers<[1], [0], [0], [1], [0, 0, 1, 1], [], []>} : vector<16x32xf32>, vector<32x96xf32>, vector<16x96xf32> -> vector<16x96xf32>
    %278 = vector.extract_strided_slice %277 {offsets = [0, 0], sizes = [16, 32], strides = [1, 1]} : vector<16x96xf32> to vector<16x32xf32>
    %279 = vector.extract_strided_slice %277 {offsets = [0, 32], sizes = [16, 32], strides = [1, 1]} : vector<16x96xf32> to vector<16x32xf32>
    %280 = vector.extract_strided_slice %277 {offsets = [0, 64], sizes = [16, 32], strides = [1, 1]} : vector<16x96xf32> to vector<16x32xf32>
    %281 = tpu.transpose %279, [1, 0] : vector<16x32xf32> -> vector<32x16xf32>
    %282 = vector.extract_strided_slice %278 {offsets = [0, 0], sizes = [16, 8], strides = [1, 1]} : vector<16x32xf32> to vector<16x8xf32>
    %283 = vector.extract_strided_slice %281 {offsets = [0, 0], sizes = [8, 16], strides = [1, 1]} : vector<32x16xf32> to vector<8x16xf32>
    %cst_114 = arith.constant dense<0.000000e+00> : vector<16x16xf32>
    %284 = tpu.matmul %282, %283, %cst_114 {dimension_numbers = #tpu.dot_dimension_numbers<[1], [0], [0], [1], [0, 0, 1, 1], [], []>} : vector<16x8xf32>, vector<8x16xf32>, vector<16x16xf32> -> vector<16x16xf32>
    %285 = arith.addf %284, %2 : vector<16x16xf32>
    %cst_115 = arith.constant dense<0xFF800000> : vector<16xf32>
    %286 = vector.multi_reduction <maximumf>, %285, %cst_115 [1] : vector<16x16xf32> to vector<16xf32>
    %287 = vector.shape_cast %286 : vector<16xf32> to vector<16x1xf32>
    %288 = vector.broadcast %287 : vector<16x1xf32> to vector<16x16xf32>
    %289 = arith.subf %285, %288 : vector<16x16xf32>
    %290 = math.exp %289 : vector<16x16xf32>
    %cst_116 = arith.constant dense<0.000000e+00> : vector<16xf32>
    %291 = vector.multi_reduction <add>, %290, %cst_116 [1] : vector<16x16xf32> to vector<16xf32>
    %292 = vector.shape_cast %291 : vector<16xf32> to vector<16x1xf32>
    %293 = tpu.reciprocal %292 {approx = true} : vector<16x1xf32> -> vector<16x1xf32>
    %294 = vector.broadcast %293 : vector<16x1xf32> to vector<16x16xf32>
    %295 = arith.mulf %290, %294 : vector<16x16xf32>
    %296 = vector.extract_strided_slice %280 {offsets = [0, 0], sizes = [16, 8], strides = [1, 1]} : vector<16x32xf32> to vector<16x8xf32>
    %cst_117 = arith.constant dense<0.000000e+00> : vector<16x8xf32>
    %297 = tpu.matmul %295, %296, %cst_117 {dimension_numbers = #tpu.dot_dimension_numbers<[1], [0], [0], [1], [0, 0, 1, 1], [], []>} : vector<16x16xf32>, vector<16x8xf32>, vector<16x8xf32> -> vector<16x8xf32>
    %c0_118 = arith.constant 0 : index
    %c0_119 = arith.constant 0 : index
    %298 = vector.load %arg11[%c0_118, %c0_119] : memref<16x32xf32, #tpu.memory_space<vmem>>, vector<16x8xf32>
    tpu.vector_store %arg11[%c0_118, %c0_119], %297 {strides = array<i32>} : memref<16x32xf32, #tpu.memory_space<vmem>>, vector<16x8xf32>,
    %299 = vector.extract_strided_slice %278 {offsets = [0, 8], sizes = [16, 8], strides = [1, 1]} : vector<16x32xf32> to vector<16x8xf32>
    %300 = vector.extract_strided_slice %281 {offsets = [8, 0], sizes = [8, 16], strides = [1, 1]} : vector<32x16xf32> to vector<8x16xf32>
    %cst_120 = arith.constant dense<0.000000e+00> : vector<16x16xf32>
    %301 = tpu.matmul %299, %300, %cst_120 {dimension_numbers = #tpu.dot_dimension_numbers<[1], [0], [0], [1], [0, 0, 1, 1], [], []>} : vector<16x8xf32>, vector<8x16xf32>, vector<16x16xf32> -> vector<16x16xf32>
    %302 = arith.addf %301, %2 : vector<16x16xf32>
    %cst_121 = arith.constant dense<0xFF800000> : vector<16xf32>
    %303 = vector.multi_reduction <maximumf>, %302, %cst_121 [1] : vector<16x16xf32> to vector<16xf32>
    %304 = vector.shape_cast %303 : vector<16xf32> to vector<16x1xf32>
    %305 = vector.broadcast %304 : vector<16x1xf32> to vector<16x16xf32>
    %306 = arith.subf %302, %305 : vector<16x16xf32>
    %307 = math.exp %306 : vector<16x16xf32>
    %cst_122 = arith.constant dense<0.000000e+00> : vector<16xf32>
    %308 = vector.multi_reduction <add>, %307, %cst_122 [1] : vector<16x16xf32> to vector<16xf32>
    %309 = vector.shape_cast %308 : vector<16xf32> to vector<16x1xf32>
    %310 = tpu.reciprocal %309 {approx = true} : vector<16x1xf32> -> vector<16x1xf32>
    %311 = vector.broadcast %310 : vector<16x1xf32> to vector<16x16xf32>
    %312 = arith.mulf %307, %311 : vector<16x16xf32>
    %313 = vector.extract_strided_slice %280 {offsets = [0, 8], sizes = [16, 8], strides = [1, 1]} : vector<16x32xf32> to vector<16x8xf32>
    %cst_123 = arith.constant dense<0.000000e+00> : vector<16x8xf32>
    %314 = tpu.matmul %312, %313, %cst_123 {dimension_numbers = #tpu.dot_dimension_numbers<[1], [0], [0], [1], [0, 0, 1, 1], [], []>} : vector<16x16xf32>, vector<16x8xf32>, vector<16x8xf32> -> vector<16x8xf32>
    %c0_124 = arith.constant 0 : index
    %c8_125 = arith.constant 8 : index
    %315 = vector.load %arg11[%c0_124, %c8_125] : memref<16x32xf32, #tpu.memory_space<vmem>>, vector<16x8xf32>
    tpu.vector_store %arg11[%c0_124, %c8_125], %314 {strides = array<i32>} : memref<16x32xf32, #tpu.memory_space<vmem>>, vector<16x8xf32>,
    %316 = vector.extract_strided_slice %278 {offsets = [0, 16], sizes = [16, 8], strides = [1, 1]} : vector<16x32xf32> to vector<16x8xf32>
    %317 = vector.extract_strided_slice %281 {offsets = [16, 0], sizes = [8, 16], strides = [1, 1]} : vector<32x16xf32> to vector<8x16xf32>
    %cst_126 = arith.constant dense<0.000000e+00> : vector<16x16xf32>
    %318 = tpu.matmul %316, %317, %cst_126 {dimension_numbers = #tpu.dot_dimension_numbers<[1], [0], [0], [1], [0, 0, 1, 1], [], []>} : vector<16x8xf32>, vector<8x16xf32>, vector<16x16xf32> -> vector<16x16xf32>
    %319 = arith.addf %318, %2 : vector<16x16xf32>
    %cst_127 = arith.constant dense<0xFF800000> : vector<16xf32>
    %320 = vector.multi_reduction <maximumf>, %319, %cst_127 [1] : vector<16x16xf32> to vector<16xf32>
    %321 = vector.shape_cast %320 : vector<16xf32> to vector<16x1xf32>
    %322 = vector.broadcast %321 : vector<16x1xf32> to vector<16x16xf32>
    %323 = arith.subf %319, %322 : vector<16x16xf32>
    %324 = math.exp %323 : vector<16x16xf32>
    %cst_128 = arith.constant dense<0.000000e+00> : vector<16xf32>
    %325 = vector.multi_reduction <add>, %324, %cst_128 [1] : vector<16x16xf32> to vector<16xf32>
    %326 = vector.shape_cast %325 : vector<16xf32> to vector<16x1xf32>
    %327 = tpu.reciprocal %326 {approx = true} : vector<16x1xf32> -> vector<16x1xf32>
    %328 = vector.broadcast %327 : vector<16x1xf32> to vector<16x16xf32>
    %329 = arith.mulf %324, %328 : vector<16x16xf32>
    %330 = vector.extract_strided_slice %280 {offsets = [0, 16], sizes = [16, 8], strides = [1, 1]} : vector<16x32xf32> to vector<16x8xf32>
    %cst_129 = arith.constant dense<0.000000e+00> : vector<16x8xf32>
    %331 = tpu.matmul %329, %330, %cst_129 {dimension_numbers = #tpu.dot_dimension_numbers<[1], [0], [0], [1], [0, 0, 1, 1], [], []>} : vector<16x16xf32>, vector<16x8xf32>, vector<16x8xf32> -> vector<16x8xf32>
    %c0_130 = arith.constant 0 : index
    %c16_131 = arith.constant 16 : index
    %332 = vector.load %arg11[%c0_130, %c16_131] : memref<16x32xf32, #tpu.memory_space<vmem>>, vector<16x8xf32>
    tpu.vector_store %arg11[%c0_130, %c16_131], %331 {strides = array<i32>} : memref<16x32xf32, #tpu.memory_space<vmem>>, vector<16x8xf32>,
    %333 = vector.extract_strided_slice %278 {offsets = [0, 24], sizes = [16, 8], strides = [1, 1]} : vector<16x32xf32> to vector<16x8xf32>
    %334 = vector.extract_strided_slice %281 {offsets = [24, 0], sizes = [8, 16], strides = [1, 1]} : vector<32x16xf32> to vector<8x16xf32>
    %cst_132 = arith.constant dense<0.000000e+00> : vector<16x16xf32>
    %335 = tpu.matmul %333, %334, %cst_132 {dimension_numbers = #tpu.dot_dimension_numbers<[1], [0], [0], [1], [0, 0, 1, 1], [], []>} : vector<16x8xf32>, vector<8x16xf32>, vector<16x16xf32> -> vector<16x16xf32>
    %336 = arith.addf %335, %2 : vector<16x16xf32>
    %cst_133 = arith.constant dense<0xFF800000> : vector<16xf32>
    %337 = vector.multi_reduction <maximumf>, %336, %cst_133 [1] : vector<16x16xf32> to vector<16xf32>
    %338 = vector.shape_cast %337 : vector<16xf32> to vector<16x1xf32>
    %339 = vector.broadcast %338 : vector<16x1xf32> to vector<16x16xf32>
    %340 = arith.subf %336, %339 : vector<16x16xf32>
    %341 = math.exp %340 : vector<16x16xf32>
    %cst_134 = arith.constant dense<0.000000e+00> : vector<16xf32>
    %342 = vector.multi_reduction <add>, %341, %cst_134 [1] : vector<16x16xf32> to vector<16xf32>
    %343 = vector.shape_cast %342 : vector<16xf32> to vector<16x1xf32>
    %344 = tpu.reciprocal %343 {approx = true} : vector<16x1xf32> -> vector<16x1xf32>
    %345 = vector.broadcast %344 : vector<16x1xf32> to vector<16x16xf32>
    %346 = arith.mulf %341, %345 : vector<16x16xf32>
    %347 = vector.extract_strided_slice %280 {offsets = [0, 24], sizes = [16, 8], strides = [1, 1]} : vector<16x32xf32> to vector<16x8xf32>
    %cst_135 = arith.constant dense<0.000000e+00> : vector<16x8xf32>
    %348 = tpu.matmul %346, %347, %cst_135 {dimension_numbers = #tpu.dot_dimension_numbers<[1], [0], [0], [1], [0, 0, 1, 1], [], []>} : vector<16x16xf32>, vector<16x8xf32>, vector<16x8xf32> -> vector<16x8xf32>
    %c0_136 = arith.constant 0 : index
    %c24_137 = arith.constant 24 : index
    %349 = vector.load %arg11[%c0_136, %c24_137] : memref<16x32xf32, #tpu.memory_space<vmem>>, vector<16x8xf32>
    tpu.vector_store %arg11[%c0_136, %c24_137], %348 {strides = array<i32>} : memref<16x32xf32, #tpu.memory_space<vmem>>, vector<16x8xf32>,
    %c0_138 = arith.constant 0 : index
    %c0_139 = arith.constant 0 : index
    %350 = vector.load %arg11[%c0_138, %c0_139] : memref<16x32xf32, #tpu.memory_space<vmem>>, vector<16x32xf32>
    %cst_140 = arith.constant dense<0.000000e+00> : vector<16x32xf32>
    %351 = tpu.matmul %350, %260, %cst_140 {dimension_numbers = #tpu.dot_dimension_numbers<[1], [0], [0], [1], [0, 0, 1, 1], [], []>} : vector<16x32xf32>, vector<32x32xf32>, vector<16x32xf32> -> vector<16x32xf32>
    %352 = vector.broadcast %263 : vector<1x32xf32> to vector<16x32xf32>
    %353 = arith.addf %351, %352 : vector<16x32xf32>
    %354 = arith.addf %353, %256 : vector<16x32xf32>
    %cst_141 = arith.constant dense<0.000000e+00> : vector<16xf32>
    %355 = vector.multi_reduction <add>, %354, %cst_141 [1] : vector<16x32xf32> to vector<16xf32>
    %356 = vector.shape_cast %355 : vector<16xf32> to vector<16x1xf32>
    %cst_142 = arith.constant 3.200000e+01 : f32
    %357 = vector.broadcast %cst_142 : f32 to vector<16x1xf32>
    %358 = arith.divf %356, %357 : vector<16x1xf32>
    %359 = vector.broadcast %358 : vector<16x1xf32> to vector<16x32xf32>
    %360 = arith.subf %354, %359 : vector<16x32xf32>
    %361 = arith.mulf %360, %360 : vector<16x32xf32>
    %cst_143 = arith.constant dense<0.000000e+00> : vector<16xf32>
    %362 = vector.multi_reduction <add>, %361, %cst_143 [1] : vector<16x32xf32> to vector<16xf32>
    %363 = vector.shape_cast %362 : vector<16xf32> to vector<16x1xf32>
    %cst_144 = arith.constant 3.200000e+01 : f32
    %364 = vector.broadcast %cst_144 : f32 to vector<16x1xf32>
    %365 = arith.divf %363, %364 : vector<16x1xf32>
    %366 = vector.broadcast %358 : vector<16x1xf32> to vector<16x32xf32>
    %367 = arith.subf %354, %366 : vector<16x32xf32>
    %cst_145 = arith.constant 9.99999974E-6 : f32
    %368 = vector.broadcast %cst_145 : f32 to vector<16x1xf32>
    %369 = arith.addf %365, %368 : vector<16x1xf32>
    %370 = math.rsqrt %369 : vector<16x1xf32>
    %371 = vector.broadcast %370 : vector<16x1xf32> to vector<16x32xf32>
    %372 = arith.mulf %367, %371 : vector<16x32xf32>
    %373 = vector.broadcast %264 : vector<1x32xf32> to vector<16x32xf32>
    %374 = arith.mulf %372, %373 : vector<16x32xf32>
    %375 = vector.broadcast %265 : vector<1x32xf32> to vector<16x32xf32>
    %376 = arith.addf %374, %375 : vector<16x32xf32>
    %377 = vector.extract_strided_slice %258 {offsets = [0, 0], sizes = [32, 64], strides = [1, 1]} : vector<32x96xf32> to vector<32x64xf32>
    %cst_146 = arith.constant dense<0.000000e+00> : vector<16x64xf32>
    %378 = tpu.matmul %1, %377, %cst_146 {dimension_numbers = #tpu.dot_dimension_numbers<[1], [0], [0], [1], [0, 0, 1, 1], [], []>} : vector<16x32xf32>, vector<32x64xf32>, vector<16x64xf32> -> vector<16x64xf32>
    %379 = vector.extract_strided_slice %258 {offsets = [0, 64], sizes = [32, 32], strides = [1, 1]} : vector<32x96xf32> to vector<32x32xf32>
    %cst_147 = arith.constant dense<0.000000e+00> : vector<16x32xf32>
    %380 = tpu.matmul %376, %379, %cst_147 {dimension_numbers = #tpu.dot_dimension_numbers<[1], [0], [0], [1], [0, 0, 1, 1], [], []>} : vector<16x32xf32>, vector<32x32xf32>, vector<16x32xf32> -> vector<16x32xf32>
    %381 = vector.extract_strided_slice %378 {offsets = [0, 0], sizes = [16, 32], strides = [1, 1]} : vector<16x64xf32> to vector<16x32xf32>
    %382 = vector.extract_strided_slice %378 {offsets = [0, 32], sizes = [16, 32], strides = [1, 1]} : vector<16x64xf32> to vector<16x32xf32>
    %383 = tpu.transpose %382, [1, 0] : vector<16x32xf32> -> vector<32x16xf32>
    %384 = vector.extract_strided_slice %381 {offsets = [0, 0], sizes = [16, 8], strides = [1, 1]} : vector<16x32xf32> to vector<16x8xf32>
    %385 = vector.extract_strided_slice %383 {offsets = [0, 0], sizes = [8, 16], strides = [1, 1]} : vector<32x16xf32> to vector<8x16xf32>
    %cst_148 = arith.constant dense<0.000000e+00> : vector<16x16xf32>
    %386 = tpu.matmul %384, %385, %cst_148 {dimension_numbers = #tpu.dot_dimension_numbers<[1], [0], [0], [1], [0, 0, 1, 1], [], []>} : vector<16x8xf32>, vector<8x16xf32>, vector<16x16xf32> -> vector<16x16xf32>
    %387 = arith.addf %386, %3 : vector<16x16xf32>
    %cst_149 = arith.constant dense<0xFF800000> : vector<16xf32>
    %388 = vector.multi_reduction <maximumf>, %387, %cst_149 [1] : vector<16x16xf32> to vector<16xf32>
    %389 = vector.shape_cast %388 : vector<16xf32> to vector<16x1xf32>
    %390 = vector.broadcast %389 : vector<16x1xf32> to vector<16x16xf32>
    %391 = arith.subf %387, %390 : vector<16x16xf32>
    %392 = math.exp %391 : vector<16x16xf32>
    %cst_150 = arith.constant dense<0.000000e+00> : vector<16xf32>
    %393 = vector.multi_reduction <add>, %392, %cst_150 [1] : vector<16x16xf32> to vector<16xf32>
    %394 = vector.shape_cast %393 : vector<16xf32> to vector<16x1xf32>
    %395 = tpu.reciprocal %394 {approx = true} : vector<16x1xf32> -> vector<16x1xf32>
    %396 = vector.broadcast %395 : vector<16x1xf32> to vector<16x16xf32>
    %397 = arith.mulf %392, %396 : vector<16x16xf32>
    %398 = vector.extract_strided_slice %380 {offsets = [0, 0], sizes = [16, 8], strides = [1, 1]} : vector<16x32xf32> to vector<16x8xf32>
    %cst_151 = arith.constant dense<0.000000e+00> : vector<16x8xf32>
    %399 = tpu.matmul %397, %398, %cst_151 {dimension_numbers = #tpu.dot_dimension_numbers<[1], [0], [0], [1], [0, 0, 1, 1], [], []>} : vector<16x16xf32>, vector<16x8xf32>, vector<16x8xf32> -> vector<16x8xf32>
    %c0_152 = arith.constant 0 : index
    %c0_153 = arith.constant 0 : index
    %400 = vector.load %arg11[%c0_152, %c0_153] : memref<16x32xf32, #tpu.memory_space<vmem>>, vector<16x8xf32>
    tpu.vector_store %arg11[%c0_152, %c0_153], %399 {strides = array<i32>} : memref<16x32xf32, #tpu.memory_space<vmem>>, vector<16x8xf32>,
    %401 = vector.extract_strided_slice %381 {offsets = [0, 8], sizes = [16, 8], strides = [1, 1]} : vector<16x32xf32> to vector<16x8xf32>
    %402 = vector.extract_strided_slice %383 {offsets = [8, 0], sizes = [8, 16], strides = [1, 1]} : vector<32x16xf32> to vector<8x16xf32>
    %cst_154 = arith.constant dense<0.000000e+00> : vector<16x16xf32>
    %403 = tpu.matmul %401, %402, %cst_154 {dimension_numbers = #tpu.dot_dimension_numbers<[1], [0], [0], [1], [0, 0, 1, 1], [], []>} : vector<16x8xf32>, vector<8x16xf32>, vector<16x16xf32> -> vector<16x16xf32>
    %404 = arith.addf %403, %3 : vector<16x16xf32>
    %cst_155 = arith.constant dense<0xFF800000> : vector<16xf32>
    %405 = vector.multi_reduction <maximumf>, %404, %cst_155 [1] : vector<16x16xf32> to vector<16xf32>
    %406 = vector.shape_cast %405 : vector<16xf32> to vector<16x1xf32>
    %407 = vector.broadcast %406 : vector<16x1xf32> to vector<16x16xf32>
    %408 = arith.subf %404, %407 : vector<16x16xf32>
    %409 = math.exp %408 : vector<16x16xf32>
    %cst_156 = arith.constant dense<0.000000e+00> : vector<16xf32>
    %410 = vector.multi_reduction <add>, %409, %cst_156 [1] : vector<16x16xf32> to vector<16xf32>
    %411 = vector.shape_cast %410 : vector<16xf32> to vector<16x1xf32>
    %412 = tpu.reciprocal %411 {approx = true} : vector<16x1xf32> -> vector<16x1xf32>
    %413 = vector.broadcast %412 : vector<16x1xf32> to vector<16x16xf32>
    %414 = arith.mulf %409, %413 : vector<16x16xf32>
    %415 = vector.extract_strided_slice %380 {offsets = [0, 8], sizes = [16, 8], strides = [1, 1]} : vector<16x32xf32> to vector<16x8xf32>
    %cst_157 = arith.constant dense<0.000000e+00> : vector<16x8xf32>
    %416 = tpu.matmul %414, %415, %cst_157 {dimension_numbers = #tpu.dot_dimension_numbers<[1], [0], [0], [1], [0, 0, 1, 1], [], []>} : vector<16x16xf32>, vector<16x8xf32>, vector<16x8xf32> -> vector<16x8xf32>
    %c0_158 = arith.constant 0 : index
    %c8_159 = arith.constant 8 : index
    %417 = vector.load %arg11[%c0_158, %c8_159] : memref<16x32xf32, #tpu.memory_space<vmem>>, vector<16x8xf32>
    tpu.vector_store %arg11[%c0_158, %c8_159], %416 {strides = array<i32>} : memref<16x32xf32, #tpu.memory_space<vmem>>, vector<16x8xf32>,
    %418 = vector.extract_strided_slice %381 {offsets = [0, 16], sizes = [16, 8], strides = [1, 1]} : vector<16x32xf32> to vector<16x8xf32>
    %419 = vector.extract_strided_slice %383 {offsets = [16, 0], sizes = [8, 16], strides = [1, 1]} : vector<32x16xf32> to vector<8x16xf32>
    %cst_160 = arith.constant dense<0.000000e+00> : vector<16x16xf32>
    %420 = tpu.matmul %418, %419, %cst_160 {dimension_numbers = #tpu.dot_dimension_numbers<[1], [0], [0], [1], [0, 0, 1, 1], [], []>} : vector<16x8xf32>, vector<8x16xf32>, vector<16x16xf32> -> vector<16x16xf32>
    %421 = arith.addf %420, %3 : vector<16x16xf32>
    %cst_161 = arith.constant dense<0xFF800000> : vector<16xf32>
    %422 = vector.multi_reduction <maximumf>, %421, %cst_161 [1] : vector<16x16xf32> to vector<16xf32>
    %423 = vector.shape_cast %422 : vector<16xf32> to vector<16x1xf32>
    %424 = vector.broadcast %423 : vector<16x1xf32> to vector<16x16xf32>
    %425 = arith.subf %421, %424 : vector<16x16xf32>
    %426 = math.exp %425 : vector<16x16xf32>
    %cst_162 = arith.constant dense<0.000000e+00> : vector<16xf32>
    %427 = vector.multi_reduction <add>, %426, %cst_162 [1] : vector<16x16xf32> to vector<16xf32>
    %428 = vector.shape_cast %427 : vector<16xf32> to vector<16x1xf32>
    %429 = tpu.reciprocal %428 {approx = true} : vector<16x1xf32> -> vector<16x1xf32>
    %430 = vector.broadcast %429 : vector<16x1xf32> to vector<16x16xf32>
    %431 = arith.mulf %426, %430 : vector<16x16xf32>
    %432 = vector.extract_strided_slice %380 {offsets = [0, 16], sizes = [16, 8], strides = [1, 1]} : vector<16x32xf32> to vector<16x8xf32>
    %cst_163 = arith.constant dense<0.000000e+00> : vector<16x8xf32>
    %433 = tpu.matmul %431, %432, %cst_163 {dimension_numbers = #tpu.dot_dimension_numbers<[1], [0], [0], [1], [0, 0, 1, 1], [], []>} : vector<16x16xf32>, vector<16x8xf32>, vector<16x8xf32> -> vector<16x8xf32>
    %c0_164 = arith.constant 0 : index
    %c16_165 = arith.constant 16 : index
    %434 = vector.load %arg11[%c0_164, %c16_165] : memref<16x32xf32, #tpu.memory_space<vmem>>, vector<16x8xf32>
    tpu.vector_store %arg11[%c0_164, %c16_165], %433 {strides = array<i32>} : memref<16x32xf32, #tpu.memory_space<vmem>>, vector<16x8xf32>,
    %435 = vector.extract_strided_slice %381 {offsets = [0, 24], sizes = [16, 8], strides = [1, 1]} : vector<16x32xf32> to vector<16x8xf32>
    %436 = vector.extract_strided_slice %383 {offsets = [24, 0], sizes = [8, 16], strides = [1, 1]} : vector<32x16xf32> to vector<8x16xf32>
    %cst_166 = arith.constant dense<0.000000e+00> : vector<16x16xf32>
    %437 = tpu.matmul %435, %436, %cst_166 {dimension_numbers = #tpu.dot_dimension_numbers<[1], [0], [0], [1], [0, 0, 1, 1], [], []>} : vector<16x8xf32>, vector<8x16xf32>, vector<16x16xf32> -> vector<16x16xf32>
    %438 = arith.addf %437, %3 : vector<16x16xf32>
    %cst_167 = arith.constant dense<0xFF800000> : vector<16xf32>
    %439 = vector.multi_reduction <maximumf>, %438, %cst_167 [1] : vector<16x16xf32> to vector<16xf32>
    %440 = vector.shape_cast %439 : vector<16xf32> to vector<16x1xf32>
    %441 = vector.broadcast %440 : vector<16x1xf32> to vector<16x16xf32>
    %442 = arith.subf %438, %441 : vector<16x16xf32>
    %443 = math.exp %442 : vector<16x16xf32>
    %cst_168 = arith.constant dense<0.000000e+00> : vector<16xf32>
    %444 = vector.multi_reduction <add>, %443, %cst_168 [1] : vector<16x16xf32> to vector<16xf32>
    %445 = vector.shape_cast %444 : vector<16xf32> to vector<16x1xf32>
    %446 = tpu.reciprocal %445 {approx = true} : vector<16x1xf32> -> vector<16x1xf32>
    %447 = vector.broadcast %446 : vector<16x1xf32> to vector<16x16xf32>
    %448 = arith.mulf %443, %447 : vector<16x16xf32>
    %449 = vector.extract_strided_slice %380 {offsets = [0, 24], sizes = [16, 8], strides = [1, 1]} : vector<16x32xf32> to vector<16x8xf32>
    %cst_169 = arith.constant dense<0.000000e+00> : vector<16x8xf32>
    %450 = tpu.matmul %448, %449, %cst_169 {dimension_numbers = #tpu.dot_dimension_numbers<[1], [0], [0], [1], [0, 0, 1, 1], [], []>} : vector<16x16xf32>, vector<16x8xf32>, vector<16x8xf32> -> vector<16x8xf32>
    %c0_170 = arith.constant 0 : index
    %c24_171 = arith.constant 24 : index
    %451 = vector.load %arg11[%c0_170, %c24_171] : memref<16x32xf32, #tpu.memory_space<vmem>>, vector<16x8xf32>
    tpu.vector_store %arg11[%c0_170, %c24_171], %450 {strides = array<i32>} : memref<16x32xf32, #tpu.memory_space<vmem>>, vector<16x8xf32>,
    %c0_172 = arith.constant 0 : index
    %c0_173 = arith.constant 0 : index
    %452 = vector.load %arg11[%c0_172, %c0_173] : memref<16x32xf32, #tpu.memory_space<vmem>>, vector<16x32xf32>
    %cst_174 = arith.constant dense<0.000000e+00> : vector<16x32xf32>
    %453 = tpu.matmul %452, %260, %cst_174 {dimension_numbers = #tpu.dot_dimension_numbers<[1], [0], [0], [1], [0, 0, 1, 1], [], []>} : vector<16x32xf32>, vector<32x32xf32>, vector<16x32xf32> -> vector<16x32xf32>
    %454 = vector.broadcast %263 : vector<1x32xf32> to vector<16x32xf32>
    %455 = arith.addf %453, %454 : vector<16x32xf32>
    %456 = arith.addf %455, %376 : vector<16x32xf32>
    %cst_175 = arith.constant dense<0.000000e+00> : vector<16xf32>
    %457 = vector.multi_reduction <add>, %456, %cst_175 [1] : vector<16x32xf32> to vector<16xf32>
    %458 = vector.shape_cast %457 : vector<16xf32> to vector<16x1xf32>
    %cst_176 = arith.constant 3.200000e+01 : f32
    %459 = vector.broadcast %cst_176 : f32 to vector<16x1xf32>
    %460 = arith.divf %458, %459 : vector<16x1xf32>
    %461 = vector.broadcast %460 : vector<16x1xf32> to vector<16x32xf32>
    %462 = arith.subf %456, %461 : vector<16x32xf32>
    %463 = arith.mulf %462, %462 : vector<16x32xf32>
    %cst_177 = arith.constant dense<0.000000e+00> : vector<16xf32>
    %464 = vector.multi_reduction <add>, %463, %cst_177 [1] : vector<16x32xf32> to vector<16xf32>
    %465 = vector.shape_cast %464 : vector<16xf32> to vector<16x1xf32>
    %cst_178 = arith.constant 3.200000e+01 : f32
    %466 = vector.broadcast %cst_178 : f32 to vector<16x1xf32>
    %467 = arith.divf %465, %466 : vector<16x1xf32>
    %468 = vector.broadcast %460 : vector<16x1xf32> to vector<16x32xf32>
    %469 = arith.subf %456, %468 : vector<16x32xf32>
    %cst_179 = arith.constant 9.99999974E-6 : f32
    %470 = vector.broadcast %cst_179 : f32 to vector<16x1xf32>
    %471 = arith.addf %467, %470 : vector<16x1xf32>
    %472 = math.rsqrt %471 : vector<16x1xf32>
    %473 = vector.broadcast %472 : vector<16x1xf32> to vector<16x32xf32>
    %474 = arith.mulf %469, %473 : vector<16x32xf32>
    %475 = vector.broadcast %266 : vector<1x32xf32> to vector<16x32xf32>
    %476 = arith.mulf %474, %475 : vector<16x32xf32>
    %477 = vector.broadcast %267 : vector<1x32xf32> to vector<16x32xf32>
    %478 = arith.addf %476, %477 : vector<16x32xf32>
    %cst_180 = arith.constant dense<0.000000e+00> : vector<16x64xf32>
    %479 = tpu.matmul %478, %272, %cst_180 {dimension_numbers = #tpu.dot_dimension_numbers<[1], [0], [0], [1], [0, 0, 1, 1], [], []>} : vector<16x32xf32>, vector<32x64xf32>, vector<16x64xf32> -> vector<16x64xf32>
    %480 = vector.broadcast %276 : vector<1x64xf32> to vector<16x64xf32>
    %481 = arith.addf %479, %480 : vector<16x64xf32>
    %cst_181 = arith.constant 0.000000e+00 : f32
    %482 = vector.broadcast %cst_181 : f32 to vector<16x64xf32>
    %483 = arith.maximumf %481, %482 : vector<16x64xf32>
    %cst_182 = arith.constant dense<0.000000e+00> : vector<16x32xf32>
    %484 = tpu.matmul %483, %274, %cst_182 {dimension_numbers = #tpu.dot_dimension_numbers<[1], [0], [0], [1], [0, 0, 1, 1], [], []>} : vector<16x64xf32>, vector<64x32xf32>, vector<16x32xf32> -> vector<16x32xf32>
    %485 = vector.broadcast %270 : vector<1x32xf32> to vector<16x32xf32>
    %486 = arith.addf %484, %485 : vector<16x32xf32>
    %487 = arith.addf %486, %478 : vector<16x32xf32>
    %cst_183 = arith.constant dense<0.000000e+00> : vector<16xf32>
    %488 = vector.multi_reduction <add>, %487, %cst_183 [1] : vector<16x32xf32> to vector<16xf32>
    %489 = vector.shape_cast %488 : vector<16xf32> to vector<16x1xf32>
    %cst_184 = arith.constant 3.200000e+01 : f32
    %490 = vector.broadcast %cst_184 : f32 to vector<16x1xf32>
    %491 = arith.divf %489, %490 : vector<16x1xf32>
    %492 = vector.broadcast %491 : vector<16x1xf32> to vector<16x32xf32>
    %493 = arith.subf %487, %492 : vector<16x32xf32>
    %494 = arith.mulf %493, %493 : vector<16x32xf32>
    %cst_185 = arith.constant dense<0.000000e+00> : vector<16xf32>
    %495 = vector.multi_reduction <add>, %494, %cst_185 [1] : vector<16x32xf32> to vector<16xf32>
    %496 = vector.shape_cast %495 : vector<16xf32> to vector<16x1xf32>
    %cst_186 = arith.constant 3.200000e+01 : f32
    %497 = vector.broadcast %cst_186 : f32 to vector<16x1xf32>
    %498 = arith.divf %496, %497 : vector<16x1xf32>
    %499 = vector.broadcast %491 : vector<16x1xf32> to vector<16x32xf32>
    %500 = arith.subf %487, %499 : vector<16x32xf32>
    %cst_187 = arith.constant 9.99999974E-6 : f32
    %501 = vector.broadcast %cst_187 : f32 to vector<16x1xf32>
    %502 = arith.addf %498, %501 : vector<16x1xf32>
    %503 = math.rsqrt %502 : vector<16x1xf32>
    %504 = vector.broadcast %503 : vector<16x1xf32> to vector<16x32xf32>
    %505 = arith.mulf %500, %504 : vector<16x32xf32>
    %506 = vector.broadcast %268 : vector<1x32xf32> to vector<16x32xf32>
    %507 = arith.mulf %505, %506 : vector<16x32xf32>
    %508 = vector.broadcast %269 : vector<1x32xf32> to vector<16x32xf32>
    %509 = arith.addf %507, %508 : vector<16x32xf32>
    %c0_188 = arith.constant 0 : index
    %c0_189 = arith.constant 0 : index
    %510 = vector.load %arg10[%c0_188, %c0_189] : memref<16x32xf32, #tpu.memory_space<vmem>>, vector<16x32xf32>
    tpu.vector_store %arg10[%c0_188, %c0_189], %509 {strides = array<i32>} : memref<16x32xf32, #tpu.memory_space<vmem>>, vector<16x32xf32>,
    return
  }
}

</mosaic_0001>

<bundles_post_ra>
// kernel: transformer_decoder_pallas.1
= control target key start
LH: loop header
LB: loop body
LE: loop exit
PB: predicated region body
PF: predicated region fallthrough
CT: control target
= control target key end

     0   :  { %vm66_vm0 = vcmask 261120   ;;  %s7270_s0 = inlined_call_operand.vmem [shape: f32[16,32], index: 0, kind: input, shape index: {}]   ;;  %s7271_s1 = inlined_call_operand.vmem [shape: f32[16,32], index: 1, kind: input, shape index: {}]   ;;  %s7272_s2 = inlined_call_operand.vmem [shape: f32[16,16], index: 2, kind: input, shape index: {}]   ;;  %s7273_s3 = inlined_call_operand.vmem [shape: f32[16,16], index: 3, kind: input, shape index: {}]   ;;  %s7274_s4 = inlined_call_operand.vmem [shape: f32[2,32,96], index: 4, kind: input, shape index: {}]   ;;  %s7275_s5 = inlined_call_operand.vmem [shape: f32[2,32,32], index: 5, kind: input, shape index: {}]   ;;  %s7276_s6 = inlined_call_operand.vmem [shape: f32[2,32,64], index: 6, kind: input, shape index: {}]   ;;  %s7277_s7 = inlined_call_operand.vmem [shape: f32[2,64,32], index: 7, kind: input, shape index: {}]   ;;  %s7278_s8 = inlined_call_operand.vmem [shape: f32[2,8,32], index: 8, kind: input, shape index: {}]   ;;  %s7279_s9 = inlined_call_operand.vmem [shape: f32[2,1,64], index: 9, kind: input, shape index: {}]   ;;  %s7280_s10 = inlined_call_operand.hbm [shape: f32[16,32], index: 10, kind: output, shape index: {}]  }
   0x1   :  { %v6364_v0 = vld [vmem:[%s7274_s4] sm:$0xff]  ;;  %v6369_v1 = vld [vmem:[%s7274_s4 + $0x8] sm:$0xff]  ;;  %v6374_v2 = vld [vmem:[%s7274_s4 + $0x10] sm:$0xff] }
   0x2   :  { %v6378_v3 = vpack.c.bf16 %v6369_v1, %v6364_v0  ;;  %v6383_v4 = vld [vmem:[%s7274_s4 + $0x18] sm:$0xff]  ;;  %v6388_v5 = vld [vmem:[%s7270_s0] sm:$0xff] }
   0x3   :  { %v6392_v6 = vpack.c.bf16 %v6383_v4, %v6374_v2  ;;  %5248 = vmatprep.mubr.msk.f32.mxu1 %vm66_vm0, %v6388_v5 }
   0x4   :  { %15 = vsyncpa [#allocation4], 0  ;;  %5635 = vmatprep.subr.bf16.mxu1 %v6378_v3  ;;  %v6403_v7 = vld [vmem:[%s7270_s0 + $0x8] sm:$0xff]  ;;  %vm154_vm1 = vcmask 64512   ;;  %s6290_s25 = smov 120   ;;  %s6291_s0 = smov 96  }
   0x5   :  { %5637 = vmatpush3.bf16.msra.mxu1 %v6378_v3  ;;  %s6292_s26 = smov 88   ;;  %vm6427_vm2 = vmpackc.low %vm154_vm1, %vm154_vm1  ;;  %v6446_v22 = vld [vmem:[%s7272_s2 + $0x8] sm:$0xff]  ;;  %v6451_v23 = vld [vmem:[%s7272_s2] sm:$0xff]  ;;  %vm238_vm3 = vcmask 130048   ;;  %s6293_s11 = smov 64   ;;  %vm558_vm4 = vcmask 130112  }
   0x6   :  { %5639 = vmatprep.subr.bf16.mxu1 %v6392_v6  ;;  %s6294_s12 = smov 80   ;;  %s6295_s13 = smov 56   ;;  %vm769_vm5 = vcmask 195712   ;;  %vm980_vm6 = vcmask 261312   ;;  %vm2331_vm7 = vcmask 523264  }
   0x7   :  { %s6296_s14 = smov 112   ;;  %s6297_s15 = smov 72  }
   0x8   :  { %s6298_s16 = smov 104   ;;  %s6299_s17 = smov 48  }
   0x9   :  { %5641 = vmatpush3.bf16.msra.mxu1 %v6392_v6  ;;  %s7285_s18 = smov 8   ;;  %s6301_s19 = smov 40  }
   0xa   :  { %s7283_s20 = smov 16   ;;  %s7281_s27 = smov 24  }
   0xb   :  { %s7290_s24 = smov 16  }
   0xc   :  { %5249 = vmatmul.mubr.msk.f32.vlgmr.msra.gmra.mrb[0].mxu1 %vm66_vm0, %v6403_v7 }
  0xdf   :  { %v6407_v8 = vpop.f32.mrb[0].mxu1 }
  0xe0   :  { %v6409_v9 = vpop.f32.mrb[1].mxu1 }
  0xe1   :  { %350 = vrot.lane.b32.xlu1 %v6409_v9, %s6290_s25  ;;  %5255 = vmatprep.mubr.msk.f32.mxu1 %vm154_vm1, %v6409_v9  ;;  %v6417_v10 = vpack.i.bf16 %v6407_v8, %v6409_v9 }
  0xe3   :  { %5939 = vrot.lane.b32.xlu0 %v6417_v10, %s6291_s0 }
  0xe5   :  { %352 = vrot.lane.b32.xlu1 %v6407_v8, %s6290_s25 }
  0xe7   :  { %5944 = vrot.lane.b32.xlu0 %v6417_v10, %s6292_s26 }
 0x153   :  { %v351_v20 = vpop.permute.xlu1 %350 }
 0x155   :  { %v5940_v11 = vpop.permute.xlu0 %5939 }
 0x156   :  { %v5942_v12 = vunpack.i.h.bf16 %v5940_v11  ;;  %v5941_v13 = vunpack.i.l.bf16 %v5940_v11 }
 0x157   :  { %v353_v21 = vpop.permute.xlu1 %352 }
 0x158   :  { %v5642_v15 = vpack.c.bf16 %v5942_v12, %v5941_v13 }
 0x159   :  { %v5945_v16 = vpop.permute.xlu0 %5944 }
 0x15a   :  { %v5947_v17 = vunpack.i.h.bf16 %v5945_v16  ;;  %v5946_v18 = vunpack.i.l.bf16 %v5945_v16  ;;  %5644 = vmatprep.subr.msk.bf16.mxu1 %vm6427_vm2, %v5642_v15 }
 0x15b   :  { %5647 = vmatpush3.bf16.xpose.msk.msra.mxu1 %vm6427_vm2, %v5642_v15 }
 0x15c   :  { %v5652_v19 = vpack.c.bf16 %v5947_v17, %v5946_v18 }
 0x15e   :  { %5654 = vmatprep.subr.msk.bf16.mxu1 %vm6427_vm2, %v5652_v19 }
 0x162   :  { %5256 = vmatmul.mubr.msk.f32.vlgmr.msra.gmra.mrb[2].mxu1 %vm154_vm1, %v6407_v8 }
 0x163   :  { %5657 = vmatpush3.bf16.xpose.msk.msra.mxu1 %vm6427_vm2, %v5652_v19  ;;  %5269 = vmatprep.mubr.msk.f32.mxu1 %vm154_vm1, %v351_v20 }
 0x16a   :  { %5270 = vmatmul.mubr.msk.f32.vlgmr.msra.gmra.mrb[4].mxu1 %vm154_vm1, %v353_v21 }
 0x235   :  { %v5257_v24 = vpop.f32.mrb[2].mxu1 }
 0x236   :  { %v235_v25 = vadd.f32 %v5257_v24, %v6446_v22  ;;  %v229_v26 = vpop.f32.mrb[3].mxu1 }
 0x237   :  { %v230_v27 = vadd.f32 %v229_v26, %v6451_v23 }
 0x238   :  { %v242_v28 = vsel %vm238_vm3, %v235_v25, -inf }
 0x239   :  { %243 = vmax.xlane.f32.xlu1 %v242_v28  ;;  %v239_v29 = vsel %vm238_vm3, %v230_v27, -inf }
 0x23a   :  { %240 = vmax.xlane.f32.xlu0 %v239_v29 }
 0x23d   :  { %v5271_v30 = vpop.f32.mrb[4].mxu1 }
 0x23e   :  { %v432_v31 = vpop.f32.mrb[5].mxu1  ;;  %v438_v33 = vadd.f32 %v5271_v30, %v6446_v22 }
 0x23f   :  { %v433_v32 = vadd.f32 %v432_v31, %v6451_v23 }
 0x240   :  { %v444_v35 = vsel %vm238_vm3, %v438_v33, -inf }
 0x241   :  { %v441_v34 = vsel %vm238_vm3, %v433_v32, -inf }
 0x242   :  { %442 = vmax.xlane.f32.xlu0 %v441_v34 }
 0x246   :  { %445 = vmax.xlane.f32.xlu0 %v444_v35 }
 0x24a   :  { %5949 = vrot.lane.b32.xlu1 %v6417_v10, %s6293_s11 }
 0x2c6   :  { %v244_v36 = vpop.xlane.xlu1 %243 }
 0x2c7   :  { %v246_v37 = vsub.f32 %v235_v25, %v244_v36  ;;  %v241_v38 = vpop.xlane.xlu0 %240 }
 0x2c8   :  { %v245_v39 = vsub.f32 %v230_v27, %v241_v38 }
 0x2c9   :  { %v249_v40 = vmul.f32 1.442695, %v246_v37 }
 0x2ca   :  { %v247_v41 = vmul.f32 1.442695, %v245_v39  ;;  %v5950_v42 = vpop.permute.xlu1 %5949 }
 0x2cb   :  { %6108 = vpow2.f32 %v249_v40  ;;  %v5952_v43 = vunpack.i.h.bf16 %v5950_v42  ;;  %v5951_v44 = vunpack.i.l.bf16 %v5950_v42 }
 0x2cc   :  { %6110 = vpow2.f32 %v247_v41 }
 0x2cd   :  { %v5648_v45 = vpack.c.bf16 %v5952_v43, %v5951_v44 }
 0x2cf   :  { %5649 = vmatprep.subr.bf16.mxu0 %v5648_v45  ;;  %v443_v46 = vpop.xlane.xlu0 %442 }
 0x2d0   :  { %5651 = vmatpush3.bf16.msra.mxu0 %v5648_v45  ;;  %v447_v56 = vsub.f32 %v433_v32, %v443_v46 }
 0x2d2   :  { %v449_v57 = vmul.f32 1.442695, %v447_v56 }
 0x2d3   :  { %v446_v47 = vpop.xlane.xlu0 %445 }
 0x2d4   :  { %v448_v48 = vsub.f32 %v438_v33, %v446_v47 }
 0x2d5   :  { %v6109_v49 = vpop.eup %6108 }
 0x2d6   :  { %v6111_v50 = vpop.eup %6110  ;;  %v451_v51 = vmul.f32 1.442695, %v448_v48  ;;  %v254_v52 = vsel %vm238_vm3, %v6109_v49, 0.0 }
 0x2d7   :  { %255 = vadd.xlane.f32.xlu0 %v254_v52  ;;  %v251_v53 = vsel %vm238_vm3, %v6111_v50, 0.0 }
 0x2d8   :  { %6112 = vpow2.f32 %v451_v51  ;;  %252 = vadd.xlane.f32.xlu1 %v251_v53 }
 0x2d9   :  { %6114 = vpow2.f32 %v449_v57 }
 0x2e2   :  { %v6113_v54 = vpop.eup %6112 }
 0x2e3   :  { %v456_v55 = vsel %vm238_vm3, %v6113_v54, 0.0  ;;  %v6115_v58 = vpop.eup %6114 }
 0x2e4   :  { %457 = vadd.xlane.f32.xlu0 %v456_v55  ;;  %v453_v59 = vsel %vm238_vm3, %v6115_v58, 0.0 }
 0x2e9   :  { %5959 = vrot.lane.b32.xlu1 %v6417_v10, %s6294_s12 }
 0x2fa   :  { %5954 = vrot.lane.b32.xlu0 %v6417_v10, %s6295_s13 }
 0x2fe   :  { %563 = vrot.lane.b32.xlu0 %v6407_v8, %s6296_s14 }
 0x30d   :  { %454 = vadd.xlane.f32.xlu1 %v453_v59 }
 0x31e   :  { %561 = vrot.lane.b32.xlu1 %v6409_v9, %s6296_s14 }
 0x364   :  { %v256_v60 = vpop.xlane.xlu0 %255 }
 0x365   :  { %6116 = vrcp.f32 %v256_v60  ;;  %v253_v61 = vpop.xlane.xlu1 %252 }
 0x366   :  { %6118 = vrcp.f32 %v253_v61 }
 0x369   :  { %v5960_v15 = vpop.permute.xlu1 %5959 }
 0x36a   :  { %v5962_v17 = vunpack.i.h.bf16 %v5960_v15  ;;  %v5961_v18 = vunpack.i.l.bf16 %v5960_v15 }
 0x36c   :  { %v5662_v24 = vpack.c.bf16 %v5962_v17, %v5961_v18 }
 0x36f   :  { %v6117_v62 = vpop.eup %6116 }
 0x370   :  { %v6119_v63 = vpop.eup %6118  ;;  %v260_v13 = vmul.f32 %v6117_v62, %v6109_v49 }
 0x371   :  { %v458_v11 = vpop.xlane.xlu0 %457  ;;  %v259_v12 = vmul.f32 %v6119_v63, %v6111_v50 }
 0x372   :  { %6120 = vrcp.f32 %v458_v11 }
 0x373   :  { %5262 = vmatprep.mubr.msk.f32.mxu0 %vm238_vm3, %v259_v12 }
 0x374   :  { %5263 = vmatmul.mubr.msk.f32.vlgmr.msra.gmra.mrb[0].mxu0 %vm238_vm3, %v260_v13 }
 0x375   :  { %v5955_v16 = vpop.permute.xlu0 %5954 }
 0x376   :  { %v5957_v19 = vunpack.i.h.bf16 %v5955_v16  ;;  %v5956_v20 = vunpack.i.l.bf16 %v5955_v16 }
 0x378   :  { %v5658_v21 = vpack.c.bf16 %v5957_v19, %v5956_v20 }
 0x379   :  { %v564_v31 = vpop.permute.xlu0 %563 }
 0x37a   :  { %5659 = vmatprep.subr.bf16.mxu0 %v5658_v21 }
 0x37b   :  { %5661 = vmatpush3.bf16.msra.mxu0 %v5658_v21 }
 0x37c   :  { %5664 = vmatprep.subr.msk.bf16.mxu0 %vm6427_vm2, %v5662_v24  ;;  %v6121_v26 = vpop.eup %6120 }
 0x37d   :  { %v462_v29 = vmul.f32 %v6121_v26, %v6113_v54 }
 0x39a   :  { %v455_v25 = vpop.xlane.xlu1 %454 }
 0x39b   :  { %6122 = vrcp.f32 %v455_v25 }
 0x39e   :  { %v562_v30 = vpop.permute.xlu1 %561 }
 0x3a5   :  { %v6123_v27 = vpop.eup %6122 }
 0x3a6   :  { %v461_v28 = vmul.f32 %v6123_v27, %v6115_v58 }
 0x3a8   :  { %5276 = vmatprep.mubr.msk.f32.mxu0 %vm238_vm3, %v461_v28 }
 0x3a9   :  { %5277 = vmatmul.mubr.msk.f32.vlgmr.msra.gmra.mrb[2].mxu0 %vm238_vm3, %v462_v29 }
 0x3aa   :  { %5667 = vmatpush3.bf16.xpose.msk.msra.mxu0 %vm6427_vm2, %v5662_v24  ;;  %5283 = vmatprep.mubr.msk.f32.mxu0 %vm154_vm1, %v562_v30  ;;  %v38_v30 = vld [vmem:[%s7271_s1] sm:$0xff] }
 0x3b1   :  { %5284 = vmatmul.mubr.msk.f32.vlgmr.msra.gmra.mrb[4].mxu0 %vm154_vm1, %v564_v31  ;;  %v39_v31 = vld [vmem:[%s7271_s1 + $0x8] sm:$0xff] }
 0x447   :  { %v5264_v32 = vpop.f32.mrb[0].mxu0 }
 0x448   :  { %349 = vst.msk [vmem:[#allocation2 + $0x8] sm:$0xff] %vm154_vm1, %v5264_v32  ;;  %v339_v33 = vpop.f32.mrb[1].mxu0 }
 0x449   :  { %348 = vst.msk [vmem:[#allocation2] sm:$0xff] %vm154_vm1, %v339_v33 }
 0x47c   :  { %v6487_v34 = vpop.f32.mrb[2].mxu0 }
 0x47d   :  { %v6489_v35 = vpop.f32.mrb[3].mxu0 }
 0x484   :  { %v5285_v36 = vpop.f32.mrb[4].mxu0 }
 0x485   :  { %v649_v37 = vadd.f32 %v5285_v36, %v6446_v22  ;;  %v643_v38 = vpop.f32.mrb[5].mxu0 }
 0x486   :  { %v644_v39 = vadd.f32 %v643_v38, %v6451_v23 }
 0x487   :  { %v655_v40 = vsel %vm238_vm3, %v649_v37, -inf }
 0x488   :  { %656 = vmax.xlane.f32.xlu0 %v655_v40  ;;  %v652_v41 = vsel %vm238_vm3, %v644_v39, -inf }
 0x489   :  { %653 = vmax.xlane.f32.xlu1 %v652_v41 }
 0x515   :  { %v657_v42 = vpop.xlane.xlu0 %656 }
 0x516   :  { %v659_v43 = vsub.f32 %v649_v37, %v657_v42  ;;  %v654_v44 = vpop.xlane.xlu1 %653 }
 0x517   :  { %v658_v45 = vsub.f32 %v644_v39, %v654_v44 }
 0x518   :  { %v662_v46 = vmul.f32 1.442695, %v659_v43 }
 0x519   :  { %v660_v47 = vmul.f32 1.442695, %v658_v45  ;;  %v48_v45 = vld [vmem:[%s7275_s5] sm:$0xff] }
 0x51a   :  { %6124 = vpow2.f32 %v662_v46  ;;  %v49_v46 = vld [vmem:[%s7275_s5 + $0x8] sm:$0xff] }
 0x51b   :  { %6126 = vpow2.f32 %v660_v47  ;;  %v6551_v47 = vpack.c.bf16 %v49_v46, %v48_v45 }
 0x524   :  { %v6125_v48 = vpop.eup %6124 }
 0x525   :  { %v6127_v49 = vpop.eup %6126  ;;  %v667_v50 = vsel %vm238_vm3, %v6125_v48, 0.0 }
 0x526   :  { %668 = vadd.xlane.f32.xlu1 %v667_v50  ;;  %v664_v51 = vsel %vm238_vm3, %v6127_v49, 0.0 }
 0x527   :  { %665 = vadd.xlane.f32.xlu0 %v664_v51 }
 0x537   :  { %5969 = vrot.lane.b32.xlu1 %v6417_v10, %s6297_s15 }
 0x53b   :  { %772 = vrot.lane.b32.xlu1 %v6409_v9, %s6298_s16 }
 0x53d   :  { %5964 = vrot.lane.b32.xlu0 %v6417_v10, %s6299_s17 }
 0x541   :  { %774 = vrot.lane.b32.xlu0 %v6407_v8, %s6298_s16 }
 0x5b3   :  { %v669_v52 = vpop.xlane.xlu1 %668 }
 0x5b4   :  { %6128 = vrcp.f32 %v669_v52  ;;  %v666_v53 = vpop.xlane.xlu0 %665 }
 0x5b5   :  { %6130 = vrcp.f32 %v666_v53 }
 0x5b7   :  { %v5970_v54 = vpop.permute.xlu1 %5969 }
 0x5b8   :  { %v5965_v55 = vpop.permute.xlu0 %5964  ;;  %v5972_v56 = vunpack.i.h.bf16 %v5970_v54  ;;  %v5971_v57 = vunpack.i.l.bf16 %v5970_v54 }
 0x5b9   :  { %v5967_v58 = vunpack.i.h.bf16 %v5965_v55  ;;  %v5966_v59 = vunpack.i.l.bf16 %v5965_v55 }
 0x5ba   :  { %v5672_v61 = vpack.c.bf16 %v5972_v56, %v5971_v57 }
 0x5bb   :  { %v5668_v60 = vpack.c.bf16 %v5967_v58, %v5966_v59  ;;  %v773_v11 = vpop.permute.xlu1 %772 }
 0x5bc   :  { %v775_v12 = vpop.permute.xlu0 %774 }
 0x5bd   :  { %5669 = vmatprep.subr.bf16.mxu1 %v5668_v60 }
 0x5be   :  { %v6129_v9 = vpop.eup %6128  ;;  %5671 = vmatpush3.bf16.msra.mxu1 %v5668_v60 }
 0x5bf   :  { %v6131_v62 = vpop.eup %6130  ;;  %5674 = vmatprep.subr.msk.bf16.mxu1 %vm6427_vm2, %v5672_v61  ;;  %v673_v63 = vmul.f32 %v6129_v9, %v6125_v48  ;;  %v50_v48 = vld [vmem:[%s7275_s5 + $0x10] sm:$0xff] }
 0x5c0   :  { %v672_v8 = vmul.f32 %v6131_v62, %v6127_v49  ;;  %v51_v49 = vld [vmem:[%s7275_s5 + $0x18] sm:$0xff] }
 0x5c1   :  { %v6559_v50 = vpack.c.bf16 %v51_v49, %v50_v48 }
 0x5c2   :  { %5290 = vmatprep.mubr.msk.f32.mxu1 %vm238_vm3, %v672_v8 }
 0x5c3   :  { %5291 = vmatmul.mubr.msk.f32.vlgmr.msra.gmra.mrb[6].mxu1 %vm238_vm3, %v673_v63 }
 0x5c4   :  { %5297 = vmatprep.mubr.msk.f32.mxu1 %vm154_vm1, %v773_v11 }
 0x5c7   :  { %5677 = vmatpush3.bf16.xpose.msk.msra.mxu1 %vm6427_vm2, %v5672_v61 }
 0x5c8   :  { %5691 = vmatprep.subr.bf16.mxu1 %v6378_v3 }
 0x5ce   :  { %5298 = vmatmul.mubr.msk.f32.vlgmr.msra.gmra.mrb[8].mxu1 %vm154_vm1, %v775_v12 }
 0x5cf   :  { %5693 = vmatpush3.bf16.msra.mxu1 %v6378_v3  ;;  %5326 = vmatprep.mubr.msk.f32.mxu1 %vm66_vm0, %v38_v30 }
 0x5d0   :  { %5695 = vmatprep.subr.bf16.mxu1 %v6392_v6 }
 0x5d3   :  { %5697 = vmatpush3.bf16.msra.mxu1 %v6392_v6 }
 0x5d6   :  { %5327 = vmatmul.mubr.msk.f32.vlgmr.msra.gmra.mrb[10].mxu1 %vm66_vm0, %v39_v31 }
 0x696   :  { %v5292_v13 = vpop.f32.mrb[6].mxu1 }
 0x697   :  { %v752_v15 = vpop.f32.mrb[7].mxu1 }
 0x6a1   :  { %v5299_v16 = vpop.f32.mrb[8].mxu1 }
 0x6a2   :  { %v860_v17 = vadd.f32 %v5299_v16, %v6446_v22  ;;  %v854_v18 = vpop.f32.mrb[9].mxu1 }
 0x6a3   :  { %v855_v19 = vadd.f32 %v854_v18, %v6451_v23 }
 0x6a4   :  { %v866_v20 = vsel %vm238_vm3, %v860_v17, -inf }
 0x6a5   :  { %867 = vmax.xlane.f32.xlu0 %v866_v20  ;;  %v863_v21 = vsel %vm238_vm3, %v855_v19, -inf }
 0x6a6   :  { %864 = vmax.xlane.f32.xlu1 %v863_v21 }
 0x6a9   :  { %v6565_v51 = vpop.f32.mrb[10].mxu1 }
 0x6aa   :  { %v6567_v52 = vpop.f32.mrb[11].mxu1 }
 0x6ab   :  { %v6571_v54 = vpack.i.bf16 %v6565_v51, %v6567_v52  ;;  %5344 = vmatprep.mubr.msk.f32.mxu1 %vm154_vm1, %v6567_v52 }
 0x732   :  { %v868_v24 = vpop.xlane.xlu0 %867 }
 0x733   :  { %v870_v3 = vsub.f32 %v860_v17, %v868_v24  ;;  %v865_v25 = vpop.xlane.xlu1 %864  ;;  %v6601_v17 = vld [vmem:[%s7278_s8] sm:$0xff] }
 0x734   :  { %v869_v26 = vsub.f32 %v855_v19, %v865_v25 }
 0x735   :  { %v873_v27 = vmul.f32 1.442695, %v870_v3 }
 0x736   :  { %v871_v6 = vmul.f32 1.442695, %v869_v26 }
 0x737   :  { %6132 = vpow2.f32 %v873_v27 }
 0x738   :  { %6134 = vpow2.f32 %v871_v6 }
 0x741   :  { %v6133_v28 = vpop.eup %6132 }
 0x742   :  { %v6135_v29 = vpop.eup %6134  ;;  %v878_v22 = vsel %vm238_vm3, %v6133_v28, 0.0 }
 0x743   :  { %879 = vadd.xlane.f32.xlu1 %v878_v22  ;;  %v875_v23 = vsel %vm238_vm3, %v6135_v29, 0.0 }
 0x744   :  { %876 = vadd.xlane.f32.xlu0 %v875_v23 }
 0x754   :  { %552 = vrot.lane.b32.xlu1 %v6489_v35, %s7285_s18 }
 0x758   :  { %554 = vrot.lane.b32.xlu1 %v6487_v34, %s7285_s18 }
 0x75a   :  { %5974 = vrot.lane.b32.xlu0 %v6417_v10, %s6301_s19 }
 0x75c   :  { %765 = vrot.lane.b32.xlu1 %v5292_v13, %s7283_s20  ;;  %v985_v13 = vlaneseq }
 0x75e   :  { %763 = vrot.lane.b32.xlu0 %v752_v15, %s7283_s20  ;;  %v6595_v15 = vshrl.u32 %v985_v13, 7 }
 0x760   :  { %v987_v16 = vsub.s32 0, %v6595_v15 }
 0x762   :  { %v6606_v18 = vrot.slane %v6601_v17, %v987_v16 }
 0x7d0   :  { %v880_v32 = vpop.xlane.xlu1 %879 }
 0x7d1   :  { %6136 = vrcp.f32 %v880_v32  ;;  %v877_v10 = vpop.xlane.xlu0 %876 }
 0x7d2   :  { %6138 = vrcp.f32 %v877_v10 }
 0x7d4   :  { %v553_v33 = vpop.permute.xlu1 %552 }
 0x7d5   :  { %559 = vst.msk [vmem:[#allocation2] sm:$0xff] %vm558_vm4, %v553_v33  ;;  %v5975_v34 = vpop.permute.xlu0 %5974 }
 0x7d6   :  { %v5977_v35 = vunpack.i.h.bf16 %v5975_v34  ;;  %v5976_v36 = vunpack.i.l.bf16 %v5975_v34 }
 0x7d8   :  { %v555_v37 = vpop.permute.xlu1 %554  ;;  %v5678_v38 = vpack.c.bf16 %v5977_v35, %v5976_v36  ;;  %v5993_v36 = vpack.i.bf16 %v6383_v4, %v6374_v2 }
 0x7d9   :  { %560 = vst.msk [vmem:[#allocation2 + $0x8] sm:$0xff] %vm558_vm4, %v555_v37  ;;  %v764_v39 = vpop.permute.xlu0 %763  ;;  %v5988_v37 = vpack.i.bf16 %v6369_v1, %v6364_v0 }
 0x7da   :  { %770 = vst.msk [vmem:[#allocation2] sm:$0xff] %vm769_vm5, %v764_v39  ;;  %5679 = vmatprep.subr.bf16.mxu0 %v5678_v38  ;;  %v6636_v39 = vld [vmem:[%s7273_s3] sm:$0xff] }
 0x7db   :  { %v6137_v40 = vpop.eup %6136  ;;  %5681 = vmatpush3.bf16.msra.mxu0 %v5678_v38  ;;  %v6631_v38 = vld [vmem:[%s7273_s3 + $0x8] sm:$0xff] }
 0x7dc   :  { %v6139_v41 = vpop.eup %6138  ;;  %v766_v42 = vpop.permute.xlu1 %765  ;;  %v884_v44 = vmul.f32 %v6137_v40, %v6133_v28  ;;  %5683 = vmatprep.subr.bf16.mxu0 %v6551_v47 }
 0x7dd   :  { %771 = vst.msk [vmem:[#allocation2 + $0x8] sm:$0xff] %vm769_vm5, %v766_v42  ;;  %v883_v43 = vmul.f32 %v6139_v41, %v6135_v29 }
 0x7df   :  { %5304 = vmatprep.mubr.msk.f32.mxu0 %vm238_vm3, %v883_v43 }
 0x7e0   :  { %5305 = vmatmul.mubr.msk.f32.vlgmr.msra.gmra.mrb[6].mxu0 %vm238_vm3, %v884_v44 }
 0x7e1   :  { %5685 = vmatpush3.bf16.msra.mxu0 %v6551_v47 }
 0x7e2   :  { %5687 = vmatprep.subr.bf16.mxu0 %v6559_v50 }
 0x7e5   :  { %5689 = vmatpush3.bf16.msra.mxu0 %v6559_v50 }
 0x8b3   :  { %v5306_v53 = vpop.f32.mrb[6].mxu0 }
 0x8b4   :  { %976 = vrot.lane.b32.xlu1 %v5306_v53, %s7281_s27  ;;  %v963_v55 = vpop.f32.mrb[7].mxu0 }
 0x8b5   :  { %974 = vrot.lane.b32.xlu0 %v963_v55, %s7281_s27 }
 0x8b8   :  { %5984 = vrot.lane.b32.xlu1 %v6571_v54, %s6292_s26 }
 0x8b9   :  { %5979 = vrot.lane.b32.xlu0 %v6571_v54, %s6291_s0 }
 0x926   :  { %v977_v56 = vpop.permute.xlu1 %976 }
 0x927   :  { %982 = vst.msk [vmem:[#allocation2 + $0x8] sm:$0xff] %vm980_vm6, %v977_v56  ;;  %v975_v57 = vpop.permute.xlu0 %974 }
 0x928   :  { %981 = vst.msk [vmem:[#allocation2] sm:$0xff] %vm980_vm6, %v975_v57 }
 0x92a   :  { %v5985_v8 = vpop.permute.xlu1 %5984 }
 0x92b   :  { %v5980_v58 = vpop.permute.xlu0 %5979  ;;  %v5987_v63 = vunpack.i.h.bf16 %v5985_v8  ;;  %v5986_v11 = vunpack.i.l.bf16 %v5985_v8 }
 0x92c   :  { %v5982_v59 = vunpack.i.h.bf16 %v5980_v58  ;;  %v5981_v60 = vunpack.i.l.bf16 %v5980_v58 }
 0x92d   :  { %v5716_v12 = vpack.c.bf16 %v5987_v63, %v5986_v11 }
 0x92e   :  { %v5706_v61 = vpack.c.bf16 %v5982_v59, %v5981_v60  ;;  %v984_v62 = vld [vmem:[#allocation2 + $0x8] sm:$0xff]  ;;  %v1101_v59 = vsub.s32 1, %v6595_v15  ;;  %v1107_v60 = vsub.s32 2, %v6595_v15 }
 0x92f   :  { %v983_v9 = vld [vmem:[#allocation2] sm:$0xff] }
 0x930   :  { %5315 = vmatprep.mubr.msk.f32.mxu0 %vm66_vm0, %v983_v9  ;;  %5708 = vmatprep.subr.msk.bf16.mxu1 %vm6427_vm2, %v5706_v61  ;;  %v1108_v11 = vrot.slane %v6601_v17, %v1107_v60 }
 0x931   :  { %5316 = vmatmul.mubr.msk.f32.vlgmr.msra.gmra.mrb[8].mxu0 %vm66_vm0, %v984_v62  ;;  %5711 = vmatpush3.bf16.xpose.msk.msra.mxu1 %vm6427_vm2, %v5706_v61  ;;  %v1102_v61 = vrot.slane %v6601_v17, %v1101_v59 }
 0x932   :  { %5718 = vmatprep.subr.msk.bf16.mxu1 %vm6427_vm2, %v5716_v12 }
 0x938   :  { %5345 = vmatmul.mubr.msk.f32.vlgmr.msra.gmra.mrb[12].mxu1 %vm154_vm1, %v6565_v51 }
 0x939   :  { %5721 = vmatpush3.bf16.xpose.msk.msra.mxu1 %vm6427_vm2, %v5716_v12 }
 0xa04   :  { %v5317_v19 = vpop.f32.mrb[8].mxu0 }
 0xa05   :  { %v1067_v20 = vadd.f32 %v5317_v19, %v6606_v18  ;;  %v1061_v21 = vpop.f32.mrb[9].mxu0 }
 0xa06   :  { %v1062_v24 = vadd.f32 %v1061_v21, %v6606_v18 }
 0xa07   :  { %v1071_v3 = vadd.f32 %v1067_v20, %v6403_v7 }
 0xa08   :  { %v1070_v25 = vadd.f32 %v1062_v24, %v6388_v5 }
 0xa09   :  { %v1075_v26 = vsel %vm66_vm0, %v1071_v3, 0.0 }
 0xa0a   :  { %1076 = vadd.xlane.f32.xlu1 %v1075_v26  ;;  %v1072_v27 = vsel %vm66_vm0, %v1070_v25, 0.0 }
 0xa0b   :  { %1073 = vadd.xlane.f32.xlu0 %v1072_v27  ;;  %v5346_v6 = vpop.f32.mrb[12].mxu1 }
 0xa0c   :  { %v1369_v28 = vpop.f32.mrb[13].mxu1  ;;  %v1375_v40 = vadd.f32 %v5346_v6, %v6631_v38 }
 0xa0d   :  { %v1370_v2 = vadd.f32 %v1369_v28, %v6636_v39 }
 0xa0e   :  { %v1381_v4 = vsel %vm238_vm3, %v1375_v40, -inf }
 0xa0f   :  { %v1378_v0 = vsel %vm238_vm3, %v1370_v2, -inf }
 0xa1b   :  { %1485 = vrot.lane.b32.xlu1 %v6565_v51, %s6290_s25 }
 0xa21   :  { %1483 = vrot.lane.b32.xlu0 %v6567_v52, %s6290_s25 }
 0xa97   :  { %v1077_v29 = vpop.xlane.xlu1 %1076 }
 0xa98   :  { %v1080_v22 = vmul.f32 0.03125, %v1077_v29  ;;  %v1074_v23 = vpop.xlane.xlu0 %1073 }
 0xa99   :  { %v1079_v7 = vmul.f32 0.03125, %v1074_v23 }
 0xa9a   :  { %v1082_v30 = vsub.f32 %v1071_v3, %v1080_v22 }
 0xa9b   :  { %v1081_v5 = vsub.f32 %v1070_v25, %v1079_v7  ;;  %v1486_v10 = vpop.permute.xlu1 %1485 }
 0xa9c   :  { %v1484_v31 = vpop.permute.xlu0 %1483  ;;  %v1084_v32 = vmul.f32 %v1082_v30, %v1082_v30 }
 0xa9d   :  { %5358 = vmatprep.mubr.msk.f32.mxu1 %vm154_vm1, %v1484_v31  ;;  %v1083_v33 = vmul.f32 %v1081_v5, %v1081_v5 }
 0xa9e   :  { %5359 = vmatmul.mubr.msk.f32.vlgmr.msra.gmra.mrb[14].mxu1 %vm154_vm1, %v1486_v10  ;;  %v1088_v34 = vsel %vm66_vm0, %v1084_v32, 0.0 }
 0xa9f   :  { %1089 = vadd.xlane.f32.xlu1 %v1088_v34  ;;  %v1085_v35 = vsel %vm66_vm0, %v1083_v33, 0.0 }
 0xaa0   :  { %1086 = vadd.xlane.f32.xlu0 %v1085_v35 }
 0xab0   :  { %5994 = vrot.lane.b32.xlu1 %v5993_v36, %s6293_s11 }
 0xab6   :  { %5989 = vrot.lane.b32.xlu0 %v5988_v37, %s6293_s11 }
 0xad4   :  { %1382 = vmax.xlane.f32.xlu1 %v1381_v4 }
 0xad5   :  { %1379 = vmax.xlane.f32.xlu0 %v1378_v0 }
 0xb2c   :  { %v1090_v1 = vpop.xlane.xlu1 %1089 }
 0xb2d   :  { %v1092_v41 = vmul.f32 0.03125, %v1090_v1  ;;  %v1087_v42 = vpop.xlane.xlu0 %1086 }
 0xb2e   :  { %v1091_v43 = vmul.f32 0.03125, %v1087_v42 }
 0xb2f   :  { %v1094_v44 = vadd.f32 1e-05, %v1092_v41 }
 0xb30   :  { %v1093_v45 = vadd.f32 1e-05, %v1091_v43  ;;  %v5995_v46 = vpop.permute.xlu1 %5994 }
 0xb31   :  { %6140 = vrsqrt.f32 %v1094_v44  ;;  %v5990_v48 = vpop.permute.xlu0 %5989  ;;  %v5997_v49 = vunpack.i.h.bf16 %v5995_v46  ;;  %v5996_v53 = vunpack.i.l.bf16 %v5995_v46 }
 0xb32   :  { %6142 = vrsqrt.f32 %v1093_v45  ;;  %v5992_v55 = vunpack.i.h.bf16 %v5990_v48  ;;  %v5991_v56 = vunpack.i.l.bf16 %v5990_v48 }
 0xb33   :  { %v5702_v58 = vpack.c.bf16 %v5997_v49, %v5996_v53 }
 0xb34   :  { %v5698_v57 = vpack.c.bf16 %v5992_v55, %v5991_v56 }
 0xb36   :  { %5699 = vmatprep.subr.bf16.mxu0 %v5698_v57 }
 0xb37   :  { %5701 = vmatpush3.bf16.msra.mxu0 %v5698_v57 }
 0xb38   :  { %5703 = vmatprep.subr.bf16.mxu0 %v5702_v58 }
 0xb3b   :  { %v6141_v9 = vpop.eup %6140  ;;  %5705 = vmatpush3.bf16.msra.mxu0 %v5702_v58 }
 0xb3c   :  { %v6143_v62 = vpop.eup %6142  ;;  %v1098_v8 = vmul.f32 %v6141_v9, %v1082_v30 }
 0xb3d   :  { %v1097_v63 = vmul.f32 %v6143_v62, %v1081_v5 }
 0xb3e   :  { %v1104_v12 = vmul.f32 %v1102_v61, %v1098_v8 }
 0xb3f   :  { %v1103_v13 = vmul.f32 %v1102_v61, %v1097_v63 }
 0xb40   :  { %v6652_v20 = vadd.f32 %v1108_v11, %v1104_v12 }
 0xb41   :  { %v6650_v19 = vadd.f32 %v1108_v11, %v1103_v13 }
 0xb43   :  { %5337 = vmatprep.mubr.msk.f32.mxu0 %vm66_vm0, %v6650_v19 }
 0xb44   :  { %5338 = vmatmul.mubr.msk.f32.vlgmr.msra.gmra.mrb[10].mxu0 %vm66_vm0, %v6652_v20 }
 0xb61   :  { %v1383_v3 = vpop.xlane.xlu1 %1382 }
 0xb62   :  { %v1380_v21 = vpop.xlane.xlu0 %1379  ;;  %v1385_v26 = vsub.f32 %v1375_v40, %v1383_v3 }
 0xb63   :  { %v1384_v24 = vsub.f32 %v1370_v2, %v1380_v21 }
 0xb64   :  { %v1388_v27 = vmul.f32 1.442695, %v1385_v26 }
 0xb65   :  { %v1386_v25 = vmul.f32 1.442695, %v1384_v24 }
 0xb67   :  { %6144 = vpow2.f32 %v1386_v25 }
 0xb68   :  { %6146 = vpow2.f32 %v1388_v27 }
 0xb71   :  { %v6145_v6 = vpop.eup %6144  ;;  %v5360_v28 = vpop.f32.mrb[14].mxu1 }
 0xb72   :  { %v1565_v29 = vpop.f32.mrb[15].mxu1  ;;  %v1390_v22 = vsel %vm238_vm3, %v6145_v6, 0.0  ;;  %v1571_v7 = vadd.f32 %v5360_v28, %v6631_v38  ;;  %v6147_v31 = vpop.eup %6146 }
 0xb73   :  { %v1566_v23 = vadd.f32 %v1565_v29, %v6636_v39  ;;  %1391 = vadd.xlane.f32.xlu1 %v1390_v22  ;;  %v1393_v32 = vsel %vm238_vm3, %v6147_v31, 0.0 }
 0xb74   :  { %v1577_v5 = vsel %vm238_vm3, %v1571_v7, -inf }
 0xb75   :  { %v1574_v30 = vsel %vm238_vm3, %v1566_v23, -inf }
 0xb76   :  { %1575 = vmax.xlane.f32.xlu0 %v1574_v30 }
 0xb7a   :  { %1578 = vmax.xlane.f32.xlu0 %v1577_v5 }
 0xb7e   :  { %1394 = vadd.xlane.f32.xlu0 %v1393_v32 }
 0xc00   :  { %v1392_v10 = vpop.xlane.xlu1 %1391 }
 0xc01   :  { %6148 = vrcp.f32 %v1392_v10 }
 0xc03   :  { %v1576_v33 = vpop.xlane.xlu0 %1575 }
 0xc04   :  { %v1580_v34 = vsub.f32 %v1566_v23, %v1576_v33 }
 0xc06   :  { %v1582_v35 = vmul.f32 1.442695, %v1580_v34 }
 0xc07   :  { %v1579_v36 = vpop.xlane.xlu0 %1578 }
 0xc08   :  { %6150 = vpow2.f32 %v1582_v35  ;;  %v1581_v37 = vsub.f32 %v1571_v7, %v1579_v36 }
 0xc0a   :  { %v1584_v40 = vmul.f32 1.442695, %v1581_v37 }
 0xc0b   :  { %v6149_v2 = vpop.eup %6148  ;;  %v1395_v0 = vpop.xlane.xlu0 %1394 }
 0xc0c   :  { %6152 = vpow2.f32 %v1584_v40  ;;  %v1398_v4 = vmul.f32 %v6149_v2, %v6145_v6 }
 0xc0d   :  { %6154 = vrcp.f32 %v1395_v0 }
 0xc0e   :  { %5351 = vmatprep.mubr.msk.f32.mxu0 %vm238_vm3, %v1398_v4 }
 0xc12   :  { %v6151_v1 = vpop.eup %6150 }
 0xc13   :  { %v1586_v41 = vsel %vm238_vm3, %v6151_v1, 0.0 }
 0xc14   :  { %1587 = vadd.xlane.f32.xlu1 %v1586_v41 }
 0xc16   :  { %v6153_v42 = vpop.eup %6152 }
 0xc17   :  { %v5339_v43 = vpop.f32.mrb[10].mxu0  ;;  %v1589_v44 = vsel %vm238_vm3, %v6153_v42, 0.0  ;;  %v6155_v49 = vpop.eup %6154 }
 0xc18   :  { %v1280_v45 = vpop.f32.mrb[11].mxu0  ;;  %1590 = vadd.xlane.f32.xlu0 %v1589_v44  ;;  %v1399_v53 = vmul.f32 %v6155_v49, %v6147_v31 }
 0xc19   :  { %v5712_v46 = vpack.c.bf16 %v5339_v43, %v1280_v45  ;;  %v6667_v48 = vpack.i.bf16 %v5339_v43, %v1280_v45 }
 0xc1b   :  { %5713 = vmatprep.subr.bf16.mxu0 %v5712_v46 }
 0xc1c   :  { %5715 = vmatpush3.bf16.msra.mxu0 %v5712_v46 }
 0xc1f   :  { %5352 = vmatmul.mubr.msk.f32.vlgmr.msra.gmra.mrb[12].mxu0 %vm238_vm3, %v1399_v53 }
 0xc25   :  { %5999 = vrot.lane.b32.xlu1 %v6667_v48, %s6290_s25 }
 0xc29   :  { %1695 = vrot.lane.b32.xlu1 %v6567_v52, %s6296_s14 }
 0xc2d   :  { %1697 = vrot.lane.b32.xlu1 %v6565_v51, %s6296_s14 }
 0xc2e   :  { %6004 = vrot.lane.b32.xlu0 %v6571_v54, %s6294_s12 }
 0xca1   :  { %v1588_v55 = vpop.xlane.xlu1 %1587 }
 0xca2   :  { %6156 = vrcp.f32 %v1588_v55 }
 0xca5   :  { %v6000_v56 = vpop.permute.xlu1 %5999  ;;  %v1591_v57 = vpop.xlane.xlu0 %1590 }
 0xca6   :  { %v6002_v58 = vunpack.i.h.bf16 %v6000_v56  ;;  %v6001_v61 = vunpack.i.l.bf16 %v6000_v56  ;;  %6158 = vrcp.f32 %v1591_v57 }
 0xca8   :  { %v5722_v9 = vpack.c.bf16 %v6002_v58, %v6001_v61 }
 0xca9   :  { %v6005_v62 = vpop.permute.xlu0 %6004  ;;  %v1696_v3 = vpop.permute.xlu1 %1695 }
 0xcaa   :  { %v6007_v8 = vunpack.i.h.bf16 %v6005_v62  ;;  %v6006_v63 = vunpack.i.l.bf16 %v6005_v62  ;;  %5723 = vmatprep.subr.bf16.mxu0 %v5722_v9 }
 0xcab   :  { %5725 = vmatpush3.bf16.msra.mxu0 %v5722_v9 }
 0xcac   :  { %v6157_v11 = vpop.eup %6156  ;;  %v5726_v12 = vpack.c.bf16 %v6007_v8, %v6006_v63 }
 0xcad   :  { %v1594_v13 = vmul.f32 %v6157_v11, %v6151_v1  ;;  %v1698_v25 = vpop.permute.xlu1 %1697 }
 0xcae   :  { %5728 = vmatprep.subr.msk.bf16.mxu0 %vm6427_vm2, %v5726_v12 }
 0xcaf   :  { %5365 = vmatprep.mubr.msk.f32.mxu0 %vm238_vm3, %v1594_v13 }
 0xcb0   :  { %v6159_v21 = vpop.eup %6158 }
 0xcb1   :  { %v1595_v24 = vmul.f32 %v6159_v21, %v6153_v42 }
 0xcb3   :  { %5366 = vmatmul.mubr.msk.f32.vlgmr.msra.gmra.mrb[14].mxu0 %vm238_vm3, %v1595_v24 }
 0xcb4   :  { %5731 = vmatpush3.bf16.xpose.msk.msra.mxu0 %vm6427_vm2, %v5726_v12  ;;  %5372 = vmatprep.mubr.msk.f32.mxu0 %vm154_vm1, %v1696_v3 }
 0xcbb   :  { %5373 = vmatmul.mubr.msk.f32.vlgmr.msra.gmra.mrb[16].mxu0 %vm154_vm1, %v1698_v25 }
 0xcf2   :  { %v5353_v26 = vpop.f32.mrb[12].mxu0 }
 0xcf3   :  { %1482 = vst.msk [vmem:[#allocation2 + $0x8] sm:$0xff] %vm154_vm1, %v5353_v26  ;;  %v1472_v27 = vpop.f32.mrb[13].mxu0 }
 0xcf4   :  { %1481 = vst.msk [vmem:[#allocation2] sm:$0xff] %vm154_vm1, %v1472_v27 }
 0xd86   :  { %v6688_v6 = vpop.f32.mrb[14].mxu0 }
 0xd87   :  { %v6690_v28 = vpop.f32.mrb[15].mxu0 }
 0xd8e   :  { %v5374_v29 = vpop.f32.mrb[16].mxu0 }
 0xd8f   :  { %v1783_v22 = vadd.f32 %v5374_v29, %v6631_v38  ;;  %v1777_v23 = vpop.f32.mrb[17].mxu0 }
 0xd90   :  { %v1778_v7 = vadd.f32 %v1777_v23, %v6636_v39 }
 0xd91   :  { %v1789_v30 = vsel %vm238_vm3, %v1783_v22, -inf }
 0xd92   :  { %1790 = vmax.xlane.f32.xlu1 %v1789_v30  ;;  %v1786_v5 = vsel %vm238_vm3, %v1778_v7, -inf }
 0xd93   :  { %1787 = vmax.xlane.f32.xlu0 %v1786_v5 }
 0xda3   :  { %6009 = vrot.lane.b32.xlu1 %v6667_v48, %s6296_s14 }
 0xda7   :  { %1905 = vrot.lane.b32.xlu1 %v6567_v52, %s6298_s16 }
 0xdab   :  { %1907 = vrot.lane.b32.xlu1 %v6565_v51, %s6298_s16 }
 0xe1f   :  { %v1791_v31 = vpop.xlane.xlu1 %1790 }
 0xe20   :  { %v1793_v32 = vsub.f32 %v1783_v22, %v1791_v31  ;;  %v1788_v10 = vpop.xlane.xlu0 %1787 }
 0xe21   :  { %v1792_v33 = vsub.f32 %v1778_v7, %v1788_v10 }
 0xe22   :  { %v1796_v34 = vmul.f32 1.442695, %v1793_v32 }
 0xe23   :  { %v1794_v35 = vmul.f32 1.442695, %v1792_v33  ;;  %v6010_v36 = vpop.permute.xlu1 %6009 }
 0xe24   :  { %6160 = vpow2.f32 %v1796_v34  ;;  %v6012_v37 = vunpack.i.h.bf16 %v6010_v36  ;;  %v6011_v40 = vunpack.i.l.bf16 %v6010_v36 }
 0xe25   :  { %6162 = vpow2.f32 %v1794_v35 }
 0xe26   :  { %v5732_v2 = vpack.c.bf16 %v6012_v37, %v6011_v40 }
 0xe27   :  { %v1906_v56 = vpop.permute.xlu1 %1905 }
 0xe28   :  { %5733 = vmatprep.subr.bf16.mxu1 %v5732_v2 }
 0xe29   :  { %5735 = vmatpush3.bf16.msra.mxu1 %v5732_v2 }
 0xe2e   :  { %v6161_v4 = vpop.eup %6160 }
 0xe2f   :  { %v1801_v52 = vsel %vm238_vm3, %v6161_v4, 0.0  ;;  %v6163_v0 = vpop.eup %6162 }
 0xe30   :  { %1802 = vadd.xlane.f32.xlu0 %v1801_v52  ;;  %v1798_v51 = vsel %vm238_vm3, %v6163_v0, 0.0 }
 0xe34   :  { %1799 = vadd.xlane.f32.xlu0 %v1798_v51 }
 0xe4a   :  { %6014 = vrot.lane.b32.xlu0 %v6571_v54, %s6297_s15  ;;  %v1908_v54 = vpop.permute.xlu1 %1907 }
 0xebd   :  { %v1803_v1 = vpop.xlane.xlu0 %1802 }
 0xebe   :  { %6164 = vrcp.f32 %v1803_v1 }
 0xec1   :  { %v1800_v41 = vpop.xlane.xlu0 %1799 }
 0xec2   :  { %6166 = vrcp.f32 %v1800_v41 }
 0xec5   :  { %v6015_v42 = vpop.permute.xlu0 %6014 }
 0xec6   :  { %v6017_v43 = vunpack.i.h.bf16 %v6015_v42  ;;  %v6016_v44 = vunpack.i.l.bf16 %v6015_v42 }
 0xec8   :  { %v5736_v45 = vpack.c.bf16 %v6017_v43, %v6016_v44  ;;  %v6165_v46 = vpop.eup %6164 }
 0xec9   :  { %v1807_v55 = vmul.f32 %v6165_v46, %v6161_v4 }
 0xeca   :  { %5738 = vmatprep.subr.msk.bf16.mxu1 %vm6427_vm2, %v5736_v45 }
 0xecc   :  { %v6167_v49 = vpop.eup %6166 }
 0xecd   :  { %v1806_v53 = vmul.f32 %v6167_v49, %v6163_v0 }
 0xecf   :  { %5379 = vmatprep.mubr.msk.f32.mxu1 %vm238_vm3, %v1806_v53 }
 0xed0   :  { %5380 = vmatmul.mubr.msk.f32.vlgmr.msra.gmra.mrb[16].mxu1 %vm238_vm3, %v1807_v55 }
 0xed1   :  { %5741 = vmatpush3.bf16.xpose.msk.msra.mxu1 %vm6427_vm2, %v5736_v45  ;;  %5386 = vmatprep.mubr.msk.f32.mxu1 %vm154_vm1, %v1906_v56 }
 0xed8   :  { %5387 = vmatmul.mubr.msk.f32.vlgmr.msra.gmra.mrb[18].mxu1 %vm154_vm1, %v1908_v54  ;;  %v54_v54 = vld [vmem:[%s7276_s6 + $0x8] sm:$0xff] }
 0xfa3   :  { %v5381_v57 = vpop.f32.mrb[16].mxu1 }
 0xfa4   :  { %v1886_v58 = vpop.f32.mrb[17].mxu1 }
 0xfab   :  { %v5388_v61 = vpop.f32.mrb[18].mxu1 }
 0xfac   :  { %v1993_v9 = vadd.f32 %v5388_v61, %v6631_v38  ;;  %v1987_v62 = vpop.f32.mrb[19].mxu1  ;;  %v56_v61 = vld [vmem:[%s7276_s6 + $0x18] sm:$0xff] }
 0xfad   :  { %v1988_v8 = vadd.f32 %v1987_v62, %v6636_v39  ;;  %v57_v62 = vld [vmem:[%s7277_s7] sm:$0xff] }
 0xfae   :  { %v1999_v63 = vsel %vm238_vm3, %v1993_v9, -inf }
 0xfaf   :  { %2000 = vmax.xlane.f32.xlu1 %v1999_v63  ;;  %v1996_v11 = vsel %vm238_vm3, %v1988_v8, -inf  ;;  %v59_v63 = vld [vmem:[%s7277_s7 + $0x10] sm:$0xff] }
 0xfb0   :  { %1997 = vmax.xlane.f32.xlu0 %v1996_v11 }
 0xfc0   :  { %6019 = vrot.lane.b32.xlu1 %v6667_v48, %s6298_s16 }
 0xfc4   :  { %1689 = vrot.lane.b32.xlu1 %v6688_v6, %s7285_s18 }
 0xfc8   :  { %1897 = vrot.lane.b32.xlu1 %v1886_v58, %s7283_s20  ;;  %v55_v58 = vld [vmem:[%s7276_s6 + $0x10] sm:$0xff] }
0x103c   :  { %v2001_v12 = vpop.xlane.xlu1 %2000 }
0x103d   :  { %v2003_v13 = vsub.f32 %v1993_v9, %v2001_v12  ;;  %v1998_v38 = vpop.xlane.xlu0 %1997  ;;  %v5758_v9 = vpack.c.bf16 %v56_v61, %v55_v58  ;;  %v60_v12 = vld [vmem:[%s7277_s7 + $0x18] sm:$0xff] }
0x103e   :  { %v2002_v21 = vsub.f32 %v1988_v8, %v1998_v38  ;;  %v58_v8 = vld [vmem:[%s7277_s7 + $0x8] sm:$0xff]  ;;  %v61_v38 = vld [vmem:[%s7277_s7 + $0x20] sm:$0xff] }
0x103f   :  { %v2006_v24 = vmul.f32 1.442695, %v2003_v13  ;;  %v5762_v11 = vpack.c.bf16 %v58_v8, %v57_v62  ;;  %v5766_v13 = vpack.c.bf16 %v60_v12, %v59_v63  ;;  %v6819_v62 = vld [vmem:[%s7274_s4 + $0x28] sm:$0xff]  ;;  %v6829_v63 = vld [vmem:[%s7274_s4 + $0x30] sm:$0xff] }
0x1040   :  { %v2004_v39 = vmul.f32 1.442695, %v2002_v21  ;;  %v6020_v3 = vpop.permute.xlu1 %6019  ;;  %v62_v21 = vld [vmem:[%s7277_s7 + $0x28] sm:$0xff] }
0x1041   :  { %v6022_v25 = vunpack.i.h.bf16 %v6020_v3  ;;  %v6021_v26 = vunpack.i.l.bf16 %v6020_v3 }
0x1042   :  { %6168 = vpow2.f32 %v2004_v39 }
0x1043   :  { %v5742_v27 = vpack.c.bf16 %v6022_v25, %v6021_v26  ;;  %6170 = vpow2.f32 %v2006_v24  ;;  %v5770_v24 = vpack.c.bf16 %v62_v21, %v61_v38 }
0x1044   :  { %v1690_v29 = vpop.permute.xlu1 %1689 }
0x1045   :  { %1694 = vst.msk [vmem:[#allocation2 + $0x8] sm:$0xff] %vm558_vm4, %v1690_v29  ;;  %5743 = vmatprep.subr.bf16.mxu0 %v5742_v27 }
0x1046   :  { %5745 = vmatpush3.bf16.msra.mxu0 %v5742_v27 }
0x1047   :  { %5747 = vmatprep.subr.bf16.mxu0 %v6551_v47 }
0x1048   :  { %v1898_v31 = vpop.permute.xlu1 %1897 }
0x104c   :  { %v6169_v48 = vpop.eup %6168 }
0x104d   :  { %v2008_v6 = vsel %vm238_vm3, %v6169_v48, 0.0  ;;  %v6171_v22 = vpop.eup %6170 }
0x104e   :  { %2009 = vadd.xlane.f32.xlu0 %v2008_v6  ;;  %v2011_v23 = vsel %vm238_vm3, %v6171_v22, 0.0  ;;  %v2234_v6 = vsub.s32 4, %v6595_v15 }
0x1052   :  { %2012 = vadd.xlane.f32.xlu0 %v2011_v23 }
0x1068   :  { %1687 = vrot.lane.b32.xlu0 %v6690_v28, %s7285_s18 }
0x106c   :  { %1899 = vrot.lane.b32.xlu0 %v5381_v57, %s7283_s20 }
0x10db   :  { %v2010_v7 = vpop.xlane.xlu0 %2009 }
0x10dc   :  { %6172 = vrcp.f32 %v2010_v7 }
0x10df   :  { %v2013_v30 = vpop.xlane.xlu0 %2012 }
0x10e0   :  { %6174 = vrcp.f32 %v2013_v30 }
0x10e3   :  { %v1688_v5 = vpop.permute.xlu0 %1687 }
0x10e4   :  { %1693 = vst.msk [vmem:[#allocation2] sm:$0xff] %vm558_vm4, %v1688_v5 }
0x10e5   :  { %1903 = vst.msk [vmem:[#allocation2] sm:$0xff] %vm769_vm5, %v1898_v31  ;;  %v2235_v31 = vrot.slane %v6601_v17, %v2234_v6 }
0x10e6   :  { %v6173_v32 = vpop.eup %6172 }
0x10e7   :  { %v1900_v10 = vpop.permute.xlu0 %1899  ;;  %v2016_v33 = vmul.f32 %v6173_v32, %v6169_v48  ;;  %v2228_v48 = vsub.s32 3, %v6595_v15 }
0x10e8   :  { %1904 = vst.msk [vmem:[#allocation2 + $0x8] sm:$0xff] %vm769_vm5, %v1900_v10 }
0x10e9   :  { %5393 = vmatprep.mubr.msk.f32.mxu0 %vm238_vm3, %v2016_v33 }
0x10ea   :  { %v6175_v28 = vpop.eup %6174 }
0x10eb   :  { %v2017_v34 = vmul.f32 %v6175_v28, %v6171_v22  ;;  %v2229_v22 = vrot.slane %v6601_v17, %v2228_v48 }
0x10ed   :  { %5394 = vmatmul.mubr.msk.f32.vlgmr.msra.gmra.mrb[18].mxu0 %vm238_vm3, %v2017_v34  ;;  %v63_v34 = vld [vmem:[%s7277_s7 + $0x30] sm:$0xff] }
0x10ee   :  { %5749 = vmatpush3.bf16.msra.mxu0 %v6551_v47 }
0x10ef   :  { %5751 = vmatprep.subr.bf16.mxu0 %v6559_v50 }
0x10f2   :  { %5753 = vmatpush3.bf16.msra.mxu0 %v6559_v50 }
0x10f3   :  { %5763 = vmatprep.subr.bf16.mxu0 %v5762_v11 }
0x11c0   :  { %v5395_v35 = vpop.f32.mrb[18].mxu0 }
0x11c1   :  { %2109 = vrot.lane.b32.xlu0 %v5395_v35, %s7281_s27  ;;  %v2096_v36 = vpop.f32.mrb[19].mxu0  ;;  %v64_v35 = vld [vmem:[%s7277_s7 + $0x38] sm:$0xff] }
0x11c2   :  { %2107 = vrot.lane.b32.xlu1 %v2096_v36, %s7281_s27  ;;  %v5774_v36 = vpack.c.bf16 %v64_v35, %v63_v34 }
0x1233   :  { %v2110_v37 = vpop.permute.xlu0 %2109 }
0x1234   :  { %2114 = vst.msk [vmem:[#allocation2 + $0x8] sm:$0xff] %vm980_vm6, %v2110_v37  ;;  %v2108_v40 = vpop.permute.xlu1 %2107  ;;  %v4930_v37 = vld [vmem:[%s7279_s9] ss:$0 sm:$0xff] }
0x1235   :  { %2113 = vst.msk [vmem:[#allocation2] sm:$0xff] %vm980_vm6, %v2108_v40 }
0x123b   :  { %v2116_v47 = vld [vmem:[#allocation2 + $0x8] sm:$0xff] }
0x123c   :  { %v2115_v2 = vld [vmem:[#allocation2] sm:$0xff] }
0x123d   :  { %5404 = vmatprep.mubr.msk.f32.mxu0 %vm66_vm0, %v2115_v2 }
0x123e   :  { %5405 = vmatmul.mubr.msk.f32.vlgmr.msra.gmra.mrb[20].mxu0 %vm66_vm0, %v2116_v47 }
0x123f   :  { %5765 = vmatpush3.bf16.msra.mxu0 %v5762_v11  ;;  %v6834_v11 = vld [vmem:[%s7274_s4 + $0x38] sm:$0xff] }
0x1240   :  { %5767 = vmatprep.subr.bf16.mxu0 %v5766_v13  ;;  %v6839_v12 = vpack.c.bf16 %v6834_v11, %v6829_v63 }
0x1243   :  { %5769 = vmatpush3.bf16.msra.mxu0 %v5766_v13 }
0x1244   :  { %5771 = vmatprep.subr.bf16.mxu0 %v5770_v24 }
0x1247   :  { %5773 = vmatpush3.bf16.msra.mxu0 %v5770_v24 }
0x1248   :  { %5775 = vmatprep.subr.bf16.mxu0 %v5774_v36 }
0x124b   :  { %5777 = vmatpush3.bf16.msra.mxu0 %v5774_v36 }
0x1311   :  { %v5406_v4 = vpop.f32.mrb[20].mxu0 }
0x1312   :  { %v2195_v50 = vadd.f32 %v5406_v4, %v6606_v18  ;;  %v2189_v52 = vpop.f32.mrb[21].mxu0 }
0x1313   :  { %v2190_v0 = vadd.f32 %v2189_v52, %v6606_v18 }
0x1314   :  { %v2199_v51 = vadd.f32 %v2195_v50, %v6652_v20 }
0x1315   :  { %v2198_v1 = vadd.f32 %v2190_v0, %v6650_v19  ;;  %v53_v19 = vld [vmem:[%s7276_s6] sm:$0xff]  ;;  %v2329_v0 = vsub.s32 7, %v6595_v15 }
0x1316   :  { %v2203_v41 = vsel %vm66_vm0, %v2199_v51, 0.0  ;;  %v5754_v57 = vpack.c.bf16 %v54_v54, %v53_v19 }
0x1317   :  { %2204 = vadd.xlane.f32.xlu0 %v2203_v41  ;;  %v2200_v42 = vsel %vm66_vm0, %v2198_v1, 0.0 }
0x1318   :  { %2201 = vadd.xlane.f32.xlu1 %v2200_v42  ;;  %5755 = vmatprep.subr.bf16.mxu1 %v5754_v57 }
0x1319   :  { %5757 = vmatpush3.bf16.msra.mxu1 %v5754_v57 }
0x131a   :  { %5759 = vmatprep.subr.bf16.mxu1 %v5758_v9 }
0x131d   :  { %5761 = vmatpush3.bf16.msra.mxu1 %v5758_v9  ;;  %v6814_v9 = vld [vmem:[%s7274_s4 + $0x20] sm:$0xff] }
0x131e   :  { %v6823_v8 = vpack.c.bf16 %v6819_v62, %v6814_v9 }
0x1320   :  { %5779 = vmatprep.subr.bf16.mxu1 %v6823_v8 }
0x13a4   :  { %v2205_v43 = vpop.xlane.xlu0 %2204 }
0x13a5   :  { %v2207_v44 = vmul.f32 0.03125, %v2205_v43  ;;  %v2202_v45 = vpop.xlane.xlu1 %2201 }
0x13a6   :  { %v2206_v46 = vmul.f32 0.03125, %v2202_v45 }
0x13a7   :  { %v2209_v49 = vsub.f32 %v2199_v51, %v2207_v44  ;;  %v2330_v51 = vrot.slane %v6601_v17, %v2329_v0 }
0x13a8   :  { %v2208_v53 = vsub.f32 %v2198_v1, %v2206_v46 }
0x13a9   :  { %v2211_v55 = vmul.f32 %v2209_v49, %v2209_v49 }
0x13aa   :  { %v2210_v56 = vmul.f32 %v2208_v53, %v2208_v53 }
0x13ab   :  { %v2215_v18 = vsel %vm66_vm0, %v2211_v55, 0.0 }
0x13ac   :  { %2216 = vadd.xlane.f32.xlu1 %v2215_v18  ;;  %v2212_v20 = vsel %vm66_vm0, %v2210_v56, 0.0 }
0x13ad   :  { %2213 = vadd.xlane.f32.xlu0 %v2212_v20 }
0x1439   :  { %v2217_v39 = vpop.xlane.xlu1 %2216 }
0x143a   :  { %v2219_v3 = vmul.f32 0.03125, %v2217_v39  ;;  %v2214_v25 = vpop.xlane.xlu0 %2213 }
0x143b   :  { %v2218_v26 = vmul.f32 0.03125, %v2214_v25  ;;  %v2443_v25 = vsub.s32 5, %v6595_v15 }
0x143c   :  { %v2221_v27 = vadd.f32 1e-05, %v2219_v3 }
0x143d   :  { %v2220_v29 = vadd.f32 1e-05, %v2218_v26  ;;  %v2449_v26 = vsub.s32 6, %v6595_v15 }
0x143e   :  { %6176 = vrsqrt.f32 %v2221_v27  ;;  %v2444_v27 = vrot.slane %v6601_v17, %v2443_v25 }
0x143f   :  { %6178 = vrsqrt.f32 %v2220_v29 }
0x1448   :  { %v6177_v23 = vpop.eup %6176 }
0x1449   :  { %v6179_v7 = vpop.eup %6178  ;;  %v2225_v30 = vmul.f32 %v6177_v23, %v2209_v49 }
0x144a   :  { %v2224_v5 = vmul.f32 %v6179_v7, %v2208_v53 }
0x144b   :  { %v2231_v32 = vmul.f32 %v2229_v22, %v2225_v30  ;;  %v2450_v30 = vrot.slane %v6601_v17, %v2449_v26 }
0x144c   :  { %v2230_v10 = vmul.f32 %v2229_v22, %v2224_v5 }
0x144d   :  { %v2237_v28 = vadd.f32 %v2235_v31, %v2231_v32 }
0x144e   :  { %v2236_v33 = vadd.f32 %v2235_v31, %v2230_v10 }
0x1450   :  { %5415 = vmatprep.mubr.msk.f32.mxu1 %vm66_vm0, %v2236_v33 }
0x1451   :  { %5416 = vmatmul.mubr.msk.f32.vlgmr.msra.gmra.mrb[20].mxu1 %vm66_vm0, %v2237_v28 }
0x1452   :  { %5781 = vmatpush3.bf16.msra.mxu1 %v6823_v8 }
0x1453   :  { %5783 = vmatprep.subr.bf16.mxu1 %v6839_v12 }
0x1456   :  { %5785 = vmatpush3.bf16.msra.mxu1 %v6839_v12 }
0x1524   :  { %v5417_v40 = vpop.f32.mrb[20].mxu1 }
0x1525   :  { %v2322_v2 = vadd.f32 %v5417_v40, %v4930_v37  ;;  %v2316_v47 = vpop.f32.mrb[21].mxu1 }
0x1526   :  { %v2317_v4 = vadd.f32 %v4930_v37, %v2316_v47 }
0x1527   :  { %v2326_v52 = vmax.f32 %v2322_v2, 0.0 }
0x1528   :  { %v2325_v50 = vmax.f32 %v2317_v4, 0.0 }
0x152a   :  { %5434 = vmatprep.mubr.msk.f32.mxu0 %vm2331_vm7, %v2325_v50 }
0x152b   :  { %5435 = vmatmul.mubr.msk.f32.vlgmr.msra.gmra.mrb[22].mxu0 %vm2331_vm7, %v2326_v52 }
0x15fe   :  { %v5436_v1 = vpop.f32.mrb[22].mxu0 }
0x15ff   :  { %v2410_v41 = vadd.f32 %v5436_v1, %v2330_v51  ;;  %v2404_v42 = vpop.f32.mrb[23].mxu0  ;;  %v6892_v1 = vld [vmem:[%s7272_s2 + $0x8] sm:$0xff] }
0x1600   :  { %v2405_v43 = vadd.f32 %v2404_v42, %v2330_v51 }
0x1601   :  { %v2414_v44 = vadd.f32 %v2410_v41, %v2237_v28 }
0x1602   :  { %v2413_v45 = vadd.f32 %v2405_v43, %v2236_v33  ;;  %v6898_v43 = vld [vmem:[%s7272_s2] sm:$0xff] }
0x1603   :  { %v2418_v46 = vsel %vm66_vm0, %v2414_v44, 0.0 }
0x1604   :  { %2419 = vadd.xlane.f32.xlu1 %v2418_v46  ;;  %v2415_v49 = vsel %vm66_vm0, %v2413_v45, 0.0 }
0x1605   :  { %2416 = vadd.xlane.f32.xlu0 %v2415_v49 }
0x1691   :  { %v2420_v53 = vpop.xlane.xlu1 %2419 }
0x1692   :  { %v2422_v55 = vmul.f32 0.03125, %v2420_v53  ;;  %v2417_v56 = vpop.xlane.xlu0 %2416 }
0x1693   :  { %v2421_v18 = vmul.f32 0.03125, %v2417_v56 }
0x1694   :  { %v2424_v20 = vsub.f32 %v2414_v44, %v2422_v55 }
0x1695   :  { %v2423_v19 = vsub.f32 %v2413_v45, %v2421_v18 }
0x1696   :  { %v2426_v54 = vmul.f32 %v2424_v20, %v2424_v20 }
0x1697   :  { %v2425_v57 = vmul.f32 %v2423_v19, %v2423_v19 }
0x1698   :  { %v2430_v58 = vsel %vm66_vm0, %v2426_v54, 0.0 }
0x1699   :  { %2431 = vadd.xlane.f32.xlu1 %v2430_v58  ;;  %v2427_v61 = vsel %vm66_vm0, %v2425_v57, 0.0 }
0x169a   :  { %2428 = vadd.xlane.f32.xlu0 %v2427_v61 }
0x1726   :  { %v2432_v13 = vpop.xlane.xlu1 %2431 }
0x1727   :  { %v2434_v38 = vmul.f32 0.03125, %v2432_v13  ;;  %v2429_v21 = vpop.xlane.xlu0 %2428 }
0x1728   :  { %v2433_v24 = vmul.f32 0.03125, %v2429_v21 }
0x1729   :  { %v2436_v39 = vadd.f32 1e-05, %v2434_v38 }
0x172a   :  { %v2435_v3 = vadd.f32 1e-05, %v2433_v24 }
0x172b   :  { %6180 = vrsqrt.f32 %v2436_v39 }
0x172c   :  { %6182 = vrsqrt.f32 %v2435_v3 }
0x1735   :  { %v6181_v29 = vpop.eup %6180 }
0x1736   :  { %v6183_v22 = vpop.eup %6182  ;;  %v2440_v23 = vmul.f32 %v6181_v29, %v2424_v20 }
0x1737   :  { %v2439_v7 = vmul.f32 %v6183_v22, %v2423_v19 }
0x1738   :  { %v2446_v5 = vmul.f32 %v2444_v27, %v2440_v23 }
0x1739   :  { %v2445_v31 = vmul.f32 %v2444_v27, %v2439_v7 }
0x173a   :  { %v6853_v10 = vadd.f32 %v2450_v30, %v2446_v5 }
0x173b   :  { %v6851_v32 = vadd.f32 %v2450_v30, %v2445_v31 }
0x173d   :  { %5445 = vmatprep.mubr.msk.f32.mxu1 %vm66_vm0, %v6851_v32 }
0x173e   :  { %5446 = vmatmul.mubr.msk.f32.vlgmr.msra.gmra.mrb[22].mxu1 %vm66_vm0, %v6853_v10 }
0x1811   :  { %v6859_v33 = vpop.f32.mrb[22].mxu1 }
0x1812   :  { %v6861_v28 = vpop.f32.mrb[23].mxu1 }
0x1813   :  { %5452 = vmatprep.mubr.msk.f32.mxu1 %vm154_vm1, %v6861_v28  ;;  %v6867_v17 = vpack.i.bf16 %v6859_v33, %v6861_v28 }
0x1815   :  { %6029 = vrot.lane.b32.xlu1 %v6867_v17, %s6292_s26  ;;  %6024 = vrot.lane.b32.xlu0 %v6867_v17, %s6291_s0 }
0x1819   :  { %2762 = vrot.lane.b32.xlu1 %v6861_v28, %s6290_s25  ;;  %2764 = vrot.lane.b32.xlu0 %v6859_v33, %s6290_s25 }
0x1887   :  { %v6030_v34 = vpop.permute.xlu1 %6029  ;;  %v6025_v35 = vpop.permute.xlu0 %6024 }
0x1888   :  { %v6032_v36 = vunpack.i.h.bf16 %v6030_v34  ;;  %v6031_v37 = vunpack.i.l.bf16 %v6030_v34  ;;  %v6027_v40 = vunpack.i.h.bf16 %v6025_v35  ;;  %v6026_v2 = vunpack.i.l.bf16 %v6025_v35 }
0x188a   :  { %v5786_v47 = vpack.c.bf16 %v6027_v40, %v6026_v2  ;;  %v5796_v4 = vpack.c.bf16 %v6032_v36, %v6031_v37 }
0x188b   :  { %v2763_v50 = vpop.permute.xlu1 %2762  ;;  %v2765_v52 = vpop.permute.xlu0 %2764 }
0x188c   :  { %5788 = vmatprep.subr.msk.bf16.mxu1 %vm6427_vm2, %v5786_v47 }
0x188d   :  { %5791 = vmatpush3.bf16.xpose.msk.msra.mxu1 %vm6427_vm2, %v5786_v47 }
0x188e   :  { %5798 = vmatprep.subr.msk.bf16.mxu1 %vm6427_vm2, %v5796_v4 }
0x1894   :  { %5453 = vmatmul.mubr.msk.f32.vlgmr.msra.gmra.mrb[24].mxu1 %vm154_vm1, %v6859_v33 }
0x1895   :  { %5801 = vmatpush3.bf16.xpose.msk.msra.mxu1 %vm6427_vm2, %v5796_v4  ;;  %5466 = vmatprep.mubr.msk.f32.mxu1 %vm154_vm1, %v2763_v50 }
0x189c   :  { %5467 = vmatmul.mubr.msk.f32.vlgmr.msra.gmra.mrb[26].mxu1 %vm154_vm1, %v2765_v52 }
0x1967   :  { %v5454_v51 = vpop.f32.mrb[24].mxu1 }
0x1968   :  { %v2648_v41 = vadd.f32 %v6892_v1, %v5454_v51  ;;  %v2642_v42 = vpop.f32.mrb[25].mxu1 }
0x1969   :  { %v2643_v44 = vadd.f32 %v6898_v43, %v2642_v42 }
0x196a   :  { %v2654_v45 = vsel %vm238_vm3, %v2648_v41, -inf }
0x196b   :  { %2655 = vmax.xlane.f32.xlu0 %v2654_v45  ;;  %v2651_v46 = vsel %vm238_vm3, %v2643_v44, -inf }
0x196c   :  { %2652 = vmax.xlane.f32.xlu1 %v2651_v46 }
0x196f   :  { %v5468_v49 = vpop.f32.mrb[26].mxu1 }
0x1970   :  { %v2850_v53 = vadd.f32 %v6892_v1, %v5468_v49  ;;  %v2844_v55 = vpop.f32.mrb[27].mxu1 }
0x1971   :  { %v2845_v56 = vadd.f32 %v6898_v43, %v2844_v55 }
0x1972   :  { %v2856_v18 = vsel %vm238_vm3, %v2850_v53, -inf }
0x1973   :  { %2857 = vmax.xlane.f32.xlu1 %v2856_v18  ;;  %v2853_v20 = vsel %vm238_vm3, %v2845_v56, -inf }
0x1974   :  { %2854 = vmax.xlane.f32.xlu0 %v2853_v20 }
0x19f8   :  { %v2656_v19 = vpop.xlane.xlu0 %2655 }
0x19f9   :  { %v2658_v54 = vsub.f32 %v2648_v41, %v2656_v19  ;;  %v2653_v57 = vpop.xlane.xlu1 %2652 }
0x19fa   :  { %v2657_v58 = vsub.f32 %v2643_v44, %v2653_v57 }
0x19fb   :  { %v2661_v61 = vmul.f32 1.442695, %v2658_v54 }
0x19fc   :  { %v2659_v13 = vmul.f32 1.442695, %v2657_v58 }
0x19fd   :  { %6184 = vpow2.f32 %v2661_v61 }
0x19fe   :  { %6186 = vpow2.f32 %v2659_v13 }
0x1a00   :  { %v2858_v38 = vpop.xlane.xlu1 %2857 }
0x1a01   :  { %v2860_v21 = vsub.f32 %v2850_v53, %v2858_v38  ;;  %v2855_v24 = vpop.xlane.xlu0 %2854 }
0x1a02   :  { %v2859_v39 = vsub.f32 %v2845_v56, %v2855_v24 }
0x1a03   :  { %v2863_v3 = vmul.f32 1.442695, %v2860_v21 }
0x1a04   :  { %v2861_v27 = vmul.f32 1.442695, %v2859_v39 }
0x1a05   :  { %6188 = vpow2.f32 %v2863_v3 }
0x1a06   :  { %6190 = vpow2.f32 %v2861_v27 }
0x1a07   :  { %v6185_v29 = vpop.eup %6184 }
0x1a08   :  { %v6187_v22 = vpop.eup %6186  ;;  %v2666_v23 = vsel %vm238_vm3, %v6185_v29, 0.0 }
0x1a09   :  { %2667 = vadd.xlane.f32.xlu1 %v2666_v23  ;;  %v2663_v7 = vsel %vm238_vm3, %v6187_v22, 0.0 }
0x1a0a   :  { %2664 = vadd.xlane.f32.xlu0 %v2663_v7 }
0x1a0f   :  { %v6189_v30 = vpop.eup %6188 }
0x1a10   :  { %v6191_v5 = vpop.eup %6190  ;;  %v2868_v31 = vsel %vm238_vm3, %v6189_v30, 0.0 }
0x1a11   :  { %2869 = vadd.xlane.f32.xlu1 %v2868_v31  ;;  %v2865_v34 = vsel %vm238_vm3, %v6191_v5, 0.0 }
0x1a12   :  { %2866 = vadd.xlane.f32.xlu0 %v2865_v34 }
0x1a22   :  { %6039 = vrot.lane.b32.xlu1 %v6867_v17, %s6295_s13 }
0x1a26   :  { %6044 = vrot.lane.b32.xlu1 %v6867_v17, %s6294_s12 }
0x1a28   :  { %6034 = vrot.lane.b32.xlu0 %v6867_v17, %s6293_s11 }
0x1a2a   :  { %2974 = vrot.lane.b32.xlu1 %v6859_v33, %s6296_s14 }
0x1a2c   :  { %2972 = vrot.lane.b32.xlu0 %v6861_v28, %s6296_s14 }
0x1a96   :  { %v2668_v36 = vpop.xlane.xlu1 %2667 }
0x1a97   :  { %v2665_v35 = vpop.xlane.xlu0 %2664 }
0x1a98   :  { %6192 = vrcp.f32 %v2665_v35 }
0x1a99   :  { %6194 = vrcp.f32 %v2668_v36 }
0x1a9e   :  { %v2870_v37 = vpop.xlane.xlu1 %2869 }
0x1a9f   :  { %v2867_v40 = vpop.xlane.xlu0 %2866 }
0x1aa0   :  { %6196 = vrcp.f32 %v2867_v40 }
0x1aa1   :  { %6198 = vrcp.f32 %v2870_v37 }
0x1aa2   :  { %v6193_v2 = vpop.eup %6192  ;;  %v6040_v47 = vpop.permute.xlu1 %6039 }
0x1aa3   :  { %v6035_v4 = vpop.permute.xlu0 %6034  ;;  %v2671_v50 = vmul.f32 %v6193_v2, %v6187_v22  ;;  %v6042_v52 = vunpack.i.h.bf16 %v6040_v47  ;;  %v6041_v51 = vunpack.i.l.bf16 %v6040_v47  ;;  %v6195_v46 = vpop.eup %6194 }
0x1aa4   :  { %v6037_v41 = vunpack.i.h.bf16 %v6035_v4  ;;  %v6036_v42 = vunpack.i.l.bf16 %v6035_v4  ;;  %v2672_v18 = vmul.f32 %v6195_v46, %v6185_v29 }
0x1aa5   :  { %5459 = vmatprep.mubr.msk.f32.mxu0 %vm238_vm3, %v2671_v50  ;;  %v5802_v49 = vpack.c.bf16 %v6042_v52, %v6041_v51 }
0x1aa6   :  { %v5792_v44 = vpack.c.bf16 %v6037_v41, %v6036_v42  ;;  %v6045_v45 = vpop.permute.xlu1 %6044 }
0x1aa7   :  { %v6047_v53 = vunpack.i.h.bf16 %v6045_v45  ;;  %v6046_v55 = vunpack.i.l.bf16 %v6045_v45  ;;  %v2973_v58 = vpop.permute.xlu0 %2972 }
0x1aa8   :  { %5793 = vmatprep.subr.bf16.mxu0 %v5792_v44 }
0x1aa9   :  { %5795 = vmatpush3.bf16.msra.mxu0 %v5792_v44  ;;  %v5806_v54 = vpack.c.bf16 %v6047_v53, %v6046_v55 }
0x1aaa   :  { %v6197_v56 = vpop.eup %6196  ;;  %5803 = vmatprep.subr.bf16.mxu0 %v5802_v49  ;;  %v2975_v61 = vpop.permute.xlu1 %2974 }
0x1aab   :  { %v6199_v20 = vpop.eup %6198  ;;  %v2873_v19 = vmul.f32 %v6197_v56, %v6191_v5 }
0x1aac   :  { %5460 = vmatmul.mubr.msk.f32.vlgmr.msra.gmra.mrb[24].mxu0 %vm238_vm3, %v2672_v18  ;;  %v2874_v57 = vmul.f32 %v6199_v20, %v6189_v30  ;;  %v6262_v18 = vld [vmem:[%s7271_s1] sm:$0xff]  ;;  %v6263_v20 = vld [vmem:[%s7271_s1 + $0x8] sm:$0xff]  ;;  %s7289_s1 = smov 8  }
0x1aad   :  { %5805 = vmatpush3.bf16.msra.mxu0 %v5802_v49  ;;  %5473 = vmatprep.mubr.msk.f32.mxu0 %vm238_vm3, %v2873_v19 }
0x1aae   :  { %5808 = vmatprep.subr.msk.bf16.mxu0 %vm6427_vm2, %v5806_v54 }
0x1ab0   :  { %5474 = vmatmul.mubr.msk.f32.vlgmr.msra.gmra.mrb[26].mxu0 %vm238_vm3, %v2874_v57 }
0x1ab1   :  { %5480 = vmatprep.mubr.msk.f32.mxu0 %vm154_vm1, %v2973_v58 }
0x1ab6   :  { %5811 = vmatpush3.bf16.xpose.msk.msra.mxu0 %vm6427_vm2, %v5806_v54 }
0x1abd   :  { %5481 = vmatmul.mubr.msk.f32.vlgmr.msra.gmra.mrb[28].mxu0 %vm154_vm1, %v2975_v61 }
0x1b7f   :  { %v5461_v13 = vpop.f32.mrb[24].mxu0 }
0x1b80   :  { %2761 = vst.msk [vmem:[#allocation2 + $0x8] sm:$0xff] %vm154_vm1, %v5461_v13  ;;  %v2751_v38 = vpop.f32.mrb[25].mxu0 }
0x1b81   :  { %2760 = vst.msk [vmem:[#allocation2] sm:$0xff] %vm154_vm1, %v2751_v38 }
0x1b83   :  { %v6933_v21 = vpop.f32.mrb[26].mxu0 }
0x1b84   :  { %v6935_v24 = vpop.f32.mrb[27].mxu0 }
0x1b90   :  { %v5482_v39 = vpop.f32.mrb[28].mxu0 }
0x1b91   :  { %v3060_v3 = vadd.f32 %v6892_v1, %v5482_v39  ;;  %v3054_v27 = vpop.f32.mrb[29].mxu0 }
0x1b92   :  { %v3055_v29 = vadd.f32 %v6898_v43, %v3054_v27 }
0x1b93   :  { %v3066_v22 = vsel %vm238_vm3, %v3060_v3, -inf }
0x1b94   :  { %3067 = vmax.xlane.f32.xlu1 %v3066_v22  ;;  %v3063_v23 = vsel %vm238_vm3, %v3055_v29, -inf }
0x1b95   :  { %3064 = vmax.xlane.f32.xlu0 %v3063_v23 }
0x1ba5   :  { %6049 = vrot.lane.b32.xlu1 %v6867_v17, %s6299_s17 }
0x1ba9   :  { %3182 = vrot.lane.b32.xlu1 %v6861_v28, %s6298_s16 }
0x1bad   :  { %3184 = vrot.lane.b32.xlu1 %v6859_v33, %s6298_s16 }
0x1c21   :  { %v3068_v7 = vpop.xlane.xlu1 %3067 }
0x1c22   :  { %v3070_v30 = vsub.f32 %v3060_v3, %v3068_v7  ;;  %v3065_v5 = vpop.xlane.xlu0 %3064 }
0x1c23   :  { %v3069_v31 = vsub.f32 %v3055_v29, %v3065_v5 }
0x1c24   :  { %v3073_v34 = vmul.f32 1.442695, %v3070_v30 }
0x1c25   :  { %v3071_v35 = vmul.f32 1.442695, %v3069_v31  ;;  %v6050_v36 = vpop.permute.xlu1 %6049 }
0x1c26   :  { %6200 = vpow2.f32 %v3073_v34  ;;  %v6052_v37 = vunpack.i.h.bf16 %v6050_v36  ;;  %v6051_v40 = vunpack.i.l.bf16 %v6050_v36 }
0x1c27   :  { %6202 = vpow2.f32 %v3071_v35 }
0x1c28   :  { %v5812_v2 = vpack.c.bf16 %v6052_v37, %v6051_v40 }
0x1c29   :  { %v3183_v55 = vpop.permute.xlu1 %3182 }
0x1c2a   :  { %5813 = vmatprep.subr.bf16.mxu1 %v5812_v2 }
0x1c2b   :  { %5815 = vmatpush3.bf16.msra.mxu1 %v5812_v2 }
0x1c2d   :  { %v3185_v56 = vpop.permute.xlu1 %3184 }
0x1c30   :  { %v6201_v47 = vpop.eup %6200 }
0x1c31   :  { %v3078_v28 = vsel %vm238_vm3, %v6201_v47, 0.0  ;;  %v6203_v4 = vpop.eup %6202 }
0x1c32   :  { %3079 = vadd.xlane.f32.xlu0 %v3078_v28  ;;  %v3075_v33 = vsel %vm238_vm3, %v6203_v4, 0.0 }
0x1c36   :  { %3076 = vadd.xlane.f32.xlu0 %v3075_v33  ;;  %v4940_v33 = vld [vmem:[%s7275_s5 + $0x28] sm:$0xff] }
0x1c4c   :  { %6054 = vrot.lane.b32.xlu0 %v6867_v17, %s6297_s15 }
0x1cbf   :  { %v3080_v50 = vpop.xlane.xlu0 %3079 }
0x1cc0   :  { %6204 = vrcp.f32 %v3080_v50 }
0x1cc3   :  { %v3077_v52 = vpop.xlane.xlu0 %3076 }
0x1cc4   :  { %6206 = vrcp.f32 %v3077_v52  ;;  %v4941_v52 = vld [vmem:[%s7275_s5 + $0x30] sm:$0xff] }
0x1cc7   :  { %v6055_v51 = vpop.permute.xlu0 %6054 }
0x1cc8   :  { %v6057_v41 = vunpack.i.h.bf16 %v6055_v51  ;;  %v6056_v42 = vunpack.i.l.bf16 %v6055_v51  ;;  %v4942_v51 = vld [vmem:[%s7275_s5 + $0x38] sm:$0xff] }
0x1cca   :  { %v5816_v44 = vpack.c.bf16 %v6057_v41, %v6056_v42  ;;  %v6205_v45 = vpop.eup %6204  ;;  %v7006_v41 = vpack.c.bf16 %v4942_v51, %v4941_v52 }
0x1ccb   :  { %v3084_v53 = vmul.f32 %v6205_v45, %v6201_v47 }
0x1ccc   :  { %5818 = vmatprep.subr.msk.bf16.mxu1 %vm6427_vm2, %v5816_v44 }
0x1cce   :  { %v6207_v46 = vpop.eup %6206 }
0x1ccf   :  { %v3083_v49 = vmul.f32 %v6207_v46, %v6203_v4  ;;  %v4939_v4 = vld [vmem:[%s7275_s5 + $0x20] sm:$0xff]  ;;  %s7291_s5 = smov 24  }
0x1cd0   :  { %v6997_v50 = vpack.c.bf16 %v4940_v33, %v4939_v4  ;;  %v7080_v4 = vld [vmem:[%s7273_s3] sm:$0xff] }
0x1cd1   :  { %5487 = vmatprep.mubr.msk.f32.mxu1 %vm238_vm3, %v3083_v49 }
0x1cd2   :  { %5488 = vmatmul.mubr.msk.f32.vlgmr.msra.gmra.mrb[28].mxu1 %vm238_vm3, %v3084_v53 }
0x1cd3   :  { %5821 = vmatpush3.bf16.xpose.msk.msra.mxu1 %vm6427_vm2, %v5816_v44  ;;  %5494 = vmatprep.mubr.msk.f32.mxu1 %vm154_vm1, %v3183_v55 }
0x1cd4   :  { %5835 = vmatprep.subr.bf16.mxu1 %v6823_v8 }
0x1cda   :  { %5495 = vmatmul.mubr.msk.f32.vlgmr.msra.gmra.mrb[30].mxu1 %vm154_vm1, %v3185_v56 }
0x1cdb   :  { %5837 = vmatpush3.bf16.msra.mxu1 %v6823_v8  ;;  %5523 = vmatprep.mubr.msk.f32.mxu1 %vm66_vm0, %v6262_v18 }
0x1cdc   :  { %5839 = vmatprep.subr.bf16.mxu1 %v6839_v12 }
0x1cdf   :  { %5841 = vmatpush3.bf16.msra.mxu1 %v6839_v12 }
0x1ce2   :  { %5524 = vmatmul.mubr.msk.f32.vlgmr.msra.gmra.mrb[32].mxu1 %vm66_vm0, %v6263_v20 }
0x1da5   :  { %v5489_v19 = vpop.f32.mrb[28].mxu1 }
0x1da6   :  { %v3163_v54 = vpop.f32.mrb[29].mxu1 }
0x1dad   :  { %v5496_v57 = vpop.f32.mrb[30].mxu1 }
0x1dae   :  { %v3270_v8 = vadd.f32 %v6892_v1, %v5496_v57  ;;  %v3264_v58 = vpop.f32.mrb[31].mxu1 }
0x1daf   :  { %v3265_v61 = vadd.f32 %v6898_v43, %v3264_v58 }
0x1db0   :  { %v3276_v13 = vsel %vm238_vm3, %v3270_v8, -inf }
0x1db1   :  { %3277 = vmax.xlane.f32.xlu1 %v3276_v13  ;;  %v3273_v38 = vsel %vm238_vm3, %v3265_v61, -inf }
0x1db2   :  { %3274 = vmax.xlane.f32.xlu0 %v3273_v38  ;;  %v7044_v38 = vld [vmem:[%s7278_s8 + $0x8] sm:$0xff] }
0x1db5   :  { %v7011_v42 = vpop.f32.mrb[32].mxu1 }
0x1db6   :  { %v7013_v44 = vpop.f32.mrb[33].mxu1 }
0x1db7   :  { %v7017_v46 = vpack.i.bf16 %v7011_v42, %v7013_v44  ;;  %5541 = vmatprep.mubr.msk.f32.mxu1 %vm154_vm1, %v7013_v44 }
0x1dc2   :  { %6059 = vrot.lane.b32.xlu1 %v6867_v17, %s6301_s19 }
0x1dc6   :  { %2966 = vrot.lane.b32.xlu1 %v6933_v21, %s7289_s1 }
0x1dca   :  { %3174 = vrot.lane.b32.xlu1 %v3163_v54, %s7290_s24 }
0x1e3e   :  { %v3278_v12 = vpop.xlane.xlu1 %3277 }
0x1e3f   :  { %v3280_v39 = vsub.f32 %v3270_v8, %v3278_v12  ;;  %v3275_v1 = vpop.xlane.xlu0 %3274  ;;  %v7049_v12 = vrot.slane %v7044_v38, %v987_v16 }
0x1e40   :  { %v3279_v3 = vsub.f32 %v3265_v61, %v3275_v1 }
0x1e41   :  { %v3283_v27 = vmul.f32 1.442695, %v3280_v39 }
0x1e42   :  { %v3281_v43 = vmul.f32 1.442695, %v3279_v3  ;;  %v6060_v29 = vpop.permute.xlu1 %6059 }
0x1e43   :  { %v6062_v22 = vunpack.i.h.bf16 %v6060_v29  ;;  %v6061_v23 = vunpack.i.l.bf16 %v6060_v29 }
0x1e44   :  { %6208 = vpow2.f32 %v3281_v43 }
0x1e45   :  { %v5822_v7 = vpack.c.bf16 %v6062_v22, %v6061_v23  ;;  %6210 = vpow2.f32 %v3283_v27 }
0x1e46   :  { %v2967_v30 = vpop.permute.xlu1 %2966 }
0x1e47   :  { %2971 = vst.msk [vmem:[#allocation2 + $0x8] sm:$0xff] %vm558_vm4, %v2967_v30  ;;  %5823 = vmatprep.subr.bf16.mxu0 %v5822_v7 }
0x1e48   :  { %5825 = vmatpush3.bf16.msra.mxu0 %v5822_v7 }
0x1e49   :  { %5827 = vmatprep.subr.bf16.mxu0 %v6997_v50 }
0x1e4a   :  { %v3175_v37 = vpop.permute.xlu1 %3174 }
0x1e4e   :  { %v6209_v17 = vpop.eup %6208 }
0x1e4f   :  { %v3285_v21 = vsel %vm238_vm3, %v6209_v17, 0.0  ;;  %v6211_v5 = vpop.eup %6210 }
0x1e50   :  { %3286 = vadd.xlane.f32.xlu0 %v3285_v21  ;;  %v3288_v31 = vsel %vm238_vm3, %v6211_v5, 0.0 }
0x1e54   :  { %3289 = vadd.xlane.f32.xlu0 %v3288_v31 }
0x1e6a   :  { %2964 = vrot.lane.b32.xlu0 %v6935_v24, %s7289_s1 }
0x1e6e   :  { %3176 = vrot.lane.b32.xlu0 %v5489_v19, %s7290_s24 }
0x1edd   :  { %v3287_v34 = vpop.xlane.xlu0 %3286 }
0x1ede   :  { %6212 = vrcp.f32 %v3287_v34 }
0x1ee1   :  { %v3290_v35 = vpop.xlane.xlu0 %3289 }
0x1ee2   :  { %6214 = vrcp.f32 %v3290_v35 }
0x1ee5   :  { %v2965_v36 = vpop.permute.xlu0 %2964 }
0x1ee6   :  { %2970 = vst.msk [vmem:[#allocation2] sm:$0xff] %vm558_vm4, %v2965_v36 }
0x1ee7   :  { %3180 = vst.msk [vmem:[#allocation2] sm:$0xff] %vm769_vm5, %v3175_v37 }
0x1ee8   :  { %v6213_v40 = vpop.eup %6212 }
0x1ee9   :  { %v3177_v2 = vpop.permute.xlu0 %3176  ;;  %v3293_v47 = vmul.f32 %v6213_v40, %v6209_v17 }
0x1eea   :  { %3181 = vst.msk [vmem:[#allocation2 + $0x8] sm:$0xff] %vm769_vm5, %v3177_v2  ;;  %v6078_v2 = vpack.i.bf16 %v6834_v11, %v6829_v63 }
0x1eeb   :  { %5501 = vmatprep.mubr.msk.f32.mxu0 %vm238_vm3, %v3293_v47  ;;  %v6073_v47 = vpack.i.bf16 %v6819_v62, %v6814_v9 }
0x1eec   :  { %v6215_v24 = vpop.eup %6214 }
0x1eed   :  { %v3294_v28 = vmul.f32 %v6215_v24, %v6211_v5  ;;  %v7074_v24 = vld [vmem:[%s7273_s3 + $0x8] sm:$0xff] }
0x1eef   :  { %5502 = vmatmul.mubr.msk.f32.vlgmr.msra.gmra.mrb[30].mxu0 %vm238_vm3, %v3294_v28 }
0x1ef0   :  { %5829 = vmatpush3.bf16.msra.mxu0 %v6997_v50 }
0x1ef1   :  { %5831 = vmatprep.subr.bf16.mxu0 %v7006_v41 }
0x1ef4   :  { %5833 = vmatpush3.bf16.msra.mxu0 %v7006_v41 }
0x1fc2   :  { %v5503_v45 = vpop.f32.mrb[30].mxu0 }
0x1fc3   :  { %3386 = vrot.lane.b32.xlu0 %v5503_v45, %s7291_s5  ;;  %v3373_v49 = vpop.f32.mrb[31].mxu0 }
0x1fc4   :  { %3384 = vrot.lane.b32.xlu1 %v3373_v49, %s7291_s5 }
0x1fc7   :  { %6069 = vrot.lane.b32.xlu0 %v7017_v46, %s6292_s26 }
0x1fc8   :  { %6064 = vrot.lane.b32.xlu1 %v7017_v46, %s6291_s0 }
0x2035   :  { %v3387_v53 = vpop.permute.xlu0 %3386 }
0x2036   :  { %3391 = vst.msk [vmem:[#allocation2 + $0x8] sm:$0xff] %vm980_vm6, %v3387_v53  ;;  %v3385_v55 = vpop.permute.xlu1 %3384 }
0x2037   :  { %3390 = vst.msk [vmem:[#allocation2] sm:$0xff] %vm980_vm6, %v3385_v55 }
0x2039   :  { %v6070_v8 = vpop.permute.xlu0 %6069 }
0x203a   :  { %v6065_v56 = vpop.permute.xlu1 %6064  ;;  %v6072_v58 = vunpack.i.h.bf16 %v6070_v8  ;;  %v6071_v61 = vunpack.i.l.bf16 %v6070_v8  ;;  %v3510_v8 = vrot.slane %v7044_v38, %v1101_v59 }
0x203b   :  { %v6067_v18 = vunpack.i.h.bf16 %v6065_v56  ;;  %v6066_v20 = vunpack.i.l.bf16 %v6065_v56 }
0x203c   :  { %v5860_v13 = vpack.c.bf16 %v6072_v58, %v6071_v61 }
0x203d   :  { %v5850_v19 = vpack.c.bf16 %v6067_v18, %v6066_v20  ;;  %v3393_v57 = vld [vmem:[#allocation2 + $0x8] sm:$0xff] }
0x203e   :  { %v3392_v54 = vld [vmem:[#allocation2] sm:$0xff] }
0x203f   :  { %5512 = vmatprep.mubr.msk.f32.mxu0 %vm66_vm0, %v3392_v54  ;;  %5852 = vmatprep.subr.msk.bf16.mxu1 %vm6427_vm2, %v5850_v19 }
0x2040   :  { %5513 = vmatmul.mubr.msk.f32.vlgmr.msra.gmra.mrb[32].mxu0 %vm66_vm0, %v3393_v57  ;;  %5855 = vmatpush3.bf16.xpose.msk.msra.mxu1 %vm6427_vm2, %v5850_v19 }
0x2041   :  { %5862 = vmatprep.subr.msk.bf16.mxu1 %vm6427_vm2, %v5860_v13 }
0x2047   :  { %5542 = vmatmul.mubr.msk.f32.vlgmr.msra.gmra.mrb[34].mxu1 %vm154_vm1, %v7011_v42 }
0x2048   :  { %5865 = vmatpush3.bf16.xpose.msk.msra.mxu1 %vm6427_vm2, %v5860_v13 }
0x2113   :  { %v5514_v39 = vpop.f32.mrb[32].mxu0 }
0x2114   :  { %v3476_v1 = vadd.f32 %v5514_v39, %v7049_v12  ;;  %v3470_v3 = vpop.f32.mrb[33].mxu0 }
0x2115   :  { %v3471_v27 = vadd.f32 %v3470_v3, %v7049_v12 }
0x2116   :  { %v3480_v43 = vadd.f32 %v3476_v1, %v6853_v10  ;;  %v3516_v1 = vrot.slane %v7044_v38, %v1107_v60 }
0x2117   :  { %v3479_v29 = vadd.f32 %v3471_v27, %v6851_v32 }
0x2118   :  { %v3484_v22 = vsel %vm66_vm0, %v3480_v43, 0.0 }
0x2119   :  { %3485 = vadd.xlane.f32.xlu0 %v3484_v22  ;;  %v3481_v23 = vsel %vm66_vm0, %v3479_v29, 0.0 }
0x211a   :  { %3482 = vadd.xlane.f32.xlu1 %v3481_v23  ;;  %v5543_v16 = vpop.f32.mrb[34].mxu1 }
0x211b   :  { %v3771_v7 = vpop.f32.mrb[35].mxu1  ;;  %v3777_v28 = vadd.f32 %v7074_v24, %v5543_v16 }
0x211c   :  { %v3772_v63 = vadd.f32 %v7080_v4, %v3771_v7 }
0x211d   :  { %v3783_v11 = vsel %vm238_vm3, %v3777_v28, -inf }
0x211e   :  { %v3780_v9 = vsel %vm238_vm3, %v3772_v63, -inf }
0x212b   :  { %3887 = vrot.lane.b32.xlu1 %v7011_v42, %s6290_s25 }
0x212f   :  { %3885 = vrot.lane.b32.xlu0 %v7013_v44, %s6290_s25 }
0x21a6   :  { %v3486_v30 = vpop.xlane.xlu0 %3485 }
0x21a7   :  { %v3488_v17 = vmul.f32 0.03125, %v3486_v30  ;;  %v3483_v21 = vpop.xlane.xlu1 %3482 }
0x21a8   :  { %v3487_v10 = vmul.f32 0.03125, %v3483_v21 }
0x21a9   :  { %v3490_v5 = vsub.f32 %v3480_v43, %v3488_v17 }
0x21aa   :  { %v3489_v32 = vsub.f32 %v3479_v29, %v3487_v10  ;;  %v3886_v31 = vpop.permute.xlu0 %3885 }
0x21ab   :  { %v3888_v34 = vpop.permute.xlu1 %3887  ;;  %5555 = vmatprep.mubr.msk.f32.mxu1 %vm154_vm1, %v3886_v31  ;;  %v3492_v35 = vmul.f32 %v3490_v5, %v3490_v5 }
0x21ac   :  { %5556 = vmatmul.mubr.msk.f32.vlgmr.msra.gmra.mrb[36].mxu1 %vm154_vm1, %v3888_v34  ;;  %v3491_v36 = vmul.f32 %v3489_v32, %v3489_v32 }
0x21ad   :  { %v3496_v37 = vsel %vm66_vm0, %v3492_v35, 0.0 }
0x21ae   :  { %3497 = vadd.xlane.f32.xlu0 %v3496_v37  ;;  %v3493_v40 = vsel %vm66_vm0, %v3491_v36, 0.0 }
0x21af   :  { %3494 = vadd.xlane.f32.xlu1 %v3493_v40 }
0x21c0   :  { %6079 = vrot.lane.b32.xlu1 %v6078_v2, %s6293_s11 }
0x21c4   :  { %6074 = vrot.lane.b32.xlu0 %v6073_v47, %s6293_s11 }
0x21e3   :  { %3784 = vmax.xlane.f32.xlu0 %v3783_v11 }
0x21e4   :  { %3781 = vmax.xlane.f32.xlu1 %v3780_v9 }
0x223b   :  { %v3498_v62 = vpop.xlane.xlu0 %3497 }
0x223c   :  { %v3500_v33 = vmul.f32 0.03125, %v3498_v62  ;;  %v3495_v52 = vpop.xlane.xlu1 %3494 }
0x223d   :  { %v3499_v51 = vmul.f32 0.03125, %v3495_v52 }
0x223e   :  { %v3502_v45 = vadd.f32 1e-05, %v3500_v33 }
0x223f   :  { %v3501_v49 = vadd.f32 1e-05, %v3499_v51  ;;  %v6075_v53 = vpop.permute.xlu0 %6074 }
0x2240   :  { %6216 = vrsqrt.f32 %v3502_v45  ;;  %v6077_v55 = vunpack.i.h.bf16 %v6075_v53  ;;  %v6076_v56 = vunpack.i.l.bf16 %v6075_v53  ;;  %v6080_v18 = vpop.permute.xlu1 %6079 }
0x2241   :  { %6218 = vrsqrt.f32 %v3501_v49  ;;  %v6082_v20 = vunpack.i.h.bf16 %v6080_v18  ;;  %v6081_v19 = vunpack.i.l.bf16 %v6080_v18 }
0x2242   :  { %v5842_v54 = vpack.c.bf16 %v6077_v55, %v6076_v56 }
0x2243   :  { %v5846_v57 = vpack.c.bf16 %v6082_v20, %v6081_v19 }
0x2244   :  { %5843 = vmatprep.subr.bf16.mxu0 %v5842_v54 }
0x2245   :  { %5845 = vmatpush3.bf16.msra.mxu0 %v5842_v54 }
0x2246   :  { %5847 = vmatprep.subr.bf16.mxu0 %v5846_v57 }
0x2249   :  { %5849 = vmatpush3.bf16.msra.mxu0 %v5846_v57 }
0x224a   :  { %v6217_v58 = vpop.eup %6216 }
0x224b   :  { %v6219_v61 = vpop.eup %6218  ;;  %v3506_v13 = vmul.f32 %v6217_v58, %v3490_v5 }
0x224c   :  { %v3505_v39 = vmul.f32 %v6219_v61, %v3489_v32 }
0x224d   :  { %v3512_v3 = vmul.f32 %v3510_v8, %v3506_v13 }
0x224e   :  { %v3511_v27 = vmul.f32 %v3510_v8, %v3505_v39 }
0x224f   :  { %v7093_v29 = vadd.f32 %v3516_v1, %v3512_v3 }
0x2250   :  { %v7091_v43 = vadd.f32 %v3516_v1, %v3511_v27 }
0x2252   :  { %5534 = vmatprep.mubr.msk.f32.mxu0 %vm66_vm0, %v7091_v43 }
0x2253   :  { %5535 = vmatmul.mubr.msk.f32.vlgmr.msra.gmra.mrb[34].mxu0 %vm66_vm0, %v7093_v29 }
0x2270   :  { %v3785_v59 = vpop.xlane.xlu0 %3784 }
0x2271   :  { %v3787_v22 = vsub.f32 %v3777_v28, %v3785_v59  ;;  %v3782_v23 = vpop.xlane.xlu1 %3781 }
0x2272   :  { %v3786_v16 = vsub.f32 %v3772_v63, %v3782_v23 }
0x2273   :  { %v3790_v7 = vmul.f32 1.442695, %v3787_v22 }
0x2274   :  { %v3788_v30 = vmul.f32 1.442695, %v3786_v16 }
0x2275   :  { %6220 = vpow2.f32 %v3790_v7 }
0x2276   :  { %6222 = vpow2.f32 %v3788_v30 }
0x227f   :  { %v5557_v60 = vpop.f32.mrb[36].mxu1  ;;  %v6221_v32 = vpop.eup %6220 }
0x2280   :  { %v3973_v17 = vadd.f32 %v7074_v24, %v5557_v60  ;;  %v3967_v21 = vpop.f32.mrb[37].mxu1  ;;  %v6223_v34 = vpop.eup %6222  ;;  %v3795_v35 = vsel %vm238_vm3, %v6221_v32, 0.0 }
0x2281   :  { %v3968_v10 = vadd.f32 %v7080_v4, %v3967_v21  ;;  %v3792_v36 = vsel %vm238_vm3, %v6223_v34, 0.0 }
0x2282   :  { %v3979_v5 = vsel %vm238_vm3, %v3973_v17, -inf }
0x2283   :  { %3980 = vmax.xlane.f32.xlu1 %v3979_v5  ;;  %v3976_v31 = vsel %vm238_vm3, %v3968_v10, -inf }
0x2284   :  { %3977 = vmax.xlane.f32.xlu0 %v3976_v31 }
0x2287   :  { %3796 = vadd.xlane.f32.xlu1 %v3795_v35 }
0x2288   :  { %3793 = vadd.xlane.f32.xlu0 %v3792_v36 }
0x2310   :  { %v3981_v37 = vpop.xlane.xlu1 %3980 }
0x2311   :  { %v3983_v40 = vsub.f32 %v3973_v17, %v3981_v37  ;;  %v3978_v2 = vpop.xlane.xlu0 %3977 }
0x2312   :  { %v3982_v47 = vsub.f32 %v3968_v10, %v3978_v2 }
0x2313   :  { %v3986_v28 = vmul.f32 1.442695, %v3983_v40 }
0x2314   :  { %v3984_v63 = vmul.f32 1.442695, %v3982_v47  ;;  %v3797_v9 = vpop.xlane.xlu1 %3796 }
0x2315   :  { %6224 = vpow2.f32 %v3986_v28  ;;  %v3794_v11 = vpop.xlane.xlu0 %3793 }
0x2316   :  { %6226 = vpow2.f32 %v3984_v63 }
0x2317   :  { %6228 = vrcp.f32 %v3794_v11 }
0x2318   :  { %6230 = vrcp.f32 %v3797_v9 }
0x231f   :  { %v6225_v62 = vpop.eup %6224 }
0x2320   :  { %v6227_v33 = vpop.eup %6226  ;;  %v3991_v52 = vsel %vm238_vm3, %v6225_v62, 0.0 }
0x2321   :  { %3992 = vadd.xlane.f32.xlu1 %v3991_v52  ;;  %v3988_v51 = vsel %vm238_vm3, %v6227_v33, 0.0  ;;  %v6229_v45 = vpop.eup %6228 }
0x2322   :  { %3989 = vadd.xlane.f32.xlu0 %v3988_v51  ;;  %v3800_v49 = vmul.f32 %v6229_v45, %v6223_v34  ;;  %v6231_v20 = vpop.eup %6230 }
0x2323   :  { %v3801_v19 = vmul.f32 %v6231_v20, %v6221_v32 }
0x2324   :  { %5548 = vmatprep.mubr.msk.f32.mxu0 %vm238_vm3, %v3800_v49 }
0x2326   :  { %v5536_v53 = vpop.f32.mrb[34].mxu0 }
0x2327   :  { %v3682_v55 = vpop.f32.mrb[35].mxu0 }
0x2328   :  { %v7108_v56 = vpack.i.bf16 %v5536_v53, %v3682_v55  ;;  %v5856_v18 = vpack.c.bf16 %v5536_v53, %v3682_v55 }
0x232a   :  { %5857 = vmatprep.subr.bf16.mxu0 %v5856_v18 }
0x232b   :  { %5859 = vmatpush3.bf16.msra.mxu0 %v5856_v18 }
0x232e   :  { %5549 = vmatmul.mubr.msk.f32.vlgmr.msra.gmra.mrb[36].mxu0 %vm238_vm3, %v3801_v19 }
0x2332   :  { %6089 = vrot.lane.b32.xlu1 %v7017_v46, %s6294_s12 }
0x2336   :  { %4097 = vrot.lane.b32.xlu1 %v7013_v44, %s6296_s14 }
0x2338   :  { %6084 = vrot.lane.b32.xlu0 %v7108_v56, %s6290_s25 }
0x233c   :  { %4099 = vrot.lane.b32.xlu0 %v7011_v42, %s6296_s14 }
0x23ae   :  { %v3993_v54 = vpop.xlane.xlu1 %3992 }
0x23af   :  { %6232 = vrcp.f32 %v3993_v54  ;;  %v3990_v57 = vpop.xlane.xlu0 %3989 }
0x23b0   :  { %6234 = vrcp.f32 %v3990_v57 }
0x23b2   :  { %v6090_v8 = vpop.permute.xlu1 %6089 }
0x23b3   :  { %v6085_v58 = vpop.permute.xlu0 %6084  ;;  %v6092_v61 = vunpack.i.h.bf16 %v6090_v8  ;;  %v6091_v13 = vunpack.i.l.bf16 %v6090_v8 }
0x23b4   :  { %v6087_v39 = vunpack.i.h.bf16 %v6085_v58  ;;  %v6086_v1 = vunpack.i.l.bf16 %v6085_v58 }
0x23b5   :  { %v5870_v27 = vpack.c.bf16 %v6092_v61, %v6091_v13 }
0x23b6   :  { %v5866_v3 = vpack.c.bf16 %v6087_v39, %v6086_v1  ;;  %v4098_v7 = vpop.permute.xlu1 %4097 }
0x23b7   :  { %v4100_v30 = vpop.permute.xlu0 %4099 }
0x23b8   :  { %5867 = vmatprep.subr.bf16.mxu0 %v5866_v3 }
0x23b9   :  { %v6233_v59 = vpop.eup %6232  ;;  %5869 = vmatpush3.bf16.msra.mxu0 %v5866_v3 }
0x23ba   :  { %v6235_v22 = vpop.eup %6234  ;;  %5872 = vmatprep.subr.msk.bf16.mxu0 %vm6427_vm2, %v5870_v27  ;;  %v3997_v16 = vmul.f32 %v6233_v59, %v6225_v62 }
0x23bb   :  { %v3996_v23 = vmul.f32 %v6235_v22, %v6227_v33 }
0x23bd   :  { %5562 = vmatprep.mubr.msk.f32.mxu0 %vm238_vm3, %v3996_v23 }
0x23be   :  { %5563 = vmatmul.mubr.msk.f32.vlgmr.msra.gmra.mrb[38].mxu0 %vm238_vm3, %v3997_v16 }
0x23bf   :  { %5569 = vmatprep.mubr.msk.f32.mxu0 %vm154_vm1, %v4098_v7 }
0x23c2   :  { %5875 = vmatpush3.bf16.xpose.msk.msra.mxu0 %vm6427_vm2, %v5870_v27 }
0x23c9   :  { %5570 = vmatmul.mubr.msk.f32.vlgmr.msra.gmra.mrb[40].mxu0 %vm154_vm1, %v4100_v30 }
0x2401   :  { %v5550_v60 = vpop.f32.mrb[36].mxu0 }
0x2402   :  { %3884 = vst.msk [vmem:[#allocation2 + $0x8] sm:$0xff] %vm154_vm1, %v5550_v60  ;;  %v3874_v17 = vpop.f32.mrb[37].mxu0 }
0x2403   :  { %3883 = vst.msk [vmem:[#allocation2] sm:$0xff] %vm154_vm1, %v3874_v17 }
0x2491   :  { %v7129_v21 = vpop.f32.mrb[38].mxu0 }
0x2492   :  { %v7131_v10 = vpop.f32.mrb[39].mxu0 }
0x249c   :  { %v5571_v5 = vpop.f32.mrb[40].mxu0 }
0x249d   :  { %v4185_v32 = vadd.f32 %v7074_v24, %v5571_v5  ;;  %v4179_v31 = vpop.f32.mrb[41].mxu0 }
0x249e   :  { %v4180_v34 = vadd.f32 %v7080_v4, %v4179_v31 }
0x249f   :  { %v4191_v35 = vsel %vm238_vm3, %v4185_v32, -inf }
0x24a0   :  { %4192 = vmax.xlane.f32.xlu0 %v4191_v35  ;;  %v4188_v36 = vsel %vm238_vm3, %v4180_v34, -inf }
0x24a1   :  { %4189 = vmax.xlane.f32.xlu1 %v4188_v36 }
0x252d   :  { %v4193_v37 = vpop.xlane.xlu0 %4192 }
0x252e   :  { %v4195_v40 = vsub.f32 %v4185_v32, %v4193_v37  ;;  %v4190_v2 = vpop.xlane.xlu1 %4189 }
0x252f   :  { %v4194_v47 = vsub.f32 %v4180_v34, %v4190_v2 }
0x2530   :  { %v4198_v28 = vmul.f32 1.442695, %v4195_v40 }
0x2531   :  { %v4196_v63 = vmul.f32 1.442695, %v4194_v47 }
0x2532   :  { %6236 = vpow2.f32 %v4198_v28 }
0x2533   :  { %6238 = vpow2.f32 %v4196_v63 }
0x253c   :  { %v6237_v11 = vpop.eup %6236 }
0x253d   :  { %v6239_v9 = vpop.eup %6238  ;;  %v4203_v62 = vsel %vm238_vm3, %v6237_v11, 0.0 }
0x253e   :  { %4204 = vadd.xlane.f32.xlu1 %v4203_v62  ;;  %v4200_v33 = vsel %vm238_vm3, %v6239_v9, 0.0 }
0x253f   :  { %4201 = vadd.xlane.f32.xlu0 %v4200_v33 }
0x254f   :  { %6099 = vrot.lane.b32.xlu1 %v7017_v46, %s6297_s15 }
0x2553   :  { %4307 = vrot.lane.b32.xlu1 %v7013_v44, %s6298_s16 }
0x2555   :  { %6094 = vrot.lane.b32.xlu0 %v7108_v56, %s6296_s14 }
0x2559   :  { %4309 = vrot.lane.b32.xlu0 %v7011_v42, %s6298_s16 }
0x25cb   :  { %v4205_v52 = vpop.xlane.xlu1 %4204 }
0x25cc   :  { %6240 = vrcp.f32 %v4205_v52  ;;  %v4202_v51 = vpop.xlane.xlu0 %4201 }
0x25cd   :  { %6242 = vrcp.f32 %v4202_v51 }
0x25cf   :  { %v6100_v45 = vpop.permute.xlu1 %6099 }
0x25d0   :  { %v6095_v49 = vpop.permute.xlu0 %6094  ;;  %v6102_v53 = vunpack.i.h.bf16 %v6100_v45  ;;  %v6101_v55 = vunpack.i.l.bf16 %v6100_v45 }
0x25d1   :  { %v6097_v18 = vunpack.i.h.bf16 %v6095_v49  ;;  %v6096_v20 = vunpack.i.l.bf16 %v6095_v49 }
0x25d2   :  { %v5880_v19 = vpack.c.bf16 %v6102_v53, %v6101_v55 }
0x25d3   :  { %v5876_v46 = vpack.c.bf16 %v6097_v18, %v6096_v20  ;;  %v4308_v8 = vpop.permute.xlu1 %4307 }
0x25d4   :  { %v4310_v58 = vpop.permute.xlu0 %4309 }
0x25d5   :  { %5877 = vmatprep.subr.bf16.mxu1 %v5876_v46 }
0x25d6   :  { %v6241_v44 = vpop.eup %6240  ;;  %5879 = vmatpush3.bf16.msra.mxu1 %v5876_v46 }
0x25d7   :  { %v6243_v54 = vpop.eup %6242  ;;  %5882 = vmatprep.subr.msk.bf16.mxu1 %vm6427_vm2, %v5880_v19  ;;  %v4209_v57 = vmul.f32 %v6241_v44, %v6237_v11 }
0x25d8   :  { %v4208_v42 = vmul.f32 %v6243_v54, %v6239_v9 }
0x25da   :  { %5576 = vmatprep.mubr.msk.f32.mxu1 %vm238_vm3, %v4208_v42 }
0x25db   :  { %5577 = vmatmul.mubr.msk.f32.vlgmr.msra.gmra.mrb[38].mxu1 %vm238_vm3, %v4209_v57 }
0x25dc   :  { %5583 = vmatprep.mubr.msk.f32.mxu1 %vm154_vm1, %v4308_v8 }
0x25df   :  { %5885 = vmatpush3.bf16.xpose.msk.msra.mxu1 %vm6427_vm2, %v5880_v19 }
0x25e6   :  { %5584 = vmatmul.mubr.msk.f32.vlgmr.msra.gmra.mrb[40].mxu1 %vm154_vm1, %v4310_v58 }
0x26ae   :  { %v5578_v61 = vpop.f32.mrb[38].mxu1 }
0x26af   :  { %v4288_v13 = vpop.f32.mrb[39].mxu1 }
0x26b9   :  { %v5585_v39 = vpop.f32.mrb[40].mxu1 }
0x26ba   :  { %v4395_v1 = vadd.f32 %v7074_v24, %v5585_v39  ;;  %v4389_v3 = vpop.f32.mrb[41].mxu1  ;;  %v4946_v39 = vld [vmem:[%s7276_s6 + $0x30] sm:$0xff] }
0x26bb   :  { %v4390_v27 = vadd.f32 %v7080_v4, %v4389_v3 }
0x26bc   :  { %v4401_v59 = vsel %vm238_vm3, %v4395_v1, -inf }
0x26bd   :  { %4402 = vmax.xlane.f32.xlu0 %v4401_v59  ;;  %v4398_v22 = vsel %vm238_vm3, %v4390_v27, -inf  ;;  %v4949_v59 = vld [vmem:[%s7277_s7 + $0x48] sm:$0xff] }
0x26be   :  { %4399 = vmax.xlane.f32.xlu1 %v4398_v22  ;;  %v4950_v22 = vld [vmem:[%s7277_s7 + $0x50] sm:$0xff] }
0x274a   :  { %v4403_v23 = vpop.xlane.xlu0 %4402 }
0x274b   :  { %v4405_v14 = vsub.f32 %v4395_v1, %v4403_v23  ;;  %v4400_v16 = vpop.xlane.xlu1 %4399  ;;  %v4947_v1 = vld [vmem:[%s7276_s6 + $0x38] sm:$0xff] }
0x274c   :  { %v4404_v7 = vsub.f32 %v4390_v27, %v4400_v16  ;;  %v5902_v3 = vpack.c.bf16 %v4947_v1, %v4946_v39  ;;  %v4948_v27 = vld [vmem:[%s7277_s7 + $0x40] sm:$0xff] }
0x274d   :  { %v4408_v30 = vmul.f32 1.442695, %v4405_v14  ;;  %v5906_v23 = vpack.c.bf16 %v4949_v59, %v4948_v27  ;;  %v4951_v14 = vld [vmem:[%s7277_s7 + $0x58] sm:$0xff]  ;;  %v4845_v27 = vrot.slane %v7044_v38, %v2443_v25 }
0x274e   :  { %v4406_v60 = vmul.f32 1.442695, %v4404_v7  ;;  %v5910_v16 = vpack.c.bf16 %v4951_v14, %v4950_v22  ;;  %v4952_v7 = vld [vmem:[%s7277_s7 + $0x60] sm:$0xff]  ;;  %v4851_v14 = vrot.slane %v7044_v38, %v2449_v26 }
0x274f   :  { %6244 = vpow2.f32 %v4408_v30  ;;  %v4953_v30 = vld [vmem:[%s7277_s7 + $0x68] sm:$0xff] }
0x2750   :  { %6246 = vpow2.f32 %v4406_v60  ;;  %v5914_v60 = vpack.c.bf16 %v4953_v30, %v4952_v7 }
0x2759   :  { %v6245_v17 = vpop.eup %6244 }
0x275a   :  { %v6247_v5 = vpop.eup %6246  ;;  %v4413_v24 = vsel %vm238_vm3, %v6245_v17, 0.0 }
0x275b   :  { %4414 = vadd.xlane.f32.xlu1 %v4413_v24  ;;  %v4410_v4 = vsel %vm238_vm3, %v6247_v5, 0.0 }
0x275c   :  { %4411 = vadd.xlane.f32.xlu0 %v4410_v4 }
0x276c   :  { %4089 = vrot.lane.b32.xlu1 %v7131_v10, %s7289_s1 }
0x2770   :  { %4091 = vrot.lane.b32.xlu1 %v7129_v21, %s7289_s1 }
0x2772   :  { %6104 = vrot.lane.b32.xlu0 %v7108_v56, %s6298_s16 }
0x2774   :  { %4301 = vrot.lane.b32.xlu1 %v5578_v61, %s7290_s24  ;;  %v4945_v61 = vld [vmem:[%s7276_s6 + $0x28] sm:$0xff] }
0x2776   :  { %4299 = vrot.lane.b32.xlu0 %v4288_v13, %s7290_s24 }
0x27e8   :  { %v4415_v32 = vpop.xlane.xlu1 %4414 }
0x27e9   :  { %6248 = vrcp.f32 %v4415_v32  ;;  %v4412_v31 = vpop.xlane.xlu0 %4411 }
0x27ea   :  { %6250 = vrcp.f32 %v4412_v31 }
0x27ec   :  { %v4090_v34 = vpop.permute.xlu1 %4089 }
0x27ed   :  { %4095 = vst.msk [vmem:[#allocation2] sm:$0xff] %vm558_vm4, %v4090_v34  ;;  %v6105_v35 = vpop.permute.xlu0 %6104  ;;  %v4631_v34 = vrot.slane %v7044_v38, %v2228_v48  ;;  %v4954_v48 = vld [vmem:[%s7277_s7 + $0x70] sm:$0xff] }
0x27ee   :  { %v6107_v36 = vunpack.i.h.bf16 %v6105_v35  ;;  %v6106_v10 = vunpack.i.l.bf16 %v6105_v35 }
0x27f0   :  { %v5886_v37 = vpack.c.bf16 %v6107_v36, %v6106_v10  ;;  %v4092_v40 = vpop.permute.xlu1 %4091  ;;  %v4637_v10 = vrot.slane %v7044_v38, %v2234_v6  ;;  %v5015_v6 = vld [vmem:[%s7279_s9 + $0x1] ss:$0 sm:$0xff] }
0x27f1   :  { %4096 = vst.msk [vmem:[#allocation2 + $0x8] sm:$0xff] %vm558_vm4, %v4092_v40  ;;  %v4300_v21 = vpop.permute.xlu0 %4299 }
0x27f2   :  { %4305 = vst.msk [vmem:[#allocation2] sm:$0xff] %vm769_vm5, %v4300_v21  ;;  %5887 = vmatprep.subr.bf16.mxu0 %v5886_v37 }
0x27f3   :  { %v6249_v56 = vpop.eup %6248  ;;  %5889 = vmatpush3.bf16.msra.mxu0 %v5886_v37 }
0x27f4   :  { %v6251_v2 = vpop.eup %6250  ;;  %v4302_v47 = vpop.permute.xlu1 %4301  ;;  %5891 = vmatprep.subr.bf16.mxu0 %v6997_v50  ;;  %v4419_v63 = vmul.f32 %v6249_v56, %v6245_v17 }
0x27f5   :  { %4306 = vst.msk [vmem:[#allocation2 + $0x8] sm:$0xff] %vm769_vm5, %v4302_v47  ;;  %v4418_v28 = vmul.f32 %v6251_v2, %v6247_v5 }
0x27f7   :  { %5590 = vmatprep.mubr.msk.f32.mxu0 %vm238_vm3, %v4418_v28  ;;  %v4955_v28 = vld [vmem:[%s7277_s7 + $0x78] sm:$0xff]  ;;  %s6304_s7 = smov [#allocation3]  }
0x27f8   :  { %5591 = vmatmul.mubr.msk.f32.vlgmr.msra.gmra.mrb[42].mxu0 %vm238_vm3, %v4419_v63  ;;  %v5918_v63 = vpack.c.bf16 %v4955_v28, %v4954_v48  ;;  %s4861_s9 = sshll.u32 %s6304_s7, 4  ;;  %s4862_s9 = int_to_ptr.vmem [resolvable:$true] %s4861_s9 }
0x27f9   :  { %5893 = vmatpush3.bf16.msra.mxu0 %v6997_v50  ;;  %s6266_s2 = scalar_lea.vmem %s4862_s9, 256  ;;  %p6271_p1 = scmp.lt.s32.totalorder %s4862_s9, %s4862_s9 }
0x27fa   :  { %5895 = vmatprep.subr.bf16.mxu0 %v7006_v41  ;;  %p6267_p0 = scmp.ne.s32.totalorder %s4862_s9, %s6266_s2  ;;  %p6272_p2 = scmp.lt.s32.totalorder %s6266_s2, %s6266_s2 }
0x27fc   :  { %p6273_p3 = por %p6272_p2, %p6271_p1 }
0x27fd   :  { %5897 = vmatpush3.bf16.msra.mxu0 %v7006_v41 }
0x27fe   :  { %5907 = vmatprep.subr.bf16.mxu0 %v5906_v23  ;;  %p6274_p4 = pnand %p6273_p3, %p6267_p0 }
0x28cb   :  { %v5592_v11 = vpop.f32.mrb[42].mxu0 }
0x28cc   :  { %4511 = vrot.lane.b32.xlu1 %v5592_v11, %s7291_s5  ;;  %v4498_v9 = vpop.f32.mrb[43].mxu0 }
0x28cd   :  { %4509 = vrot.lane.b32.xlu0 %v4498_v9, %s7291_s5 }
0x293e   :  { %v4512_v62 = vpop.permute.xlu1 %4511 }
0x293f   :  { %4516 = vst.msk [vmem:[#allocation2 + $0x8] sm:$0xff] %vm980_vm6, %v4512_v62  ;;  %v4510_v33 = vpop.permute.xlu0 %4509 }
0x2940   :  { %4515 = vst.msk [vmem:[#allocation2] sm:$0xff] %vm980_vm6, %v4510_v33 }
0x2946   :  { %v4518_v50 = vld [vmem:[#allocation2 + $0x8] sm:$0xff] }
0x2947   :  { %v4517_v52 = vld [vmem:[#allocation2] sm:$0xff] }
0x2948   :  { %5601 = vmatprep.mubr.msk.f32.mxu0 %vm66_vm0, %v4517_v52 }
0x2949   :  { %5602 = vmatmul.mubr.msk.f32.vlgmr.msra.gmra.mrb[44].mxu0 %vm66_vm0, %v4518_v50 }
0x294a   :  { %5909 = vmatpush3.bf16.msra.mxu0 %v5906_v23 }
0x294b   :  { %5911 = vmatprep.subr.bf16.mxu0 %v5910_v16 }
0x294e   :  { %5913 = vmatpush3.bf16.msra.mxu0 %v5910_v16 }
0x294f   :  { %5915 = vmatprep.subr.bf16.mxu0 %v5914_v60 }
0x2952   :  { %5917 = vmatpush3.bf16.msra.mxu0 %v5914_v60 }
0x2953   :  { %5919 = vmatprep.subr.bf16.mxu0 %v5918_v63 }
0x2956   :  { %5921 = vmatpush3.bf16.msra.mxu0 %v5918_v63 }
0x2a1c   :  { %v5603_v51 = vpop.f32.mrb[44].mxu0 }
0x2a1d   :  { %v4597_v41 = vadd.f32 %v5603_v51, %v7049_v12  ;;  %v4591_v45 = vpop.f32.mrb[45].mxu0  ;;  %v4732_v51 = vrot.slane %v7044_v38, %v2329_v0 }
0x2a1e   :  { %v4592_v49 = vadd.f32 %v4591_v45, %v7049_v12 }
0x2a1f   :  { %v4601_v53 = vadd.f32 %v4597_v41, %v7093_v29 }
0x2a20   :  { %v4600_v55 = vadd.f32 %v4592_v49, %v7091_v43  ;;  %v4944_v43 = vld [vmem:[%s7276_s6 + $0x20] sm:$0xff] }
0x2a21   :  { %v4605_v18 = vsel %vm66_vm0, %v4601_v53, 0.0  ;;  %v5898_v13 = vpack.c.bf16 %v4945_v61, %v4944_v43 }
0x2a22   :  { %4606 = vadd.xlane.f32.xlu1 %v4605_v18  ;;  %v4602_v20 = vsel %vm66_vm0, %v4600_v55, 0.0 }
0x2a23   :  { %4603 = vadd.xlane.f32.xlu0 %v4602_v20  ;;  %5899 = vmatprep.subr.bf16.mxu1 %v5898_v13 }
0x2a24   :  { %5901 = vmatpush3.bf16.msra.mxu1 %v5898_v13 }
0x2a25   :  { %5903 = vmatprep.subr.bf16.mxu1 %v5902_v3 }
0x2a28   :  { %5905 = vmatpush3.bf16.msra.mxu1 %v5902_v3 }
0x2aaf   :  { %v4607_v46 = vpop.xlane.xlu1 %4606 }
0x2ab0   :  { %v4609_v19 = vmul.f32 0.03125, %v4607_v46  ;;  %v4604_v44 = vpop.xlane.xlu0 %4603 }
0x2ab1   :  { %v4608_v54 = vmul.f32 0.03125, %v4604_v44 }
0x2ab2   :  { %v4611_v42 = vsub.f32 %v4601_v53, %v4609_v19 }
0x2ab3   :  { %v4610_v57 = vsub.f32 %v4600_v55, %v4608_v54 }
0x2ab4   :  { %v4613_v12 = vmul.f32 %v4611_v42, %v4611_v42 }
0x2ab5   :  { %v4612_v8 = vmul.f32 %v4610_v57, %v4610_v57 }
0x2ab6   :  { %v4617_v29 = vsel %vm66_vm0, %v4613_v12, 0.0 }
0x2ab7   :  { %v4614_v58 = vsel %vm66_vm0, %v4612_v8, 0.0 }
0x2ab8   :  { %4615 = vadd.xlane.f32.xlu0 %v4614_v58 }
0x2abc   :  { %4618 = vadd.xlane.f32.xlu0 %v4617_v29 }
0x2b45   :  { %v4616_v17 = vpop.xlane.xlu0 %4615 }
0x2b46   :  { %v4620_v5 = vmul.f32 0.03125, %v4616_v17 }
0x2b48   :  { %v4622_v24 = vadd.f32 1e-05, %v4620_v5 }
0x2b49   :  { %v4619_v4 = vpop.xlane.xlu0 %4618 }
0x2b4a   :  { %6252 = vrsqrt.f32 %v4622_v24  ;;  %v4621_v32 = vmul.f32 0.03125, %v4619_v4 }
0x2b4c   :  { %v4623_v31 = vadd.f32 1e-05, %v4621_v32 }
0x2b4e   :  { %6254 = vrsqrt.f32 %v4623_v31 }
0x2b54   :  { %v6253_v35 = vpop.eup %6252 }
0x2b55   :  { %v4626_v36 = vmul.f32 %v6253_v35, %v4610_v57 }
0x2b57   :  { %v4632_v37 = vmul.f32 %v4631_v34, %v4626_v36 }
0x2b58   :  { %v6255_v40 = vpop.eup %6254 }
0x2b59   :  { %v4627_v21 = vmul.f32 %v6255_v40, %v4611_v42  ;;  %v4638_v56 = vadd.f32 %v4637_v10, %v4632_v37 }
0x2b5b   :  { %v4633_v2 = vmul.f32 %v4631_v34, %v4627_v21  ;;  %5612 = vmatprep.mubr.msk.f32.mxu1 %vm66_vm0, %v4638_v56 }
0x2b5d   :  { %v4639_v47 = vadd.f32 %v4637_v10, %v4633_v2 }
0x2b5f   :  { %5613 = vmatmul.mubr.msk.f32.vlgmr.msra.gmra.mrb[42].mxu1 %vm66_vm0, %v4639_v47 }
0x2c32   :  { %v5614_v11 = vpop.f32.mrb[42].mxu1 }
0x2c33   :  { %v4724_v9 = vadd.f32 %v5614_v11, %v5015_v6  ;;  %v4718_v62 = vpop.f32.mrb[43].mxu1 }
0x2c34   :  { %v4719_v33 = vadd.f32 %v5015_v6, %v4718_v62 }
0x2c35   :  { %v4728_v50 = vmax.f32 %v4724_v9, 0.0 }
0x2c36   :  { %v4727_v52 = vmax.f32 %v4719_v33, 0.0 }
0x2c38   :  { %5631 = vmatprep.mubr.msk.f32.mxu0 %vm2331_vm7, %v4727_v52 }
0x2c39   :  { %5632 = vmatmul.mubr.msk.f32.vlgmr.msra.gmra.mrb[46].mxu0 %vm2331_vm7, %v4728_v50 }
0x2d0c   :  { %v5633_v41 = vpop.f32.mrb[46].mxu0 }
0x2d0d   :  { %v4811_v45 = vadd.f32 %v5633_v41, %v4732_v51  ;;  %v4805_v49 = vpop.f32.mrb[47].mxu0 }
0x2d0e   :  { %v4806_v53 = vadd.f32 %v4805_v49, %v4732_v51 }
0x2d0f   :  { %v4815_v55 = vadd.f32 %v4811_v45, %v4639_v47 }
0x2d10   :  { %v4814_v18 = vadd.f32 %v4806_v53, %v4638_v56 }
0x2d11   :  { %v4819_v20 = vsel %vm66_vm0, %v4815_v55, 0.0 }
0x2d12   :  { %4820 = vadd.xlane.f32.xlu0 %v4819_v20  ;;  %v4816_v46 = vsel %vm66_vm0, %v4814_v18, 0.0 }
0x2d13   :  { %4817 = vadd.xlane.f32.xlu1 %v4816_v46 }
0x2d9f   :  { %v4821_v19 = vpop.xlane.xlu0 %4820 }
0x2da0   :  { %v4823_v44 = vmul.f32 0.03125, %v4821_v19  ;;  %v4818_v54 = vpop.xlane.xlu1 %4817 }
0x2da1   :  { %v4822_v42 = vmul.f32 0.03125, %v4818_v54 }
0x2da2   :  { %v4825_v57 = vsub.f32 %v4815_v55, %v4823_v44 }
0x2da3   :  { %v4824_v8 = vsub.f32 %v4814_v18, %v4822_v42 }
0x2da4   :  { %v4827_v58 = vmul.f32 %v4825_v57, %v4825_v57 }
0x2da5   :  { %v4826_v0 = vmul.f32 %v4824_v8, %v4824_v8 }
0x2da6   :  { %v4831_v12 = vsel %vm66_vm0, %v4827_v58, 0.0 }
0x2da7   :  { %4832 = vadd.xlane.f32.xlu0 %v4831_v12  ;;  %v4828_v29 = vsel %vm66_vm0, %v4826_v0, 0.0 }
0x2da8   :  { %4829 = vadd.xlane.f32.xlu1 %v4828_v29 }
0x2e34   :  { %v4833_v43 = vpop.xlane.xlu0 %4832 }
0x2e35   :  { %v4835_v61 = vmul.f32 0.03125, %v4833_v43  ;;  %v4830_v13 = vpop.xlane.xlu1 %4829 }
0x2e36   :  { %v4834_v39 = vmul.f32 0.03125, %v4830_v13 }
0x2e37   :  { %v4837_v1 = vadd.f32 1e-05, %v4835_v61 }
0x2e38   :  { %v4836_v3 = vadd.f32 1e-05, %v4834_v39 }
0x2e39   :  { %6256 = vrsqrt.f32 %v4837_v1 }
0x2e3a   :  { %6258 = vrsqrt.f32 %v4836_v3 }
0x2e43   :  { %v6257_v59 = vpop.eup %6256 }
0x2e44   :  { %v6259_v22 = vpop.eup %6258  ;;  %v4841_v23 = vmul.f32 %v6257_v59, %v4825_v57 }
0x2e45   :  { %v4840_v16 = vmul.f32 %v6259_v22, %v4824_v8 }
0x2e46   :  { %v4847_v7 = vmul.f32 %v4845_v27, %v4841_v23 }
0x2e47   :  { %v4846_v30 = vmul.f32 %v4845_v27, %v4840_v16 }
0x2e48   :  { %v4853_v60 = vadd.f32 %v4851_v14, %v4847_v7 }
0x2e49   :  { %v4852_v17 = vadd.f32 %v4851_v14, %v4846_v30 }
0x2e4a   :  { %4855 = vst.msk [vmem:[#allocation3 + $0x8] sm:$0xff] %vm66_vm0, %v4853_v60 }
0x2e4b   :  { %4854 = vst.msk [vmem:[#allocation3] sm:$0xff] %vm66_vm0, %v4852_v17 }
0x2e4c   :  { %6277 = shalt.err (!%p6274_p4)
}
0x2e4d   :  { %s6278_s11 = scalar_lea.hbm %s7280_s10, 256 }
0x2e4e   :  { %p6279_p5 = scmp.ne.s32.totalorder %s7280_s10, %s6278_s11  ;;  %p6282_p6 = scmp.lt.u32.totalorder %s6278_s11, %s7280_s10 }
0x2e50   :  { %p6284_p7 = pnand %p6282_p6, %p6279_p5 }
0x2e52   :  { %6287 = shalt.err (!%p6284_p7)
}
0x2e53   :  { %s6305_s13 = smov 128  }
0x2e54   :  { %4867 = dma.vmem_to_hbm [thread:$0]  %s4862_s9, 256, %s7280_s10, [#allocation4], %s6305_s13, %s6305_s13, %s7289_s1  }
0x2e55   :  { %6288 = dma.done.wait [#allocation4], 256  }
0x2e56   :  { %6289 = vsyncadd [#allocation4], 4294967040 }
0x2e57   :  { %4871 = vsyncpa [#allocation4], 1 }

</bundles_post_ra>
